<compile_context>
chip_gen: v7x
topology: tpu7x:2x2x1
jax: 0.10.0
libtpu: 0.0.40
codegen_flags: <defaults>
</compile_context>

<pallas_src>
import math
import jax
import jax.numpy as jnp
from jax.experimental import pallas as pl
from jax.experimental.pallas import tpu as pltpu

# ---------------- static configuration (small, consistent with the module) ---
B, T, N = 2, 8, 8
NODE_FEATURES = 4
OUT_CHANNELS = 32          # reference config uses 64 == hidden_dim; keep equal
HIDDEN_DIM = 32            # must equal OUT_CHANNELS (dif_hid / residual require it)
NODE_EMB_DIM = 8
TIME_EMB_DIM = 4
NUM_HEADS = 4
HEAD_DIM = OUT_CHANNELS // NUM_HEADS
GATE_IN = 2 * NODE_EMB_DIM + 2 * TIME_EMB_DIM          # 24
FUSED_IN = NODE_FEATURES + GATE_IN                     # 28
R_TOT = B * T * N                                      # 128 rows, (t, b, n) order
R_SEL = B * N                                          # 16 last-timestep rows
R_START = R_TOT - R_SEL                                # 112 (sublane-tile aligned)
L = B * T
LN_EPS = 1e-5


# =============================================================================
# Single fused kernel: decoupling linear + estimation gate + low-pass filter +
# dif_hid + residual LayerNorm + GRU(H=0) + 4-head masked self-attention +
# final forecasts — only the last-timestep totals leave the chip.
# =============================================================================
def fused_kernel(xg_ref, w1_ref, b1_ref, wdf_ref, bdf_ref, wzo_ref, bzo_ref,
                 wqkv_ref, bqkv_ref, wsm_ref, bsm_ref, vecs_ref, out_ref):
    f32 = jnp.float32
    C = OUT_CHANNELS

    xg = xg_ref[...]                                              # [128, 28]

    # --- DecouplingBlock.linear + EstimationGate hidden (block-diag matmul) --
    r1 = jnp.dot(xg, w1_ref[...], preferred_element_type=f32) + b1_ref[...]
    xl = r1[:, :C]                                                # x @ W_lin + b
    hg = jnp.maximum(r1[:, C:], 0.0)                              # relu(gfeat @ W_g1 + b)

    # --- EstimationGate output ---
    gate = jax.nn.sigmoid(
        jnp.dot(hg, wsm_ref[:, 0:1], preferred_element_type=f32) + bsm_ref[:, 0:1])
    gated = xl * gate                                             # [128, C]

    # --- LowPassFilter: closed-form Nyquist-bin removal along channels ---
    alt = vecs_ref[0:1, :]                                        # (-1)^k row
    nyq = jnp.sum(gated * alt, axis=-1, keepdims=True) * (1.0 / C)
    diff = gated - nyq * alt                                      # diffusion_signal

    # --- dif_hid + diffusion_forcast in one concatenated matmul ---
    df = jnp.dot(diff, wdf_ref[...], preferred_element_type=f32) + bdf_ref[...]
    dhid = df[:, :C]                                              # [128, C]

    # --- ResidualDecomp: LayerNorm(xl - relu(dhid)) ---
    u = xl - jnp.maximum(dhid, 0.0)
    mu = jnp.mean(u, axis=-1, keepdims=True)
    var = jnp.mean((u - mu) * (u - mu), axis=-1, keepdims=True)
    ln = (u - mu) * jax.lax.rsqrt(var + LN_EPS) * vecs_ref[1:2, :] + vecs_ref[2:3, :]
    inh = xl - diff + ln                                          # inherent_signal

    # --- GRU with H = 0: update + out gates in one concatenated matmul ---
    zo = jnp.dot(inh, wzo_ref[...], preferred_element_type=f32) + bzo_ref[...]
    z = jax.nn.sigmoid(zo[:, :C])
    htil = jnp.tanh(zo[:, C:])
    g = (1.0 - z) * htil                                          # [128, C]

    # --- Multihead self-attention over the (b,t) sequence, batched by node ---
    # QKV in one wide matmul; queries only for the last-timestep rows.
    qkv = jnp.dot(g, wqkv_ref[...], preferred_element_type=f32) + bqkv_ref[...]
    q_sel = qkv[R_START:, :C]                                     # [16, C]
    k = qkv[:, C:2 * C]                                           # [128, C]
    v = qkv[:, 2 * C:3 * C]                                       # [128, C]

    # block mask: rows attend only within their own node (same row % N)
    rown = jax.lax.broadcasted_iota(jnp.int32, (R_SEL, R_TOT), 0) % N
    coln = jax.lax.broadcasted_iota(jnp.int32, (R_SEL, R_TOT), 1) % N
    same_node = rown == coln

    scale = 1.0 / math.sqrt(HEAD_DIM)
    heads = []
    for hh in range(NUM_HEADS):
        sl = slice(hh * HEAD_DIM, (hh + 1) * HEAD_DIM)
        qh = q_sel[:, sl] * scale                                 # [16, hd]
        kh = k[:, sl]                                             # [128, hd]
        vh = v[:, sl]                                             # [128, hd]
        s = jax.lax.dot_general(qh, kh, (((1,), (1,)), ((), ())),
                                preferred_element_type=f32)       # [16, 128]
        s = jnp.where(same_node, s, -1e30)
        m = jnp.max(s, axis=-1, keepdims=True)
        e = jnp.exp(s - m)
        l = jnp.sum(e, axis=-1, keepdims=True)
        pv = jnp.dot(e, vh, preferred_element_type=f32)           # [16, hd]
        heads.append(pv * pl.reciprocal(l, approx=True))
    att = jnp.concatenate(heads, axis=-1)                         # [16, C]

    # --- forecasts (out_proj ∘ forecast folded into one (C,1) column) ---
    ifore = jnp.dot(att, wsm_ref[:, 1:2], preferred_element_type=f32) + bsm_ref[:, 1:2]
    dfore = df[R_START:, C:C + 1]                                 # last-t diffusion fcst
    out_ref[...] = ifore + dfore                                  # [16, 1], rows (b, n)


def run_fused(xg, fw):
    vmem = lambda: pl.BlockSpec(memory_space=pltpu.MemorySpace.VMEM)
    return pl.pallas_call(
        fused_kernel,
        out_shape=jax.ShapeDtypeStruct((R_SEL, 1), jnp.float32),
        in_specs=[vmem() for _ in range(12)],
        out_specs=vmem(),
    )(xg, fw['W1'], fw['b1'], fw['W_df'], fw['b_df'], fw['W_zo'], fw['b_zo'],
      fw['W_qkv'], fw['b_qkv'], fw['W_sm'], fw['b_sm'], fw['vecs'])


# =============================================================================
# Full forward (glue = tiny reshapes / broadcasts / weight packing only)
# =============================================================================
@jax.jit
def decoupled_model_forward(x, edge_index, emb_u, emb_d, month, year, p):
    del edge_index  # the reference GRU/attention never use the graph structure
    b, t, n, _ = x.shape
    eu = jnp.broadcast_to(emb_u[None, None], (b, t, n, NODE_EMB_DIM))
    ed = jnp.broadcast_to(emb_d[None, None], (b, t, n, NODE_EMB_DIM))
    gfeat = jnp.concatenate([month, year, eu, ed], axis=-1)       # [B,T,N,24]

    # rows ordered (t, b, n): per-node attention groups are "row % N" and the
    # last-timestep rows are the trailing, tile-aligned B*N rows.
    xg = jnp.concatenate([x, gfeat], axis=-1).transpose(1, 0, 2, 3)
    xg = xg.reshape(t * b * n, FUSED_IN)                          # [128, 28]

    # ---- pack / fuse weights (tiny XLA ops, done once per call) ----
    fw = {}
    w1 = jnp.zeros((FUSED_IN, 2 * OUT_CHANNELS), jnp.float32)
    w1 = w1.at[:NODE_FEATURES, :OUT_CHANNELS].set(p['W_lin'])
    w1 = w1.at[NODE_FEATURES:, OUT_CHANNELS:].set(p['W_g1'])
    fw['W1'] = w1
    fw['b1'] = jnp.concatenate([p['b_lin'], p['b_g1']], axis=-1)
    fw['W_df'] = jnp.concatenate([p['W_dif'], p['W_fore']], axis=-1)   # [32,33]
    fw['b_df'] = jnp.concatenate([p['b_dif'], p['b_fore']], axis=-1)
    fw['W_zo'] = jnp.concatenate([p['W_zx'], p['W_ox']], axis=-1)      # [32,64]
    fw['b_zo'] = jnp.concatenate([p['b_z'], p['b_o']], axis=-1)
    fw['W_qkv'] = jnp.concatenate([p['W_q'], p['W_k'], p['W_v']], axis=-1)
    fw['b_qkv'] = jnp.concatenate([p['b_q'], p['b_k'], p['b_v']], axis=-1)
    w_opf = p['W_op'] @ p['W_fore']                # fold out_proj ∘ forecast
    b_opf = p['b_op'] @ p['W_fore'] + p['b_fore']
    fw['W_sm'] = jnp.concatenate([p['W_g2'], w_opf], axis=-1)          # [32, 2]
    fw['b_sm'] = jnp.concatenate([p['b_g2'], b_opf], axis=-1)          # [1, 2]
    fw['vecs'] = jnp.concatenate([p['alt'], p['ln_g'], p['ln_b']], axis=0)

    out = run_fused(xg, fw)                        # [B*N, 1], rows = (b, n)
    return out.reshape(b, n)[:, None, :, None]     # [B, 1, N, 1]


# =============================================================================
# Pure-JAX reference (independent path: jnp.fft low-pass, unfused weights,
# full-sequence attention, slice at the end)
# =============================================================================
def reference_forward(x, emb_u, emb_d, month, year, p):
    b, t, n, _ = x.shape
    eu = jnp.broadcast_to(emb_u[None, None], (b, t, n, NODE_EMB_DIM))
    ed = jnp.broadcast_to(emb_d[None, None], (b, t, n, NODE_EMB_DIM))
    gfeat = jnp.concatenate([month, year, eu, ed], axis=-1)
    xl = x @ p['W_lin'] + p['b_lin']
    h = jax.nn.relu(gfeat @ p['W_g1'] + p['b_g1'])
    gate = jax.nn.sigmoid(h @ p['W_g2'] + p['b_g2'])
    gated = xl * gate
    xf = jnp.fft.fft(gated, axis=-1)
    freqs = jnp.fft.fftfreq(gated.shape[-1])
    diff = jnp.real(jnp.fft.ifft(xf * (jnp.abs(freqs) < 0.5), axis=-1)
                    ).astype(jnp.float32)
    dfore = diff @ p['W_fore'] + p['b_fore']
    dhid = diff @ p['W_dif'] + p['b_dif']
    u = xl - jax.nn.relu(dhid)
    mu = u.mean(-1, keepdims=True)
    var = ((u - mu) ** 2).mean(-1, keepdims=True)
    ln = (u - mu) / jnp.sqrt(var + LN_EPS) * p['ln_g'] + p['ln_b']
    inh = xl - diff + ln
    z = jax.nn.sigmoid(inh @ p['W_zx'] + p['b_z'])
    htil = jnp.tanh(inh @ p['W_ox'] + p['b_o'])
    g = (1.0 - z) * htil
    ga = g.transpose(2, 0, 1, 3).reshape(n, b * t, OUT_CHANNELS)
    q = ga @ p['W_q'] + p['b_q']
    k = ga @ p['W_k'] + p['b_k']
    v = ga @ p['W_v'] + p['b_v']
    qh = q.reshape(n, b * t, NUM_HEADS, HEAD_DIM).transpose(0, 2, 1, 3)
    kh = k.reshape(n, b * t, NUM_HEADS, HEAD_DIM).transpose(0, 2, 1, 3)
    vh = v.reshape(n, b * t, NUM_HEADS, HEAD_DIM).transpose(0, 2, 1, 3)
    s = jnp.einsum('nhld,nhmd->nhlm', qh, kh) / math.sqrt(HEAD_DIM)
    pm = jax.nn.softmax(s, axis=-1)
    o = jnp.einsum('nhlm,nhmd->nhld', pm, vh).transpose(0, 2, 1, 3)
    o = o.reshape(n, b * t, OUT_CHANNELS) @ p['W_op'] + p['b_op']
    ifore = (o @ p['W_fore'] + p['b_fore']).reshape(n, b, t, 1).transpose(1, 2, 0, 3)
    return (ifore + dfore)[:, -1:, :, :]


# =============================================================================
# Deterministic parameter init (shapes implied by the module's __init__)
# =============================================================================
def init_params(key):
    ks = list(jax.random.split(key, 24))
    nxt = iter(ks)
    m = lambda shape, s: (s * jax.random.normal(next(nxt), shape)).astype(jnp.float32)
    p = {}
    p['W_lin'] = m((NODE_FEATURES, OUT_CHANNELS), 0.30)
    p['b_lin'] = m((1, OUT_CHANNELS), 0.10)
    p['W_g1'] = m((GATE_IN, HIDDEN_DIM), 0.20)
    p['b_g1'] = m((1, HIDDEN_DIM), 0.10)
    p['W_g2'] = m((HIDDEN_DIM, 1), 0.20)
    p['b_g2'] = m((1, 1), 0.10)
    p['W_fore'] = m((OUT_CHANNELS, 1), 0.20)     # shared linear(out_channels, 1)
    p['b_fore'] = m((1, 1), 0.10)
    p['W_dif'] = m((HIDDEN_DIM, HIDDEN_DIM), 0.15)
    p['b_dif'] = m((1, HIDDEN_DIM), 0.10)
    p['ln_g'] = jnp.ones((1, HIDDEN_DIM), jnp.float32)   # LayerNorm default init
    p['ln_b'] = jnp.zeros((1, HIDDEN_DIM), jnp.float32)
    # GRU gate weights: only the X-half matters since H == 0
    p['W_zx'] = m((OUT_CHANNELS, OUT_CHANNELS), 0.15)
    p['b_z'] = m((1, OUT_CHANNELS), 0.10)
    p['W_ox'] = m((OUT_CHANNELS, OUT_CHANNELS), 0.15)
    p['b_o'] = m((1, OUT_CHANNELS), 0.10)
    # MultiheadAttention in_proj (split) + out_proj
    p['W_q'] = m((OUT_CHANNELS, OUT_CHANNELS), 0.20)
    p['b_q'] = m((1, OUT_CHANNELS), 0.05)
    p['W_k'] = m((OUT_CHANNELS, OUT_CHANNELS), 0.20)
    p['b_k'] = m((1, OUT_CHANNELS), 0.05)
    p['W_v'] = m((OUT_CHANNELS, OUT_CHANNELS), 0.20)
    p['b_v'] = m((1, OUT_CHANNELS), 0.05)
    p['W_op'] = m((OUT_CHANNELS, OUT_CHANNELS), 0.20)
    p['b_op'] = m((1, OUT_CHANNELS), 0.05)
    # (-1)^k vector for the closed-form Nyquist-bin removal
    p['alt'] = jnp.where(jnp.arange(OUT_CHANNELS) % 2 == 0, 1.0, -1.0
                         ).astype(jnp.float32).reshape(1, OUT_CHANNELS)
    return p


if __name__ == "__main__":
    key = jax.random.PRNGKey(0)
    kx, ku, kd, km, ky, kp = jax.random.split(key, 6)
    x = jax.random.normal(kx, (B, T, N, NODE_FEATURES), jnp.float32)
    emb_u = jax.random.normal(ku, (N, NODE_EMB_DIM), jnp.float32)
    emb_d = jax.random.normal(kd, (N, NODE_EMB_DIM), jnp.float32)
    month = jax.random.normal(km, (B, T, N, TIME_EMB_DIM), jnp.float32)
    year = jax.random.normal(ky, (B, T, N, TIME_EMB_DIM), jnp.float32)
    # ring-graph edge_index; unused — the reference GRU never applies a graph conv
    edge_index = jnp.stack([jnp.arange(N), (jnp.arange(N) + 1) % N])
    params = init_params(kp)

    out = decoupled_model_forward(x, edge_index, emb_u, emb_d, month, year, params)
    out = jax.block_until_ready(out)
    assert out.shape == (B, 1, N, 1), out.shape

    ref = reference_forward(x, emb_u, emb_d, month, year, params)
    err = float(jnp.max(jnp.abs(out - ref)))
    if err < 2e-3:
        print("KERNEL_OK")
    else:
        print(f"MISMATCH max_abs_err={err}")
</pallas_src>

<mosaic_0001>
module attributes {stable_mosaic.version = 11 : i64} {
  func.func @fused_kernel(%arg0: memref<128x28xf32, #tpu.memory_space<vmem>>, %arg1: memref<28x64xf32, #tpu.memory_space<vmem>>, %arg2: memref<1x64xf32, #tpu.memory_space<vmem>>, %arg3: memref<32x33xf32, #tpu.memory_space<vmem>>, %arg4: memref<1x33xf32, #tpu.memory_space<vmem>>, %arg5: memref<32x64xf32, #tpu.memory_space<vmem>>, %arg6: memref<1x64xf32, #tpu.memory_space<vmem>>, %arg7: memref<32x96xf32, #tpu.memory_space<vmem>>, %arg8: memref<1x96xf32, #tpu.memory_space<vmem>>, %arg9: memref<32x2xf32, #tpu.memory_space<vmem>>, %arg10: memref<1x2xf32, #tpu.memory_space<vmem>>, %arg11: memref<3x32xf32, #tpu.memory_space<vmem>>, %arg12: memref<16x1xf32, #tpu.memory_space<vmem>>) attributes {dimension_semantics = [], scalar_prefetch = 0 : i64, scratch_operands = 0 : i64, tpu.core_type = #tpu.core_type<tc>} {
    %c0 = arith.constant 0 : index
    %c0_0 = arith.constant 0 : index
    %0 = vector.load %arg0[%c0, %c0_0] : memref<128x28xf32, #tpu.memory_space<vmem>>, vector<128x28xf32>
    %c0_1 = arith.constant 0 : index
    %c0_2 = arith.constant 0 : index
    %1 = vector.load %arg1[%c0_1, %c0_2] : memref<28x64xf32, #tpu.memory_space<vmem>>, vector<28x64xf32>
    %cst = arith.constant dense<0.000000e+00> : vector<128x64xf32>
    %2 = tpu.matmul %0, %1, %cst {dimension_numbers = #tpu.dot_dimension_numbers<[1], [0], [0], [1], [0, 0, 1, 1], [], []>} : vector<128x28xf32>, vector<28x64xf32>, vector<128x64xf32> -> vector<128x64xf32>
    %c0_3 = arith.constant 0 : index
    %c0_4 = arith.constant 0 : index
    %3 = vector.load %arg2[%c0_3, %c0_4] : memref<1x64xf32, #tpu.memory_space<vmem>>, vector<1x64xf32>
    %4 = vector.broadcast %3 : vector<1x64xf32> to vector<128x64xf32>
    %5 = arith.addf %2, %4 : vector<128x64xf32>
    %6 = vector.extract_strided_slice %5 {offsets = [0, 0], sizes = [128, 32], strides = [1, 1]} : vector<128x64xf32> to vector<128x32xf32>
    %7 = vector.extract_strided_slice %5 {offsets = [0, 32], sizes = [128, 32], strides = [1, 1]} : vector<128x64xf32> to vector<128x32xf32>
    %cst_5 = arith.constant 0.000000e+00 : f32
    %8 = vector.broadcast %cst_5 : f32 to vector<128x32xf32>
    %9 = arith.maximumf %7, %8 : vector<128x32xf32>
    %c0_6 = arith.constant 0 : index
    %c0_7 = arith.constant 0 : index
    %10 = vector.load %arg9[%c0_6, %c0_7] : memref<32x2xf32, #tpu.memory_space<vmem>>, vector<32x1xf32>
    %cst_8 = arith.constant dense<0.000000e+00> : vector<128x1xf32>
    %11 = tpu.matmul %9, %10, %cst_8 {dimension_numbers = #tpu.dot_dimension_numbers<[1], [0], [0], [1], [0, 0, 1, 1], [], []>} : vector<128x32xf32>, vector<32x1xf32>, vector<128x1xf32> -> vector<128x1xf32>
    %c0_9 = arith.constant 0 : index
    %c0_10 = arith.constant 0 : index
    %12 = vector.load %arg10[%c0_9, %c0_10] : memref<1x2xf32, #tpu.memory_space<vmem>>, vector<1x1xf32>
    %13 = vector.broadcast %12 : vector<1x1xf32> to vector<128x1xf32>
    %14 = arith.addf %11, %13 : vector<128x1xf32>
    %15 = arith.negf %14 : vector<128x1xf32>
    %16 = math.exp %15 : vector<128x1xf32>
    %cst_11 = arith.constant 1.000000e+00 : f32
    %17 = vector.broadcast %cst_11 : f32 to vector<128x1xf32>
    %18 = arith.addf %17, %16 : vector<128x1xf32>
    %19 = arith.divf %17, %18 : vector<128x1xf32>
    %20 = vector.broadcast %19 : vector<128x1xf32> to vector<128x32xf32>
    %21 = arith.mulf %6, %20 : vector<128x32xf32>
    %c0_12 = arith.constant 0 : index
    %c0_13 = arith.constant 0 : index
    %22 = vector.load %arg11[%c0_12, %c0_13] : memref<3x32xf32, #tpu.memory_space<vmem>>, vector<1x32xf32>
    %23 = vector.broadcast %22 : vector<1x32xf32> to vector<128x32xf32>
    %24 = arith.mulf %21, %23 : vector<128x32xf32>
    %cst_14 = arith.constant dense<0.000000e+00> : vector<128xf32>
    %25 = vector.multi_reduction <add>, %24, %cst_14 [1] : vector<128x32xf32> to vector<128xf32>
    %26 = vector.shape_cast %25 : vector<128xf32> to vector<128x1xf32>
    %cst_15 = arith.constant 3.125000e-02 : f32
    %27 = vector.broadcast %cst_15 : f32 to vector<128x1xf32>
    %28 = arith.mulf %26, %27 : vector<128x1xf32>
    %29 = vector.broadcast %28 : vector<128x1xf32> to vector<128x32xf32>
    %30 = vector.broadcast %22 : vector<1x32xf32> to vector<128x32xf32>
    %31 = arith.mulf %29, %30 : vector<128x32xf32>
    %32 = arith.subf %21, %31 : vector<128x32xf32>
    %c0_16 = arith.constant 0 : index
    %c0_17 = arith.constant 0 : index
    %33 = vector.load %arg3[%c0_16, %c0_17] : memref<32x33xf32, #tpu.memory_space<vmem>>, vector<32x33xf32>
    %cst_18 = arith.constant dense<0.000000e+00> : vector<128x33xf32>
    %34 = tpu.matmul %32, %33, %cst_18 {dimension_numbers = #tpu.dot_dimension_numbers<[1], [0], [0], [1], [0, 0, 1, 1], [], []>} : vector<128x32xf32>, vector<32x33xf32>, vector<128x33xf32> -> vector<128x33xf32>
    %c0_19 = arith.constant 0 : index
    %c0_20 = arith.constant 0 : index
    %35 = vector.load %arg4[%c0_19, %c0_20] : memref<1x33xf32, #tpu.memory_space<vmem>>, vector<1x33xf32>
    %36 = vector.broadcast %35 : vector<1x33xf32> to vector<128x33xf32>
    %37 = arith.addf %34, %36 : vector<128x33xf32>
    %38 = vector.extract_strided_slice %37 {offsets = [0, 0], sizes = [128, 32], strides = [1, 1]} : vector<128x33xf32> to vector<128x32xf32>
    %cst_21 = arith.constant 0.000000e+00 : f32
    %39 = vector.broadcast %cst_21 : f32 to vector<128x32xf32>
    %40 = arith.maximumf %38, %39 : vector<128x32xf32>
    %41 = arith.subf %6, %40 : vector<128x32xf32>
    %cst_22 = arith.constant dense<0.000000e+00> : vector<128xf32>
    %42 = vector.multi_reduction <add>, %41, %cst_22 [1] : vector<128x32xf32> to vector<128xf32>
    %43 = vector.shape_cast %42 : vector<128xf32> to vector<128x1xf32>
    %cst_23 = arith.constant 3.200000e+01 : f32
    %44 = vector.broadcast %cst_23 : f32 to vector<128x1xf32>
    %45 = arith.divf %43, %44 : vector<128x1xf32>
    %46 = vector.broadcast %45 : vector<128x1xf32> to vector<128x32xf32>
    %47 = arith.subf %41, %46 : vector<128x32xf32>
    %48 = vector.broadcast %45 : vector<128x1xf32> to vector<128x32xf32>
    %49 = arith.subf %41, %48 : vector<128x32xf32>
    %50 = arith.mulf %47, %49 : vector<128x32xf32>
    %cst_24 = arith.constant dense<0.000000e+00> : vector<128xf32>
    %51 = vector.multi_reduction <add>, %50, %cst_24 [1] : vector<128x32xf32> to vector<128xf32>
    %52 = vector.shape_cast %51 : vector<128xf32> to vector<128x1xf32>
    %cst_25 = arith.constant 3.200000e+01 : f32
    %53 = vector.broadcast %cst_25 : f32 to vector<128x1xf32>
    %54 = arith.divf %52, %53 : vector<128x1xf32>
    %55 = vector.broadcast %45 : vector<128x1xf32> to vector<128x32xf32>
    %56 = arith.subf %41, %55 : vector<128x32xf32>
    %cst_26 = arith.constant 9.99999974E-6 : f32
    %57 = vector.broadcast %cst_26 : f32 to vector<128x1xf32>
    %58 = arith.addf %54, %57 : vector<128x1xf32>
    %59 = math.rsqrt %58 : vector<128x1xf32>
    %60 = vector.broadcast %59 : vector<128x1xf32> to vector<128x32xf32>
    %61 = arith.mulf %56, %60 : vector<128x32xf32>
    %c1 = arith.constant 1 : index
    %c0_27 = arith.constant 0 : index
    %62 = vector.load %arg11[%c1, %c0_27] : memref<3x32xf32, #tpu.memory_space<vmem>>, vector<1x32xf32>
    %63 = vector.broadcast %62 : vector<1x32xf32> to vector<128x32xf32>
    %64 = arith.mulf %61, %63 : vector<128x32xf32>
    %c2 = arith.constant 2 : index
    %c0_28 = arith.constant 0 : index
    %65 = vector.load %arg11[%c2, %c0_28] : memref<3x32xf32, #tpu.memory_space<vmem>>, vector<1x32xf32>
    %66 = vector.broadcast %65 : vector<1x32xf32> to vector<128x32xf32>
    %67 = arith.addf %64, %66 : vector<128x32xf32>
    %68 = arith.subf %6, %32 : vector<128x32xf32>
    %69 = arith.addf %68, %67 : vector<128x32xf32>
    %c0_29 = arith.constant 0 : index
    %c0_30 = arith.constant 0 : index
    %70 = vector.load %arg5[%c0_29, %c0_30] : memref<32x64xf32, #tpu.memory_space<vmem>>, vector<32x64xf32>
    %cst_31 = arith.constant dense<0.000000e+00> : vector<128x64xf32>
    %71 = tpu.matmul %69, %70, %cst_31 {dimension_numbers = #tpu.dot_dimension_numbers<[1], [0], [0], [1], [0, 0, 1, 1], [], []>} : vector<128x32xf32>, vector<32x64xf32>, vector<128x64xf32> -> vector<128x64xf32>
    %c0_32 = arith.constant 0 : index
    %c0_33 = arith.constant 0 : index
    %72 = vector.load %arg6[%c0_32, %c0_33] : memref<1x64xf32, #tpu.memory_space<vmem>>, vector<1x64xf32>
    %73 = vector.broadcast %72 : vector<1x64xf32> to vector<128x64xf32>
    %74 = arith.addf %71, %73 : vector<128x64xf32>
    %75 = vector.extract_strided_slice %74 {offsets = [0, 0], sizes = [128, 32], strides = [1, 1]} : vector<128x64xf32> to vector<128x32xf32>
    %76 = arith.negf %75 : vector<128x32xf32>
    %77 = math.exp %76 : vector<128x32xf32>
    %cst_34 = arith.constant 1.000000e+00 : f32
    %78 = vector.broadcast %cst_34 : f32 to vector<128x32xf32>
    %79 = arith.addf %78, %77 : vector<128x32xf32>
    %80 = arith.divf %78, %79 : vector<128x32xf32>
    %81 = vector.extract_strided_slice %74 {offsets = [0, 32], sizes = [128, 32], strides = [1, 1]} : vector<128x64xf32> to vector<128x32xf32>
    %82 = math.tanh %81 : vector<128x32xf32>
    %cst_35 = arith.constant 1.000000e+00 : f32
    %83 = vector.broadcast %cst_35 : f32 to vector<128x32xf32>
    %84 = arith.subf %83, %80 : vector<128x32xf32>
    %85 = arith.mulf %84, %82 : vector<128x32xf32>
    %c0_36 = arith.constant 0 : index
    %c0_37 = arith.constant 0 : index
    %86 = vector.load %arg7[%c0_36, %c0_37] : memref<32x96xf32, #tpu.memory_space<vmem>>, vector<32x96xf32>
    %cst_38 = arith.constant dense<0.000000e+00> : vector<128x96xf32>
    %87 = tpu.matmul %85, %86, %cst_38 {dimension_numbers = #tpu.dot_dimension_numbers<[1], [0], [0], [1], [0, 0, 1, 1], [], []>} : vector<128x32xf32>, vector<32x96xf32>, vector<128x96xf32> -> vector<128x96xf32>
    %c0_39 = arith.constant 0 : index
    %c0_40 = arith.constant 0 : index
    %88 = vector.load %arg8[%c0_39, %c0_40] : memref<1x96xf32, #tpu.memory_space<vmem>>, vector<1x96xf32>
    %89 = vector.broadcast %88 : vector<1x96xf32> to vector<128x96xf32>
    %90 = arith.addf %87, %89 : vector<128x96xf32>
    %91 = vector.extract_strided_slice %90 {offsets = [112, 0], sizes = [16, 32], strides = [1, 1]} : vector<128x96xf32> to vector<16x32xf32>
    %92 = vector.extract_strided_slice %90 {offsets = [0, 32], sizes = [128, 32], strides = [1, 1]} : vector<128x96xf32> to vector<128x32xf32>
    %93 = vector.extract_strided_slice %90 {offsets = [0, 64], sizes = [128, 32], strides = [1, 1]} : vector<128x96xf32> to vector<128x32xf32>
    %94 = tpu.iota {dimensions = array<i32: 0>} : vector<16x128xi32>
    %c8_i32 = arith.constant 8 : i32
    %c0_i32 = arith.constant 0 : i32
    %95 = arith.cmpi eq, %c8_i32, %c0_i32 : i32
    %c1_i32 = arith.constant 1 : i32
    %96 = arith.select %95, %c1_i32, %c8_i32 : i32
    %97 = vector.broadcast %96 : i32 to vector<16x128xi32>
    %98 = arith.remsi %94, %97 : vector<16x128xi32>
    %c0_i32_41 = arith.constant 0 : i32
    %99 = vector.broadcast %c0_i32_41 : i32 to vector<16x128xi32>
    %100 = arith.cmpi ne, %98, %99 : vector<16x128xi32>
    %c0_i32_42 = arith.constant 0 : i32
    %101 = vector.broadcast %c0_i32_42 : i32 to vector<16x128xi32>
    %102 = arith.cmpi slt, %98, %101 : vector<16x128xi32>
    %c0_i32_43 = arith.constant 0 : i32
    %103 = arith.cmpi slt, %96, %c0_i32_43 : i32
    %104 = vector.broadcast %103 : i1 to vector<16x128xi1>
    %105 = vector.broadcast %104 : vector<16x128xi1> to vector<16x128xi1>
    %106 = arith.xori %102, %105 : vector<16x128xi1>
    %107 = arith.andi %106, %100 : vector<16x128xi1>
    %108 = vector.broadcast %96 : i32 to vector<16x128xi32>
    %109 = arith.addi %98, %108 : vector<16x128xi32>
    %110 = arith.select %107, %109, %98 : vector<16x128xi1>, vector<16x128xi32>
    %111 = tpu.iota {dimensions = array<i32: 1>} : vector<16x128xi32>
    %c8_i32_44 = arith.constant 8 : i32
    %c0_i32_45 = arith.constant 0 : i32
    %112 = arith.cmpi eq, %c8_i32_44, %c0_i32_45 : i32
    %c1_i32_46 = arith.constant 1 : i32
    %113 = arith.select %112, %c1_i32_46, %c8_i32_44 : i32
    %114 = vector.broadcast %113 : i32 to vector<16x128xi32>
    %115 = arith.remsi %111, %114 : vector<16x128xi32>
    %c0_i32_47 = arith.constant 0 : i32
    %116 = vector.broadcast %c0_i32_47 : i32 to vector<16x128xi32>
    %117 = arith.cmpi ne, %115, %116 : vector<16x128xi32>
    %c0_i32_48 = arith.constant 0 : i32
    %118 = vector.broadcast %c0_i32_48 : i32 to vector<16x128xi32>
    %119 = arith.cmpi slt, %115, %118 : vector<16x128xi32>
    %c0_i32_49 = arith.constant 0 : i32
    %120 = arith.cmpi slt, %113, %c0_i32_49 : i32
    %121 = vector.broadcast %120 : i1 to vector<16x128xi1>
    %122 = vector.broadcast %121 : vector<16x128xi1> to vector<16x128xi1>
    %123 = arith.xori %119, %122 : vector<16x128xi1>
    %124 = arith.andi %123, %117 : vector<16x128xi1>
    %125 = vector.broadcast %113 : i32 to vector<16x128xi32>
    %126 = arith.addi %115, %125 : vector<16x128xi32>
    %127 = arith.select %124, %126, %115 : vector<16x128xi1>, vector<16x128xi32>
    %128 = arith.cmpi eq, %110, %127 : vector<16x128xi32>
    %129 = vector.extract_strided_slice %91 {offsets = [0, 0], sizes = [16, 8], strides = [1, 1]} : vector<16x32xf32> to vector<16x8xf32>
    %cst_50 = arith.constant 0.353553385 : f32
    %130 = vector.broadcast %cst_50 : f32 to vector<16x8xf32>
    %131 = arith.mulf %129, %130 : vector<16x8xf32>
    %132 = vector.extract_strided_slice %92 {offsets = [0, 0], sizes = [128, 8], strides = [1, 1]} : vector<128x32xf32> to vector<128x8xf32>
    %133 = vector.extract_strided_slice %93 {offsets = [0, 0], sizes = [128, 8], strides = [1, 1]} : vector<128x32xf32> to vector<128x8xf32>
    %cst_51 = arith.constant dense<0.000000e+00> : vector<16x128xf32>
    %134 = tpu.matmul %131, %132, %cst_51 {dimension_numbers = #tpu.dot_dimension_numbers<[1], [1], [0], [0], [0, 0, 1, 0], [], []>} : vector<16x8xf32>, vector<128x8xf32>, vector<16x128xf32> -> vector<16x128xf32>
    %cst_52 = arith.constant -1.000000e+30 : f32
    %135 = vector.broadcast %cst_52 : f32 to vector<16x128xf32>
    %136 = arith.select %128, %134, %135 : vector<16x128xi1>, vector<16x128xf32>
    %cst_53 = arith.constant dense<0xFF800000> : vector<16xf32>
    %137 = vector.multi_reduction <maximumf>, %136, %cst_53 [1] : vector<16x128xf32> to vector<16xf32>
    %138 = vector.shape_cast %137 : vector<16xf32> to vector<16x1xf32>
    %139 = vector.broadcast %138 : vector<16x1xf32> to vector<16x128xf32>
    %140 = arith.subf %136, %139 : vector<16x128xf32>
    %141 = math.exp %140 : vector<16x128xf32>
    %cst_54 = arith.constant dense<0.000000e+00> : vector<16xf32>
    %142 = vector.multi_reduction <add>, %141, %cst_54 [1] : vector<16x128xf32> to vector<16xf32>
    %143 = vector.shape_cast %142 : vector<16xf32> to vector<16x1xf32>
    %cst_55 = arith.constant dense<0.000000e+00> : vector<16x8xf32>
    %144 = tpu.matmul %141, %133, %cst_55 {dimension_numbers = #tpu.dot_dimension_numbers<[1], [0], [0], [1], [0, 0, 1, 1], [], []>} : vector<16x128xf32>, vector<128x8xf32>, vector<16x8xf32> -> vector<16x8xf32>
    %145 = tpu.reciprocal %143 {approx = true} : vector<16x1xf32> -> vector<16x1xf32>
    %146 = vector.broadcast %145 : vector<16x1xf32> to vector<16x8xf32>
    %147 = arith.mulf %144, %146 : vector<16x8xf32>
    %148 = vector.extract_strided_slice %91 {offsets = [0, 8], sizes = [16, 8], strides = [1, 1]} : vector<16x32xf32> to vector<16x8xf32>
    %cst_56 = arith.constant 0.353553385 : f32
    %149 = vector.broadcast %cst_56 : f32 to vector<16x8xf32>
    %150 = arith.mulf %148, %149 : vector<16x8xf32>
    %151 = vector.extract_strided_slice %92 {offsets = [0, 8], sizes = [128, 8], strides = [1, 1]} : vector<128x32xf32> to vector<128x8xf32>
    %152 = vector.extract_strided_slice %93 {offsets = [0, 8], sizes = [128, 8], strides = [1, 1]} : vector<128x32xf32> to vector<128x8xf32>
    %cst_57 = arith.constant dense<0.000000e+00> : vector<16x128xf32>
    %153 = tpu.matmul %150, %151, %cst_57 {dimension_numbers = #tpu.dot_dimension_numbers<[1], [1], [0], [0], [0, 0, 1, 0], [], []>} : vector<16x8xf32>, vector<128x8xf32>, vector<16x128xf32> -> vector<16x128xf32>
    %cst_58 = arith.constant -1.000000e+30 : f32
    %154 = vector.broadcast %cst_58 : f32 to vector<16x128xf32>
    %155 = arith.select %128, %153, %154 : vector<16x128xi1>, vector<16x128xf32>
    %cst_59 = arith.constant dense<0xFF800000> : vector<16xf32>
    %156 = vector.multi_reduction <maximumf>, %155, %cst_59 [1] : vector<16x128xf32> to vector<16xf32>
    %157 = vector.shape_cast %156 : vector<16xf32> to vector<16x1xf32>
    %158 = vector.broadcast %157 : vector<16x1xf32> to vector<16x128xf32>
    %159 = arith.subf %155, %158 : vector<16x128xf32>
    %160 = math.exp %159 : vector<16x128xf32>
    %cst_60 = arith.constant dense<0.000000e+00> : vector<16xf32>
    %161 = vector.multi_reduction <add>, %160, %cst_60 [1] : vector<16x128xf32> to vector<16xf32>
    %162 = vector.shape_cast %161 : vector<16xf32> to vector<16x1xf32>
    %cst_61 = arith.constant dense<0.000000e+00> : vector<16x8xf32>
    %163 = tpu.matmul %160, %152, %cst_61 {dimension_numbers = #tpu.dot_dimension_numbers<[1], [0], [0], [1], [0, 0, 1, 1], [], []>} : vector<16x128xf32>, vector<128x8xf32>, vector<16x8xf32> -> vector<16x8xf32>
    %164 = tpu.reciprocal %162 {approx = true} : vector<16x1xf32> -> vector<16x1xf32>
    %165 = vector.broadcast %164 : vector<16x1xf32> to vector<16x8xf32>
    %166 = arith.mulf %163, %165 : vector<16x8xf32>
    %167 = vector.extract_strided_slice %91 {offsets = [0, 16], sizes = [16, 8], strides = [1, 1]} : vector<16x32xf32> to vector<16x8xf32>
    %cst_62 = arith.constant 0.353553385 : f32
    %168 = vector.broadcast %cst_62 : f32 to vector<16x8xf32>
    %169 = arith.mulf %167, %168 : vector<16x8xf32>
    %170 = vector.extract_strided_slice %92 {offsets = [0, 16], sizes = [128, 8], strides = [1, 1]} : vector<128x32xf32> to vector<128x8xf32>
    %171 = vector.extract_strided_slice %93 {offsets = [0, 16], sizes = [128, 8], strides = [1, 1]} : vector<128x32xf32> to vector<128x8xf32>
    %cst_63 = arith.constant dense<0.000000e+00> : vector<16x128xf32>
    %172 = tpu.matmul %169, %170, %cst_63 {dimension_numbers = #tpu.dot_dimension_numbers<[1], [1], [0], [0], [0, 0, 1, 0], [], []>} : vector<16x8xf32>, vector<128x8xf32>, vector<16x128xf32> -> vector<16x128xf32>
    %cst_64 = arith.constant -1.000000e+30 : f32
    %173 = vector.broadcast %cst_64 : f32 to vector<16x128xf32>
    %174 = arith.select %128, %172, %173 : vector<16x128xi1>, vector<16x128xf32>
    %cst_65 = arith.constant dense<0xFF800000> : vector<16xf32>
    %175 = vector.multi_reduction <maximumf>, %174, %cst_65 [1] : vector<16x128xf32> to vector<16xf32>
    %176 = vector.shape_cast %175 : vector<16xf32> to vector<16x1xf32>
    %177 = vector.broadcast %176 : vector<16x1xf32> to vector<16x128xf32>
    %178 = arith.subf %174, %177 : vector<16x128xf32>
    %179 = math.exp %178 : vector<16x128xf32>
    %cst_66 = arith.constant dense<0.000000e+00> : vector<16xf32>
    %180 = vector.multi_reduction <add>, %179, %cst_66 [1] : vector<16x128xf32> to vector<16xf32>
    %181 = vector.shape_cast %180 : vector<16xf32> to vector<16x1xf32>
    %cst_67 = arith.constant dense<0.000000e+00> : vector<16x8xf32>
    %182 = tpu.matmul %179, %171, %cst_67 {dimension_numbers = #tpu.dot_dimension_numbers<[1], [0], [0], [1], [0, 0, 1, 1], [], []>} : vector<16x128xf32>, vector<128x8xf32>, vector<16x8xf32> -> vector<16x8xf32>
    %183 = tpu.reciprocal %181 {approx = true} : vector<16x1xf32> -> vector<16x1xf32>
    %184 = vector.broadcast %183 : vector<16x1xf32> to vector<16x8xf32>
    %185 = arith.mulf %182, %184 : vector<16x8xf32>
    %186 = vector.extract_strided_slice %91 {offsets = [0, 24], sizes = [16, 8], strides = [1, 1]} : vector<16x32xf32> to vector<16x8xf32>
    %cst_68 = arith.constant 0.353553385 : f32
    %187 = vector.broadcast %cst_68 : f32 to vector<16x8xf32>
    %188 = arith.mulf %186, %187 : vector<16x8xf32>
    %189 = vector.extract_strided_slice %92 {offsets = [0, 24], sizes = [128, 8], strides = [1, 1]} : vector<128x32xf32> to vector<128x8xf32>
    %190 = vector.extract_strided_slice %93 {offsets = [0, 24], sizes = [128, 8], strides = [1, 1]} : vector<128x32xf32> to vector<128x8xf32>
    %cst_69 = arith.constant dense<0.000000e+00> : vector<16x128xf32>
    %191 = tpu.matmul %188, %189, %cst_69 {dimension_numbers = #tpu.dot_dimension_numbers<[1], [1], [0], [0], [0, 0, 1, 0], [], []>} : vector<16x8xf32>, vector<128x8xf32>, vector<16x128xf32> -> vector<16x128xf32>
    %cst_70 = arith.constant -1.000000e+30 : f32
    %192 = vector.broadcast %cst_70 : f32 to vector<16x128xf32>
    %193 = arith.select %128, %191, %192 : vector<16x128xi1>, vector<16x128xf32>
    %cst_71 = arith.constant dense<0xFF800000> : vector<16xf32>
    %194 = vector.multi_reduction <maximumf>, %193, %cst_71 [1] : vector<16x128xf32> to vector<16xf32>
    %195 = vector.shape_cast %194 : vector<16xf32> to vector<16x1xf32>
    %196 = vector.broadcast %195 : vector<16x1xf32> to vector<16x128xf32>
    %197 = arith.subf %193, %196 : vector<16x128xf32>
    %198 = math.exp %197 : vector<16x128xf32>
    %cst_72 = arith.constant dense<0.000000e+00> : vector<16xf32>
    %199 = vector.multi_reduction <add>, %198, %cst_72 [1] : vector<16x128xf32> to vector<16xf32>
    %200 = vector.shape_cast %199 : vector<16xf32> to vector<16x1xf32>
    %cst_73 = arith.constant dense<0.000000e+00> : vector<16x8xf32>
    %201 = tpu.matmul %198, %190, %cst_73 {dimension_numbers = #tpu.dot_dimension_numbers<[1], [0], [0], [1], [0, 0, 1, 1], [], []>} : vector<16x128xf32>, vector<128x8xf32>, vector<16x8xf32> -> vector<16x8xf32>
    %202 = tpu.reciprocal %200 {approx = true} : vector<16x1xf32> -> vector<16x1xf32>
    %203 = vector.broadcast %202 : vector<16x1xf32> to vector<16x8xf32>
    %204 = arith.mulf %201, %203 : vector<16x8xf32>
    %205 = tpu.concatenate %147, %166, %185, %204 in 1 : vector<16x8xf32>, vector<16x8xf32>, vector<16x8xf32>, vector<16x8xf32> -> vector<16x32xf32>
    %c0_74 = arith.constant 0 : index
    %c1_75 = arith.constant 1 : index
    %206 = vector.load %arg9[%c0_74, %c1_75] : memref<32x2xf32, #tpu.memory_space<vmem>>, vector<32x1xf32>
    %cst_76 = arith.constant dense<0.000000e+00> : vector<16x1xf32>
    %207 = tpu.matmul %205, %206, %cst_76 {dimension_numbers = #tpu.dot_dimension_numbers<[1], [0], [0], [1], [0, 0, 1, 1], [], []>} : vector<16x32xf32>, vector<32x1xf32>, vector<16x1xf32> -> vector<16x1xf32>
    %c0_77 = arith.constant 0 : index
    %c1_78 = arith.constant 1 : index
    %208 = vector.load %arg10[%c0_77, %c1_78] : memref<1x2xf32, #tpu.memory_space<vmem>>, vector<1x1xf32>
    %209 = vector.broadcast %208 : vector<1x1xf32> to vector<16x1xf32>
    %210 = arith.addf %207, %209 : vector<16x1xf32>
    %211 = vector.extract_strided_slice %37 {offsets = [112, 32], sizes = [16, 1], strides = [1, 1]} : vector<128x33xf32> to vector<16x1xf32>
    %212 = arith.addf %210, %211 : vector<16x1xf32>
    %c0_79 = arith.constant 0 : index
    %c0_80 = arith.constant 0 : index
    %213 = vector.load %arg12[%c0_79, %c0_80] : memref<16x1xf32, #tpu.memory_space<vmem>>, vector<16x1xf32>
    tpu.vector_store %arg12[%c0_79, %c0_80], %212 {strides = array<i32>} : memref<16x1xf32, #tpu.memory_space<vmem>>, vector<16x1xf32>,
    return
  }
}

</mosaic_0001>

<bundles_post_ra>
// kernel: decoupled_model_forward.1
= control target key start
LH: loop header
LB: loop body
LE: loop exit
PB: predicated region body
PF: predicated region fallthrough
CT: control target
= control target key end

     0   :  { %vm117_vm0 = vcmask 1043456   ;;  %vm68_vm1 = vcmask 228352   ;;  %vm5176_vm2 = vmmov 1   ;;  %vm341_vm4 = vcmask 261120   ;;  %s5180_s23 = smov 88   ;;  %s5182_s24 = smov 56   ;;  %s6537_s1 = inlined_call_operand.vmem [shape: f32[28,64], index: 1, kind: input, shape index: {}]   ;;  %s6538_s0 = inlined_call_operand.vmem [shape: f32[128,28], index: 0, kind: input, shape index: {}]   ;;  %s6539_s9 = inlined_call_operand.vmem [shape: f32[32,2], index: 9, kind: input, shape index: {}]   ;;  %s6540_s2 = inlined_call_operand.vmem [shape: f32[1,64], index: 2, kind: input, shape index: {}]   ;;  %s6541_s10 = inlined_call_operand.vmem [shape: f32[1,2], index: 10, kind: input, shape index: {}]   ;;  %s6542_s3 = inlined_call_operand.vmem [shape: f32[32,33], index: 3, kind: input, shape index: {}]   ;;  %s6543_s11 = inlined_call_operand.vmem [shape: f32[3,32], index: 11, kind: input, shape index: {}]   ;;  %s6544_s4 = inlined_call_operand.vmem [shape: f32[1,33], index: 4, kind: input, shape index: {}]   ;;  %s6545_s5 = inlined_call_operand.vmem [shape: f32[32,64], index: 5, kind: input, shape index: {}]   ;;  %s6546_s7 = inlined_call_operand.vmem [shape: f32[32,96], index: 7, kind: input, shape index: {}]   ;;  %s6547_s6 = inlined_call_operand.vmem [shape: f32[1,64], index: 6, kind: input, shape index: {}]   ;;  %s6548_s8 = inlined_call_operand.vmem [shape: f32[1,96], index: 8, kind: input, shape index: {}]   ;;  %s6549_s12 = inlined_call_operand.vmem [shape: f32[16,1], index: 12, kind: output, shape index: {}]  }
   0x1   :  { %v57_v0 = vld [vmem:[%s6537_s1] sm:$0xff]  ;;  %v58_v1 = vld [vmem:[%s6537_s1 + $0x8] sm:$0xff]  ;;  %v59_v2 = vld [vmem:[%s6537_s1 + $0x10] sm:$0xff]  ;;  %vm2056_vm5 = vcmask 64512   ;;  %s5184_s25 = smov 112   ;;  %s5185_s26 = smov 48  }
   0x2   :  { %v4228_v3 = vpack.c.bf16 %v58_v1, %v57_v0  ;;  %v60_v4 = vld [vmem:[%s6537_s1 + $0x18] sm:$0xf]  ;;  %v41_v5 = vld [vmem:[%s6538_s0] sm:$0xff]  ;;  %vm4233_vm3 = vmpackc.low %vm117_vm0, %vm5176_vm2  ;;  %s5186_s27 = smov 72   ;;  %s5187_s28 = smov 104   ;;  %vm3209_vm9 = vcmask 130048  }
   0x3   :  { %v4232_v6 = vpack.c.bf16 %v60_v4, %v59_v2  ;;  %3785 = vmatprep.mubr.msk.f32.mxu0 %vm68_vm1, %v41_v5  ;;  %v51_v7 = vld [vmem:[%s6538_s0 + $0x50] sm:$0xff]  ;;  %v42_v8 = vld [vmem:[%s6538_s0 + $0x8] sm:$0xff]  ;;  %v52_v9 = vld [vmem:[%s6538_s0 + $0x58] sm:$0xff]  ;;  %s5189_s29 = smov 127   ;;  %s5190_s30 = smov 8   ;;  %vm3212_vm10 = vcmask 195584  }
   0x4   :  { %4229 = vmatprep.subr.bf16.mxu0 %v4228_v3  ;;  %4598 = vmatprep.subr.bf16.mxu1 %v4228_v3  ;;  %v43_v10 = vld [vmem:[%s6538_s0 + $0x10] sm:$0xff]  ;;  %v53_v11 = vld [vmem:[%s6538_s0 + $0x60] sm:$0xff]  ;;  %v44_v12 = vld [vmem:[%s6538_s0 + $0x18] sm:$0xff]  ;;  %s5192_s13 = smov 24   ;;  %vm3325_vm11 = vcmask 7168  }
   0x5   :  { %4231 = vmatpush3.bf16.msra.mxu0 %v4228_v3  ;;  %4600 = vmatpush3.bf16.msra.mxu1 %v4228_v3  ;;  %v54_v13 = vld [vmem:[%s6538_s0 + $0x68] sm:$0xff]  ;;  %v45_v14 = vld [vmem:[%s6538_s0 + $0x20] sm:$0xff]  ;;  %v55_v15 = vld [vmem:[%s6538_s0 + $0x70] sm:$0xff] }
   0x6   :  { %4234 = vmatprep.subr.msk.bf16.mxu0 %vm4233_vm3, %v4232_v6  ;;  %4599 = vmatprep.subr.msk.bf16.mxu1 %vm4233_vm3, %v4232_v6  ;;  %v46_v16 = vld [vmem:[%s6538_s0 + $0x28] sm:$0xff]  ;;  %v56_v17 = vld [vmem:[%s6538_s0 + $0x78] sm:$0xff]  ;;  %v47_v18 = vld [vmem:[%s6538_s0 + $0x30] sm:$0xff] }
   0x7   :  { %3800 = vmatprep.mubr.msk.f32.mxu1 %vm68_vm1, %v51_v7  ;;  %v48_v19 = vld [vmem:[%s6538_s0 + $0x38] sm:$0xff]  ;;  %v49_v20 = vld [vmem:[%s6538_s0 + $0x40] sm:$0xff]  ;;  %v50_v21 = vld [vmem:[%s6538_s0 + $0x48] sm:$0xff]  ;;  %s5188_s0 = smov 40  }
   0x8   :  { %v5337_v22 = vld [vmem:[%s6539_s9] sm:$0xff]  ;;  %v5342_v23 = vld [vmem:[%s6539_s9 + $0x8] sm:$0xff]  ;;  %v5347_v24 = vld [vmem:[%s6539_s9 + $0x10] sm:$0xff] }
   0x9   :  { %4237 = vmatpush3.bf16.msk.msra.mxu0 %vm4233_vm3, %v4232_v6  ;;  %4601 = vmatpush3.bf16.msk.msra.mxu1 %vm4233_vm3, %v4232_v6  ;;  %6558 = vst [vmem:[#allocation2_spill] sm:$0xff] %v5337_v22  ;;  %6559 = vst [vmem:[#allocation3_spill] sm:$0xff] %v5342_v23  ;;  %v4238_v26 = vpack.c.bf16 %v5342_v23, %v5337_v22  ;;  %v5356_v27 = vld [vmem:[%s6539_s9 + $0x18] sm:$0xff]  ;;  %v3332_v30 = vld [vmem:[%s6540_s2] ss:$0 sm:$0xff]  ;;  %s5177_s9 = smov 96  }
   0xa   :  { %6560 = vst [vmem:[#allocation4_spill] sm:$0xff] %v5347_v24  ;;  %6561 = vst [vmem:[#allocation5_spill] sm:$0xff] %v5356_v27  ;;  %v4242_v29 = vpack.c.bf16 %v5356_v27, %v5347_v24 }
   0xb   :  { %4239 = vmatprep.subr.bf16.mxu1 %v4238_v26  ;;  %vm6183_vm6 = vmpackc.low %vm2056_vm5, %vm2056_vm5 }
   0xc   :  { %3786 = vmatmul.mubr.msk.f32.vlgmr.msra.gmra.mrb[0].mxu0 %vm68_vm1, %v42_v8  ;;  %3801 = vmatmul.mubr.msk.f32.vlgmr.msra.gmra.mrb[0].mxu1 %vm68_vm1, %v52_v9 }
   0xd   :  { %3788 = vmatprep.mubr.msk.f32.mxu0 %vm68_vm1, %v43_v10  ;;  %3803 = vmatprep.mubr.msk.f32.mxu1 %vm68_vm1, %v53_v11 }
   0xe   :  { %4241 = vmatpush3.bf16.msra.mxu1 %v4238_v26 }
   0xf   :  { %4243 = vmatprep.subr.bf16.mxu1 %v4242_v29 }
  0x10   :  { %3789 = vmatmul.mubr.msk.f32.gmra.mrb[2].mxu0 %vm68_vm1, %v44_v12  ;;  %3804 = vmatmul.mubr.msk.f32.gmra.mrb[2].mxu1 %vm68_vm1, %v54_v13 }
  0x11   :  { %3791 = vmatprep.mubr.msk.f32.mxu0 %vm68_vm1, %v45_v14  ;;  %3806 = vmatprep.mubr.msk.f32.mxu1 %vm68_vm1, %v55_v15 }
  0x12   :  { %4245 = vmatpush3.bf16.msra.mxu1 %v4242_v29 }
  0x14   :  { %3792 = vmatmul.mubr.msk.f32.gmra.mrb[4].mxu0 %vm68_vm1, %v46_v16  ;;  %3807 = vmatmul.mubr.msk.f32.gmra.mrb[4].mxu1 %vm68_vm1, %v56_v17 }
  0x15   :  { %3794 = vmatprep.mubr.msk.f32.mxu0 %vm68_vm1, %v47_v18 }
  0x18   :  { %3795 = vmatmul.mubr.msk.f32.gmra.mrb[6].mxu0 %vm68_vm1, %v48_v19 }
  0x19   :  { %3797 = vmatprep.mubr.msk.f32.mxu0 %vm68_vm1, %v49_v20 }
  0x1c   :  { %3798 = vmatmul.mubr.msk.f32.gmra.mrb[8].mxu0 %vm68_vm1, %v50_v21 }
  0xdf   :  { %v3787_v31 = vpop.f32.mrb[0].mxu0  ;;  %v3802_v32 = vpop.f32.mrb[0].mxu1 }
  0xe0   :  { %v187_v33 = vpop.f32.mrb[1].mxu0  ;;  %v237_v34 = vpop.f32.mrb[1].mxu1  ;;  %v5367_v36 = vadd.f32 %v3787_v31, %v3332_v30  ;;  %v5404_v3 = vadd.f32 %v3802_v32, %v3332_v30 }
  0xe1   :  { %v5365_v35 = vadd.f32 %v3332_v30, %v187_v33  ;;  %v5400_v1 = vadd.f32 %v3332_v30, %v237_v34 }
  0xe2   :  { %v267_v45 = vmax.f32 %v5367_v36, 0.0  ;;  %v277_v8 = vmax.f32 %v5404_v3, 0.0 }
  0xe3   :  { %v3790_v37 = vpop.f32.mrb[2].mxu0  ;;  %v266_v38 = vmax.f32 %v5365_v35, 0.0  ;;  %v3805_v39 = vpop.f32.mrb[2].mxu1  ;;  %v276_v6 = vmax.f32 %v5400_v1, 0.0 }
  0xe4   :  { %v197_v40 = vpop.f32.mrb[3].mxu0  ;;  %v247_v41 = vpop.f32.mrb[3].mxu1  ;;  %v5370_v42 = vadd.f32 %v3790_v37, %v3332_v30  ;;  %v5412_v7 = vadd.f32 %v3805_v39, %v3332_v30  ;;  %v5178_v39 = vmov 0  }
  0xe5   :  { %v5372_v43 = vadd.f32 %v3332_v30, %v197_v40  ;;  %309 = vrot.lane.b32.xlu0 %v266_v38, %s5177_s9  ;;  %v5408_v5 = vadd.f32 %v3332_v30, %v247_v41  ;;  %4619 = vset.pattern.permute.xlu1 %v5178_v39  ;;  %v5448_v40 = vld [vmem:[%s6541_s10] ss:$0 sm:$0xff] }
  0xe6   :  { %v269_v52 = vmax.f32 %v5370_v42, 0.0  ;;  %v279_v12 = vmax.f32 %v5412_v7, 0.0  ;;  %4620 = vset.pattern.permute.xlu0 %v5178_v39 }
  0xe7   :  { %v268_v44 = vmax.f32 %v5372_v43, 0.0  ;;  %v3793_v46 = vpop.f32.mrb[4].mxu0  ;;  %v3808_v47 = vpop.f32.mrb[4].mxu1  ;;  %v278_v10 = vmax.f32 %v5408_v5, 0.0 }
  0xe8   :  { %v207_v48 = vpop.f32.mrb[5].mxu0  ;;  %v257_v49 = vpop.f32.mrb[5].mxu1  ;;  %v5379_v50 = vadd.f32 %v3793_v46, %v3332_v30  ;;  %v5420_v11 = vadd.f32 %v3808_v47, %v3332_v30 }
  0xe9   :  { %313 = vrot.lane.b32.xlu1 %v268_v44, %s5177_s9  ;;  %311 = vrot.lane.b32.xlu0 %v267_v45, %s5177_s9  ;;  %v5381_v51 = vadd.f32 %v3332_v30, %v207_v48  ;;  %v5416_v9 = vadd.f32 %v3332_v30, %v257_v49 }
  0xea   :  { %v271_v58 = vmax.f32 %v5379_v50, 0.0  ;;  %6562 = vst [vmem:[#allocation6_spill] sm:$0xff] %v5420_v11  ;;  %v281_v14 = vmax.f32 %v5420_v11, 0.0 }
  0xeb   :  { %v3796_v53 = vpop.f32.mrb[6].mxu0  ;;  %v270_v54 = vmax.f32 %v5381_v51, 0.0  ;;  %v280_v13 = vmax.f32 %v5416_v9, 0.0 }
  0xec   :  { %v217_v55 = vpop.f32.mrb[7].mxu0  ;;  %v5386_v56 = vadd.f32 %v3796_v53, %v3332_v30 }
  0xed   :  { %315 = vrot.lane.b32.xlu1 %v269_v52, %s5177_s9  ;;  %v5388_v57 = vadd.f32 %v3332_v30, %v217_v55  ;;  %317 = vrot.lane.b32.xlu0 %v270_v54, %s5177_s9 }
  0xee   :  { %v273_v0 = vmax.f32 %v5386_v56, 0.0 }
  0xef   :  { %v3799_v59 = vpop.f32.mrb[8].mxu0  ;;  %v272_v60 = vmax.f32 %v5388_v57, 0.0 }
  0xf0   :  { %v227_v61 = vpop.f32.mrb[9].mxu0  ;;  %v5394_v62 = vadd.f32 %v3799_v59, %v3332_v30 }
  0xf1   :  { %319 = vrot.lane.b32.xlu1 %v271_v58, %s5177_s9  ;;  %v5396_v63 = vadd.f32 %v3332_v30, %v227_v61  ;;  %321 = vrot.lane.b32.xlu0 %v272_v60, %s5177_s9 }
  0xf2   :  { %v275_v4 = vmax.f32 %v5394_v62, 0.0 }
  0xf3   :  { %v274_v2 = vmax.f32 %v5396_v63, 0.0 }
  0xf5   :  { %323 = vrot.lane.b32.xlu1 %v273_v0, %s5177_s9  ;;  %325 = vrot.lane.b32.xlu0 %v274_v2, %s5177_s9 }
  0xf9   :  { %327 = vrot.lane.b32.xlu1 %v275_v4, %s5177_s9  ;;  %329 = vrot.lane.b32.xlu0 %v276_v6, %s5177_s9 }
  0xfd   :  { %331 = vrot.lane.b32.xlu1 %v277_v8, %s5177_s9  ;;  %333 = vrot.lane.b32.xlu0 %v278_v10, %s5177_s9 }
 0x101   :  { %335 = vrot.lane.b32.xlu1 %v279_v12, %s5177_s9  ;;  %337 = vrot.lane.b32.xlu0 %v280_v13, %s5177_s9 }
 0x105   :  { %339 = vrot.lane.b32.xlu1 %v281_v14, %s5177_s9 }
 0x157   :  { %v310_v15 = vpop.permute.xlu0 %309 }
 0x158   :  { %3817 = vmatprep.mubr.msk.f32.mxu1 %vm341_vm4, %v310_v15 }
 0x15b   :  { %v314_v16 = vpop.permute.xlu1 %313  ;;  %v312_v17 = vpop.permute.xlu0 %311 }
 0x15c   :  { %3818 = vmatmul.mubr.msk.f32.vlgmr.msra.gmra.mrb[6].mxu1 %vm341_vm4, %v312_v17 }
 0x15d   :  { %3820 = vmatprep.mubr.msk.f32.mxu1 %vm341_vm4, %v314_v16 }
 0x15f   :  { %v316_v18 = vpop.permute.xlu1 %315  ;;  %v318_v19 = vpop.permute.xlu0 %317 }
 0x160   :  { %3821 = vmatmul.mubr.msk.f32.gmra.mrb[8].mxu1 %vm341_vm4, %v316_v18 }
 0x161   :  { %3823 = vmatprep.mubr.msk.f32.mxu1 %vm341_vm4, %v318_v19 }
 0x163   :  { %v320_v20 = vpop.permute.xlu1 %319  ;;  %v322_v21 = vpop.permute.xlu0 %321 }
 0x164   :  { %3824 = vmatmul.mubr.msk.f32.gmra.mrb[10].mxu1 %vm341_vm4, %v320_v20 }
 0x165   :  { %3826 = vmatprep.mubr.msk.f32.mxu1 %vm341_vm4, %v322_v21 }
 0x167   :  { %v324_v26 = vpop.permute.xlu1 %323  ;;  %v326_v29 = vpop.permute.xlu0 %325 }
 0x168   :  { %3827 = vmatmul.mubr.msk.f32.gmra.mrb[12].mxu1 %vm341_vm4, %v324_v26 }
 0x169   :  { %3829 = vmatprep.mubr.msk.f32.mxu1 %vm341_vm4, %v326_v29 }
 0x16b   :  { %v328_v30 = vpop.permute.xlu1 %327  ;;  %v330_v31 = vpop.permute.xlu0 %329 }
 0x16c   :  { %3830 = vmatmul.mubr.msk.f32.gmra.mrb[14].mxu1 %vm341_vm4, %v328_v30 }
 0x16d   :  { %3832 = vmatprep.mubr.msk.f32.mxu1 %vm341_vm4, %v330_v31 }
 0x16f   :  { %v332_v32 = vpop.permute.xlu1 %331  ;;  %v334_v33 = vpop.permute.xlu0 %333 }
 0x170   :  { %3833 = vmatmul.mubr.msk.f32.gmra.mrb[16].mxu1 %vm341_vm4, %v332_v32 }
 0x171   :  { %3835 = vmatprep.mubr.msk.f32.mxu1 %vm341_vm4, %v334_v33 }
 0x173   :  { %v336_v34 = vpop.permute.xlu1 %335  ;;  %v338_v37 = vpop.permute.xlu0 %337 }
 0x174   :  { %3836 = vmatmul.mubr.msk.f32.gmra.mrb[18].mxu1 %vm341_vm4, %v336_v34 }
 0x175   :  { %3838 = vmatprep.mubr.msk.f32.mxu1 %vm341_vm4, %v338_v37 }
 0x177   :  { %v340_v38 = vpop.permute.xlu1 %339 }
 0x178   :  { %3839 = vmatmul.mubr.msk.f32.gmra.mrb[20].mxu1 %vm341_vm4, %v340_v38 }
 0x22f   :  { %v3819_v41 = vpop.f32.mrb[6].mxu1 }
 0x230   :  { %v446_v44 = vadd.f32 %v3819_v41, %v5448_v40  ;;  %v440_v45 = vpop.f32.mrb[7].mxu1 }
 0x231   :  { %v441_v46 = vadd.f32 %v5448_v40, %v440_v45 }
 0x232   :  { %v3368_v47 = vmul.f32 -1.442695, %v446_v44 }
 0x233   :  { %v3367_v48 = vmul.f32 -1.442695, %v441_v46  ;;  %v3822_v49 = vpop.f32.mrb[8].mxu1 }
 0x234   :  { %4951 = vpow2.f32 %v3368_v47  ;;  %v456_v52 = vadd.f32 %v3822_v49, %v5448_v40  ;;  %v450_v53 = vpop.f32.mrb[9].mxu1 }
 0x235   :  { %4953 = vpow2.f32 %v3367_v48  ;;  %v451_v54 = vadd.f32 %v5448_v40, %v450_v53 }
 0x236   :  { %v3370_v55 = vmul.f32 -1.442695, %v456_v52 }
 0x237   :  { %v3369_v58 = vmul.f32 -1.442695, %v451_v54  ;;  %v3825_v59 = vpop.f32.mrb[10].mxu1 }
 0x238   :  { %4955 = vpow2.f32 %v3370_v55  ;;  %v466_v60 = vadd.f32 %v3825_v59, %v5448_v40  ;;  %v460_v61 = vpop.f32.mrb[11].mxu1 }
 0x239   :  { %4957 = vpow2.f32 %v3369_v58  ;;  %v461_v0 = vadd.f32 %v5448_v40, %v460_v61 }
 0x23a   :  { %v3372_v2 = vmul.f32 -1.442695, %v466_v60 }
 0x23b   :  { %v3371_v4 = vmul.f32 -1.442695, %v461_v0  ;;  %v3828_v6 = vpop.f32.mrb[12].mxu1 }
 0x23c   :  { %4959 = vpow2.f32 %v3372_v2  ;;  %v476_v8 = vadd.f32 %v3828_v6, %v5448_v40  ;;  %v470_v10 = vpop.f32.mrb[13].mxu1 }
 0x23d   :  { %4961 = vpow2.f32 %v3371_v4  ;;  %v471_v12 = vadd.f32 %v5448_v40, %v470_v10 }
 0x23e   :  { %v4952_v13 = vpop.eup %4951  ;;  %v3374_v14 = vmul.f32 -1.442695, %v476_v8 }
 0x23f   :  { %v4954_v15 = vpop.eup %4953  ;;  %v568_v16 = vadd.f32 1.0, %v4952_v13  ;;  %v3373_v17 = vmul.f32 -1.442695, %v471_v12  ;;  %v3831_v18 = vpop.f32.mrb[14].mxu1 }
 0x240   :  { %v567_v19 = vadd.f32 1.0, %v4954_v15  ;;  %4963 = vpow2.f32 %v3374_v14  ;;  %v486_v20 = vadd.f32 %v3831_v18, %v5448_v40  ;;  %v480_v21 = vpop.f32.mrb[15].mxu1 }
 0x241   :  { %4965 = vrcp.f32 %v568_v16  ;;  %v481_v26 = vadd.f32 %v5448_v40, %v480_v21 }
 0x242   :  { %v4956_v29 = vpop.eup %4955  ;;  %4967 = vrcp.f32 %v567_v19  ;;  %v3376_v30 = vmul.f32 -1.442695, %v486_v20 }
 0x243   :  { %v4958_v31 = vpop.eup %4957  ;;  %v570_v32 = vadd.f32 1.0, %v4956_v29  ;;  %4969 = vpow2.f32 %v3373_v17  ;;  %v3375_v33 = vmul.f32 -1.442695, %v481_v26  ;;  %v3834_v34 = vpop.f32.mrb[16].mxu1 }
 0x244   :  { %v569_v37 = vadd.f32 1.0, %v4958_v31  ;;  %4971 = vpow2.f32 %v3376_v30  ;;  %v496_v38 = vadd.f32 %v3834_v34, %v5448_v40  ;;  %v490_v39 = vpop.f32.mrb[17].mxu1 }
 0x245   :  { %4973 = vrcp.f32 %v570_v32  ;;  %v491_v41 = vadd.f32 %v5448_v40, %v490_v39 }
 0x246   :  { %v4960_v44 = vpop.eup %4959  ;;  %4975 = vrcp.f32 %v569_v37  ;;  %v3378_v45 = vmul.f32 -1.442695, %v496_v38 }
 0x247   :  { %v4962_v46 = vpop.eup %4961  ;;  %v572_v47 = vadd.f32 1.0, %v4960_v44  ;;  %4977 = vpow2.f32 %v3375_v33  ;;  %v3377_v48 = vmul.f32 -1.442695, %v491_v41  ;;  %v3837_v49 = vpop.f32.mrb[18].mxu1 }
 0x248   :  { %v571_v52 = vadd.f32 1.0, %v4962_v46  ;;  %4979 = vpow2.f32 %v3378_v45  ;;  %v506_v53 = vadd.f32 %v3837_v49, %v5448_v40  ;;  %v500_v54 = vpop.f32.mrb[19].mxu1 }
 0x249   :  { %4981 = vrcp.f32 %v572_v47  ;;  %v501_v55 = vadd.f32 %v5448_v40, %v500_v54 }
 0x24a   :  { %v4964_v58 = vpop.eup %4963  ;;  %4983 = vrcp.f32 %v571_v52  ;;  %v3380_v59 = vmul.f32 -1.442695, %v506_v53 }
 0x24b   :  { %v4966_v60 = vpop.eup %4965  ;;  %v574_v61 = vadd.f32 1.0, %v4964_v58  ;;  %4985 = vpow2.f32 %v3377_v48  ;;  %v3379_v0 = vmul.f32 -1.442695, %v501_v55  ;;  %v3840_v2 = vpop.f32.mrb[20].mxu1 }
 0x24c   :  { %v4968_v4 = vpop.eup %4967  ;;  %4987 = vpow2.f32 %v3380_v59  ;;  %v516_v6 = vadd.f32 %v3840_v2, %v5448_v40  ;;  %622 = vperm.xlu1 %4619, %v4966_v60   ;;  %v510_v8 = vpop.f32.mrb[21].mxu1  ;;  %v828_v60 = vld [vmem:[%s6542_s3] sm:$0xff] }
 0x24d   :  { %v4970_v10 = vpop.eup %4969  ;;  %4989 = vrcp.f32 %v574_v61  ;;  %v511_v12 = vadd.f32 %v5448_v40, %v510_v8  ;;  %617 = vperm.xlu0 %4620, %v4968_v4   ;;  %v829_v61 = vld [vmem:[%s6542_s3 + $0x8] sm:$0xff]  ;;  %v831_v4 = vld [vmem:[%s6542_s3 + $0x18] sm:$0xff] }
 0x24e   :  { %v4972_v13 = vpop.eup %4971  ;;  %v573_v14 = vadd.f32 1.0, %v4970_v10  ;;  %4991 = vpow2.f32 %v3379_v0  ;;  %v3382_v15 = vmul.f32 -1.442695, %v516_v6  ;;  %v830_v0 = vld [vmem:[%s6542_s3 + $0x10] sm:$0xff]  ;;  %v4246_v2 = vpack.c.bf16 %v829_v61, %v828_v60  ;;  %v5481_v10 = vld [vmem:[%s6543_s11] ss:$0 sm:$0xff] }
 0x24f   :  { %v4974_v16 = vpop.eup %4973  ;;  %v576_v17 = vadd.f32 1.0, %v4972_v13  ;;  %v3381_v18 = vmul.f32 -1.442695, %v511_v12  ;;  %v4250_v6 = vpack.c.bf16 %v831_v4, %v830_v0  ;;  %s5181_s3 = smov 120  }
 0x250   :  { %v4976_v19 = vpop.eup %4975  ;;  %4993 = vrcp.f32 %v573_v14  ;;  %4247 = vmatprep.subr.bf16.mxu0 %v4246_v2 }
 0x251   :  { %v4978_v20 = vpop.eup %4977  ;;  %4995 = vrcp.f32 %v576_v17  ;;  %627 = vperm.xlu1 %4619, %v4976_v19   ;;  %632 = vperm.xlu0 %4620, %v4974_v16  }
 0x252   :  { %v4980_v21 = vpop.eup %4979  ;;  %v575_v26 = vadd.f32 1.0, %v4978_v20  ;;  %4997 = vpow2.f32 %v3382_v15  ;;  %4249 = vmatpush3.bf16.msra.mxu0 %v4246_v2 }
 0x253   :  { %v4982_v29 = vpop.eup %4981  ;;  %v578_v30 = vadd.f32 1.0, %v4980_v21  ;;  %4999 = vpow2.f32 %v3381_v18  ;;  %4251 = vmatprep.subr.bf16.mxu0 %v4250_v6 }
 0x254   :  { %v4984_v40 = vpop.eup %4983  ;;  %5001 = vrcp.f32 %v575_v26 }
 0x255   :  { %v4986_v31 = vpop.eup %4985  ;;  %5003 = vrcp.f32 %v578_v30  ;;  %642 = vperm.xlu0 %4620, %v4982_v29   ;;  %637 = vperm.xlu1 %4619, %v4984_v40  }
 0x256   :  { %v4988_v32 = vpop.eup %4987  ;;  %v577_v33 = vadd.f32 1.0, %v4986_v31  ;;  %4253 = vmatpush3.bf16.msra.mxu0 %v4250_v6 }
 0x257   :  { %v4990_v34 = vpop.eup %4989  ;;  %v580_v37 = vadd.f32 1.0, %v4988_v32 }
 0x258   :  { %v4992_v38 = vpop.eup %4991  ;;  %5005 = vrcp.f32 %v577_v33 }
 0x259   :  { %5007 = vrcp.f32 %v580_v37  ;;  %v579_v39 = vadd.f32 1.0, %v4992_v38  ;;  %652 = vperm.xlu0 %4620, %v4990_v34  }
 0x25a   :  { %v4994_v41 = vpop.eup %4993 }
 0x25b   :  { %v4996_v44 = vpop.eup %4995  ;;  %5009 = vrcp.f32 %v579_v39  ;;  %647 = vperm.xlu1 %4619, %v4994_v41  }
 0x25c   :  { %v4998_v45 = vpop.eup %4997 }
 0x25d   :  { %v5000_v46 = vpop.eup %4999  ;;  %v582_v47 = vadd.f32 1.0, %v4998_v45  ;;  %662 = vperm.xlu0 %4620, %v4996_v44  }
 0x25e   :  { %v5002_v48 = vpop.eup %5001  ;;  %v581_v49 = vadd.f32 1.0, %v5000_v46 }
 0x25f   :  { %v5004_v52 = vpop.eup %5003  ;;  %5011 = vrcp.f32 %v582_v47  ;;  %657 = vperm.xlu1 %4619, %v5002_v48  }
 0x260   :  { %5013 = vrcp.f32 %v581_v49 }
 0x261   :  { %672 = vperm.xlu0 %4620, %v5004_v52  }
 0x262   :  { %v5006_v53 = vpop.eup %5005 }
 0x263   :  { %v5008_v54 = vpop.eup %5007  ;;  %667 = vperm.xlu1 %4619, %v5006_v53  }
 0x265   :  { %v5010_v55 = vpop.eup %5009  ;;  %682 = vperm.xlu0 %4620, %v5008_v54  }
 0x267   :  { %677 = vperm.xlu1 %4619, %v5010_v55  }
 0x269   :  { %v5012_v58 = vpop.eup %5011 }
 0x26a   :  { %v5014_v59 = vpop.eup %5013  ;;  %692 = vperm.xlu0 %4620, %v5012_v58  }
 0x26b   :  { %687 = vperm.xlu1 %4619, %v5014_v59  }
 0x2cb   :  { %v623_v8 = vpop.permute.xlu1 %622 }
 0x2cc   :  { %v5484_v12 = vmul.f32 %v623_v8, %v5367_v36  ;;  %v618_v13 = vpop.permute.xlu0 %617 }
 0x2cd   :  { %v5487_v14 = vmul.f32 %v618_v13, %v5365_v35 }
 0x2ce   :  { %v717_v15 = vmul.f32 %v5481_v10, %v5484_v12 }
 0x2cf   :  { %v716_v16 = vmul.f32 %v5481_v10, %v5487_v14 }
 0x2d0   :  { %v628_v17 = vpop.permute.xlu1 %627  ;;  %v633_v18 = vpop.permute.xlu0 %632  ;;  %v735_v19 = vsel %vm341_vm4, %v717_v15, 0.0 }
 0x2d1   :  { %v5495_v20 = vmul.f32 %v628_v17, %v5372_v43  ;;  %v5498_v21 = vmul.f32 %v633_v18, %v5370_v42  ;;  %736 = vadd.xlane.f32.xlu0 %v735_v19  ;;  %v732_v26 = vsel %vm341_vm4, %v716_v16, 0.0 }
 0x2d2   :  { %733 = vadd.xlane.f32.xlu1 %v732_v26 }
 0x2d3   :  { %v718_v29 = vmul.f32 %v5481_v10, %v5495_v20  ;;  %v719_v30 = vmul.f32 %v5481_v10, %v5498_v21 }
 0x2d4   :  { %v638_v40 = vpop.permute.xlu1 %637  ;;  %v643_v31 = vpop.permute.xlu0 %642 }
 0x2d5   :  { %v5506_v32 = vmul.f32 %v638_v40, %v5381_v51  ;;  %v5509_v33 = vmul.f32 %v643_v31, %v5379_v50  ;;  %v738_v34 = vsel %vm341_vm4, %v718_v29, 0.0  ;;  %v741_v37 = vsel %vm341_vm4, %v719_v30, 0.0 }
 0x2d6   :  { %739 = vadd.xlane.f32.xlu0 %v738_v34  ;;  %742 = vadd.xlane.f32.xlu1 %v741_v37 }
 0x2d7   :  { %v720_v38 = vmul.f32 %v5481_v10, %v5506_v32  ;;  %v721_v39 = vmul.f32 %v5481_v10, %v5509_v33 }
 0x2d8   :  { %v653_v41 = vpop.permute.xlu0 %652 }
 0x2d9   :  { %v5518_v44 = vmul.f32 %v653_v41, %v5386_v56  ;;  %v744_v45 = vsel %vm341_vm4, %v720_v38, 0.0  ;;  %v747_v46 = vsel %vm341_vm4, %v721_v39, 0.0 }
 0x2da   :  { %v648_v47 = vpop.permute.xlu1 %647  ;;  %745 = vadd.xlane.f32.xlu0 %v744_v45  ;;  %748 = vadd.xlane.f32.xlu1 %v747_v46 }
 0x2db   :  { %v5523_v48 = vmul.f32 %v648_v47, %v5388_v57  ;;  %v723_v49 = vmul.f32 %v5481_v10, %v5518_v44 }
 0x2dc   :  { %v663_v52 = vpop.permute.xlu0 %662 }
 0x2dd   :  { %v5528_v53 = vmul.f32 %v663_v52, %v5394_v62  ;;  %v722_v54 = vmul.f32 %v5481_v10, %v5523_v48  ;;  %v753_v55 = vsel %vm341_vm4, %v723_v49, 0.0 }
 0x2de   :  { %v658_v58 = vpop.permute.xlu1 %657  ;;  %754 = vadd.xlane.f32.xlu1 %v753_v55 }
 0x2df   :  { %v5534_v59 = vmul.f32 %v658_v58, %v5396_v63  ;;  %v750_v60 = vsel %vm341_vm4, %v722_v54, 0.0  ;;  %v725_v61 = vmul.f32 %v5481_v10, %v5528_v53 }
 0x2e0   :  { %751 = vadd.xlane.f32.xlu0 %v750_v60  ;;  %v673_v0 = vpop.permute.xlu0 %672 }
 0x2e1   :  { %v5540_v2 = vmul.f32 %v673_v0, %v5404_v3  ;;  %v724_v4 = vmul.f32 %v5481_v10, %v5534_v59  ;;  %v759_v6 = vsel %vm341_vm4, %v725_v61, 0.0 }
 0x2e2   :  { %v668_v8 = vpop.permute.xlu1 %667  ;;  %760 = vadd.xlane.f32.xlu1 %v759_v6 }
 0x2e3   :  { %v5546_v13 = vmul.f32 %v668_v8, %v5400_v1  ;;  %v756_v15 = vsel %vm341_vm4, %v724_v4, 0.0  ;;  %v727_v16 = vmul.f32 %v5481_v10, %v5540_v2 }
 0x2e4   :  { %757 = vadd.xlane.f32.xlu0 %v756_v15  ;;  %v683_v17 = vpop.permute.xlu0 %682 }
 0x2e5   :  { %v5552_v18 = vmul.f32 %v683_v17, %v5412_v7  ;;  %v726_v19 = vmul.f32 %v5481_v10, %v5546_v13  ;;  %v765_v26 = vsel %vm341_vm4, %v727_v16, 0.0 }
 0x2e6   :  { %v678_v29 = vpop.permute.xlu1 %677  ;;  %766 = vadd.xlane.f32.xlu1 %v765_v26 }
 0x2e7   :  { %v5558_v30 = vmul.f32 %v678_v29, %v5408_v5  ;;  %v762_v40 = vsel %vm341_vm4, %v726_v19, 0.0  ;;  %v729_v31 = vmul.f32 %v5481_v10, %v5552_v18 }
 0x2e8   :  { %763 = vadd.xlane.f32.xlu0 %v762_v40 }
 0x2e9   :  { %v693_v34 = vpop.permute.xlu0 %692  ;;  %v728_v37 = vmul.f32 %v5481_v10, %v5558_v30  ;;  %v771_v38 = vsel %vm341_vm4, %v729_v31, 0.0 }
 0x2ea   :  { %v688_v39 = vpop.permute.xlu1 %687  ;;  %v5567_v41 = vmul.f32 %v693_v34, %v5420_v11  ;;  %772 = vadd.xlane.f32.xlu1 %v771_v38 }
 0x2eb   :  { %v5570_v45 = vmul.f32 %v688_v39, %v5416_v9  ;;  %v768_v46 = vsel %vm341_vm4, %v728_v37, 0.0 }
 0x2ec   :  { %769 = vadd.xlane.f32.xlu0 %v768_v46  ;;  %v731_v47 = vmul.f32 %v5481_v10, %v5567_v41 }
 0x2ed   :  { %v730_v49 = vmul.f32 %v5481_v10, %v5570_v45 }
 0x2ee   :  { %v777_v52 = vsel %vm341_vm4, %v731_v47, 0.0 }
 0x2ef   :  { %v774_v54 = vsel %vm341_vm4, %v730_v49, 0.0  ;;  %778 = vadd.xlane.f32.xlu1 %v777_v52 }
 0x2f0   :  { %775 = vadd.xlane.f32.xlu0 %v774_v54 }
 0x35e   :  { %v737_v55 = vpop.xlane.xlu0 %736 }
 0x35f   :  { %v781_v58 = vmul.f32 0.03125, %v737_v55  ;;  %v734_v60 = vpop.xlane.xlu1 %733 }
 0x360   :  { %v780_v61 = vmul.f32 0.03125, %v734_v60 }
 0x361   :  { %v797_v0 = vmul.f32 %v5481_v10, %v781_v58 }
 0x362   :  { %v796_v4 = vmul.f32 %v5481_v10, %v780_v61 }
 0x363   :  { %v743_v6 = vpop.xlane.xlu1 %742  ;;  %v740_v8 = vpop.xlane.xlu0 %739  ;;  %v5585_v19 = vsub.f32 %v5484_v12, %v797_v0 }
 0x364   :  { %v5582_v15 = vsub.f32 %v5487_v14, %v796_v4  ;;  %v783_v16 = vmul.f32 0.03125, %v743_v6  ;;  %v782_v17 = vmul.f32 0.03125, %v740_v8 }
 0x366   :  { %v799_v26 = vmul.f32 %v5481_v10, %v783_v16  ;;  %v798_v29 = vmul.f32 %v5481_v10, %v782_v17  ;;  %3849 = vmatprep.mubr.msk.f32.mxu0 %vm341_vm4, %v5582_v15 }
 0x367   :  { %v749_v40 = vpop.xlane.xlu1 %748  ;;  %3850 = vmatmul.mubr.msk.f32.vlgmr.msra.gmra.mrb[10].mxu0 %vm341_vm4, %v5585_v19  ;;  %v746_v31 = vpop.xlane.xlu0 %745 }
 0x368   :  { %v5594_v14 = vsub.f32 %v5498_v21, %v799_v26  ;;  %v5597_v34 = vsub.f32 %v5495_v20, %v798_v29  ;;  %v785_v12 = vmul.f32 0.03125, %v749_v40  ;;  %v784_v37 = vmul.f32 0.03125, %v746_v31 }
 0x36a   :  { %v801_v38 = vmul.f32 %v5481_v10, %v785_v12  ;;  %v800_v39 = vmul.f32 %v5481_v10, %v784_v37  ;;  %3852 = vmatprep.mubr.msk.f32.mxu0 %vm341_vm4, %v5597_v34 }
 0x36b   :  { %v755_v46 = vpop.xlane.xlu1 %754  ;;  %3853 = vmatmul.mubr.msk.f32.gmra.mrb[12].mxu0 %vm341_vm4, %v5594_v14 }
 0x36c   :  { %v5606_v47 = vsub.f32 %v5509_v33, %v801_v38  ;;  %v5609_v21 = vsub.f32 %v5506_v32, %v800_v39  ;;  %v787_v20 = vmul.f32 0.03125, %v755_v46 }
 0x36d   :  { %v752_v49 = vpop.xlane.xlu0 %751 }
 0x36e   :  { %v803_v52 = vmul.f32 %v5481_v10, %v787_v20  ;;  %v786_v54 = vmul.f32 0.03125, %v752_v49  ;;  %3855 = vmatprep.mubr.msk.f32.mxu0 %vm341_vm4, %v5609_v21 }
 0x36f   :  { %v761_v55 = vpop.xlane.xlu1 %760  ;;  %3856 = vmatmul.mubr.msk.f32.gmra.mrb[14].mxu0 %vm341_vm4, %v5606_v47 }
 0x370   :  { %v802_v58 = vmul.f32 %v5481_v10, %v786_v54  ;;  %v789_v60 = vmul.f32 0.03125, %v761_v55  ;;  %v5618_v33 = vsub.f32 %v5518_v44, %v803_v52 }
 0x371   :  { %v758_v32 = vpop.xlane.xlu0 %757 }
 0x372   :  { %v5621_v61 = vsub.f32 %v5523_v48, %v802_v58  ;;  %v805_v0 = vmul.f32 %v5481_v10, %v789_v60  ;;  %v788_v4 = vmul.f32 0.03125, %v758_v32 }
 0x373   :  { %v767_v6 = vpop.xlane.xlu1 %766 }
 0x374   :  { %v804_v8 = vmul.f32 %v5481_v10, %v788_v4  ;;  %3858 = vmatprep.mubr.msk.f32.mxu0 %vm341_vm4, %v5621_v61  ;;  %v791_v16 = vmul.f32 0.03125, %v767_v6  ;;  %v5628_v17 = vsub.f32 %v5528_v53, %v805_v0 }
 0x375   :  { %3859 = vmatmul.mubr.msk.f32.gmra.mrb[16].mxu0 %vm341_vm4, %v5618_v33  ;;  %v764_v44 = vpop.xlane.xlu0 %763 }
 0x376   :  { %v5633_v48 = vsub.f32 %v5534_v59, %v804_v8  ;;  %v807_v26 = vmul.f32 %v5481_v10, %v791_v16  ;;  %v790_v29 = vmul.f32 0.03125, %v764_v44 }
 0x377   :  { %v773_v40 = vpop.xlane.xlu1 %772 }
 0x378   :  { %v806_v31 = vmul.f32 %v5481_v10, %v790_v29  ;;  %3861 = vmatprep.mubr.msk.f32.mxu0 %vm341_vm4, %v5633_v48  ;;  %v793_v12 = vmul.f32 0.03125, %v773_v40  ;;  %v5640_v53 = vsub.f32 %v5540_v2, %v807_v26 }
 0x379   :  { %3862 = vmatmul.mubr.msk.f32.gmra.mrb[18].mxu0 %vm341_vm4, %v5628_v17  ;;  %v770_v37 = vpop.xlane.xlu0 %769 }
 0x37a   :  { %v5645_v59 = vsub.f32 %v5546_v13, %v806_v31  ;;  %v809_v38 = vmul.f32 %v5481_v10, %v793_v12  ;;  %v792_v39 = vmul.f32 0.03125, %v770_v37 }
 0x37c   :  { %v808_v46 = vmul.f32 %v5481_v10, %v792_v39  ;;  %3864 = vmatprep.mubr.msk.f32.mxu0 %vm341_vm4, %v5645_v59  ;;  %v779_v20 = vpop.xlane.xlu1 %778  ;;  %v5652_v49 = vsub.f32 %v5552_v18, %v809_v38 }
 0x37d   :  { %v795_v2 = vmul.f32 0.03125, %v779_v20  ;;  %3865 = vmatmul.mubr.msk.f32.gmra.mrb[20].mxu0 %vm341_vm4, %v5640_v53  ;;  %v776_v52 = vpop.xlane.xlu0 %775 }
 0x37e   :  { %v5657_v13 = vsub.f32 %v5558_v30, %v808_v46  ;;  %v794_v54 = vmul.f32 0.03125, %v776_v52 }
 0x37f   :  { %v811_v55 = vmul.f32 %v5481_v10, %v795_v2 }
 0x380   :  { %v810_v58 = vmul.f32 %v5481_v10, %v794_v54  ;;  %3867 = vmatprep.mubr.msk.f32.mxu0 %vm341_vm4, %v5657_v13  ;;  %v5678_v10 = vld [vmem:[%s6544_s4] ss:$0 sm:$0xff]  ;;  %s5183_s4 = smov 80  }
 0x381   :  { %v5664_v60 = vsub.f32 %v5567_v41, %v811_v55  ;;  %3868 = vmatmul.mubr.msk.f32.gmra.mrb[22].mxu0 %vm341_vm4, %v5652_v49 }
 0x382   :  { %v5669_v18 = vsub.f32 %v5570_v45, %v810_v58 }
 0x383   :  { %6563 = vst [vmem:[#allocation7_spill] sm:$0xff] %v5664_v60 }
 0x384   :  { %3870 = vmatprep.mubr.msk.f32.mxu0 %vm341_vm4, %v5669_v18 }
 0x385   :  { %3871 = vmatmul.mubr.msk.f32.gmra.mrb[24].mxu0 %vm341_vm4, %v5664_v60 }
 0x43a   :  { %v3851_v30 = vpop.f32.mrb[10].mxu0 }
 0x43b   :  { %v959_v41 = vadd.f32 %v3851_v30, %v5678_v10  ;;  %v953_v32 = vpop.f32.mrb[11].mxu0 }
 0x43c   :  { %v954_v0 = vadd.f32 %v5678_v10, %v953_v32 }
 0x43d   :  { %v1033_v4 = vmax.f32 %v959_v41, 0.0 }
 0x43e   :  { %v1032_v45 = vmax.f32 %v954_v0, 0.0  ;;  %v3854_v6 = vpop.f32.mrb[12].mxu0 }
 0x43f   :  { %v969_v8 = vadd.f32 %v3854_v6, %v5678_v10  ;;  %v963_v16 = vpop.f32.mrb[13].mxu0  ;;  %v5684_v44 = vsub.f32 %v5367_v36, %v1033_v4 }
 0x440   :  { %v964_v26 = vadd.f32 %v5678_v10, %v963_v16  ;;  %v5688_v29 = vsub.f32 %v5365_v35, %v1032_v45 }
 0x441   :  { %v1035_v40 = vmax.f32 %v969_v8, 0.0  ;;  %v1067_v31 = vsel %vm341_vm4, %v5684_v44, 0.0 }
 0x442   :  { %v1034_v12 = vmax.f32 %v964_v26, 0.0  ;;  %1068 = vadd.xlane.f32.xlu1 %v1067_v31  ;;  %v3857_v37 = vpop.f32.mrb[14].mxu0  ;;  %v1064_v38 = vsel %vm341_vm4, %v5688_v29, 0.0 }
 0x443   :  { %v979_v39 = vadd.f32 %v3857_v37, %v5678_v10  ;;  %1065 = vadd.xlane.f32.xlu0 %v1064_v38  ;;  %v973_v46 = vpop.f32.mrb[15].mxu0  ;;  %v5696_v20 = vsub.f32 %v5370_v42, %v1035_v40 }
 0x444   :  { %v974_v2 = vadd.f32 %v5678_v10, %v973_v46  ;;  %v5700_v52 = vsub.f32 %v5372_v43, %v1034_v12 }
 0x445   :  { %v1037_v54 = vmax.f32 %v979_v39, 0.0  ;;  %v1073_v55 = vsel %vm341_vm4, %v5696_v20, 0.0 }
 0x446   :  { %v1036_v58 = vmax.f32 %v974_v2, 0.0  ;;  %1074 = vadd.xlane.f32.xlu1 %v1073_v55  ;;  %v1070_v30 = vsel %vm341_vm4, %v5700_v52, 0.0 }
 0x447   :  { %1071 = vadd.xlane.f32.xlu0 %v1070_v30  ;;  %v5707_v41 = vsub.f32 %v5379_v50, %v1037_v54 }
 0x448   :  { %v3860_v32 = vpop.f32.mrb[16].mxu0  ;;  %v5710_v0 = vsub.f32 %v5381_v51, %v1036_v58 }
 0x449   :  { %v989_v4 = vadd.f32 %v3860_v32, %v5678_v10  ;;  %v983_v45 = vpop.f32.mrb[17].mxu0  ;;  %v1079_v6 = vsel %vm341_vm4, %v5707_v41, 0.0 }
 0x44a   :  { %v984_v8 = vadd.f32 %v5678_v10, %v983_v45  ;;  %1080 = vadd.xlane.f32.xlu1 %v1079_v6  ;;  %v1076_v16 = vsel %vm341_vm4, %v5710_v0, 0.0 }
 0x44b   :  { %v1039_v26 = vmax.f32 %v989_v4, 0.0  ;;  %1077 = vadd.xlane.f32.xlu0 %v1076_v16 }
 0x44c   :  { %v1038_v40 = vmax.f32 %v984_v8, 0.0  ;;  %v3863_v31 = vpop.f32.mrb[18].mxu0 }
 0x44d   :  { %v999_v12 = vadd.f32 %v3863_v31, %v5678_v10  ;;  %v993_v37 = vpop.f32.mrb[19].mxu0  ;;  %v5720_v38 = vsub.f32 %v5386_v56, %v1039_v26 }
 0x44e   :  { %v994_v39 = vadd.f32 %v5678_v10, %v993_v37  ;;  %v5724_v46 = vsub.f32 %v5388_v57, %v1038_v40 }
 0x44f   :  { %v1041_v2 = vmax.f32 %v999_v12, 0.0  ;;  %v1085_v54 = vsel %vm341_vm4, %v5720_v38, 0.0 }
 0x450   :  { %v1040_v55 = vmax.f32 %v994_v39, 0.0  ;;  %1086 = vadd.xlane.f32.xlu1 %v1085_v54  ;;  %v3866_v58 = vpop.f32.mrb[20].mxu0  ;;  %v1082_v30 = vsel %vm341_vm4, %v5724_v46, 0.0 }
 0x451   :  { %v1009_v32 = vadd.f32 %v3866_v58, %v5678_v10  ;;  %1083 = vadd.xlane.f32.xlu0 %v1082_v30  ;;  %v1003_v4 = vpop.f32.mrb[21].mxu0  ;;  %v5732_v45 = vsub.f32 %v5394_v62, %v1041_v2 }
 0x452   :  { %v1004_v6 = vadd.f32 %v5678_v10, %v1003_v4  ;;  %v5736_v8 = vsub.f32 %v5396_v63, %v1040_v55 }
 0x453   :  { %v1043_v16 = vmax.f32 %v1009_v32, 0.0  ;;  %v1091_v26 = vsel %vm341_vm4, %v5732_v45, 0.0 }
 0x454   :  { %v1042_v40 = vmax.f32 %v1004_v6, 0.0  ;;  %1092 = vadd.xlane.f32.xlu1 %v1091_v26  ;;  %v3869_v31 = vpop.f32.mrb[22].mxu0  ;;  %v1088_v12 = vsel %vm341_vm4, %v5736_v8, 0.0 }
 0x455   :  { %v1019_v37 = vadd.f32 %v3869_v31, %v5678_v10  ;;  %1089 = vadd.xlane.f32.xlu0 %v1088_v12  ;;  %v1013_v39 = vpop.f32.mrb[23].mxu0  ;;  %v5744_v2 = vsub.f32 %v5404_v3, %v1043_v16 }
 0x456   :  { %v1014_v54 = vadd.f32 %v5678_v10, %v1013_v39  ;;  %v5748_v55 = vsub.f32 %v5400_v1, %v1042_v40 }
 0x457   :  { %v1045_v58 = vmax.f32 %v1019_v37, 0.0  ;;  %v1097_v30 = vsel %vm341_vm4, %v5744_v2, 0.0 }
 0x458   :  { %v1044_v32 = vmax.f32 %v1014_v54, 0.0  ;;  %1098 = vadd.xlane.f32.xlu1 %v1097_v30  ;;  %v3872_v4 = vpop.f32.mrb[24].mxu0  ;;  %v1094_v6 = vsel %vm341_vm4, %v5748_v55, 0.0 }
 0x459   :  { %v5755_v26 = vadd.f32 %v3872_v4, %v5678_v10  ;;  %1095 = vadd.xlane.f32.xlu0 %v1094_v6  ;;  %v1023_v16 = vpop.f32.mrb[25].mxu0  ;;  %v5758_v31 = vsub.f32 %v5412_v7, %v1045_v58  ;;  %v1347_v6 = vld [vmem:[%s6545_s5] sm:$0xff] }
 0x45a   :  { %v5761_v40 = vadd.f32 %v5678_v10, %v1023_v16  ;;  %v5764_v12 = vsub.f32 %v5408_v5, %v1044_v32  ;;  %v1348_v16 = vld [vmem:[%s6545_s5 + $0x8] sm:$0xff] }
 0x45b   :  { %6564 = vst [vmem:[#allocation8_spill] sm:$0xff] %v5755_v26  ;;  %v1047_v37 = vmax.f32 %v5755_v26, 0.0  ;;  %v1103_v39 = vsel %vm341_vm4, %v5758_v31, 0.0 }
 0x45c   :  { %6565 = vst [vmem:[#allocation9_spill] sm:$0xff] %v5761_v40  ;;  %v1046_v54 = vmax.f32 %v5761_v40, 0.0  ;;  %1104 = vadd.xlane.f32.xlu1 %v1103_v39  ;;  %v1100_v30 = vsel %vm341_vm4, %v5764_v12, 0.0 }
 0x45d   :  { %1101 = vadd.xlane.f32.xlu0 %v1100_v30  ;;  %v5773_v58 = vsub.f32 %v5420_v11, %v1047_v37  ;;  %v4254_v37 = vpack.c.bf16 %v1348_v16, %v1347_v6 }
 0x45e   :  { %v5776_v10 = vsub.f32 %v5416_v9, %v1046_v54 }
 0x45f   :  { %v1109_v32 = vsel %vm341_vm4, %v5773_v58, 0.0  ;;  %4255 = vmatprep.subr.bf16.mxu1 %v4254_v37 }
 0x460   :  { %1110 = vadd.xlane.f32.xlu1 %v1109_v32  ;;  %v1106_v4 = vsel %vm341_vm4, %v5776_v10, 0.0  ;;  %4257 = vmatpush3.bf16.msra.mxu1 %v4254_v37 }
 0x461   :  { %1107 = vadd.xlane.f32.xlu0 %v1106_v4 }
 0x4cf   :  { %v1069_v39 = vpop.xlane.xlu1 %1068 }
 0x4d0   :  { %v1114_v54 = vmul.f32 0.03125, %v1069_v39  ;;  %v1066_v30 = vpop.xlane.xlu0 %1065 }
 0x4d1   :  { %v1113_v25 = vmul.f32 0.03125, %v1066_v30 }
 0x4d2   :  { %v5789_v32 = vsub.f32 %v5684_v44, %v1114_v54 }
 0x4d3   :  { %v5792_v4 = vsub.f32 %v5688_v29, %v1113_v25  ;;  %v1075_v28 = vpop.xlane.xlu1 %1074 }
 0x4d4   :  { %v1116_v26 = vmul.f32 0.03125, %v1075_v28  ;;  %v1072_v40 = vpop.xlane.xlu0 %1071  ;;  %v1146_v22 = vmul.f32 %v5789_v32, %v5789_v32 }
 0x4d5   :  { %v1115_v23 = vmul.f32 0.03125, %v1072_v40  ;;  %v1145_v6 = vmul.f32 %v5792_v4, %v5792_v4 }
 0x4d6   :  { %v5799_v16 = vsub.f32 %v5696_v20, %v1116_v26  ;;  %v1164_v37 = vsel %vm341_vm4, %v1146_v22, 0.0 }
 0x4d7   :  { %v5803_v44 = vsub.f32 %v5700_v52, %v1115_v23  ;;  %v1081_v25 = vpop.xlane.xlu1 %1080  ;;  %1165 = vadd.xlane.f32.xlu1 %v1164_v37  ;;  %v1161_v28 = vsel %vm341_vm4, %v1145_v6, 0.0 }
 0x4d8   :  { %v1118_v29 = vmul.f32 0.03125, %v1081_v25  ;;  %1162 = vadd.xlane.f32.xlu0 %v1161_v28  ;;  %v1078_v39 = vpop.xlane.xlu0 %1077  ;;  %v1148_v40 = vmul.f32 %v5799_v16, %v5799_v16 }
 0x4d9   :  { %v1117_v54 = vmul.f32 0.03125, %v1078_v39  ;;  %v1147_v20 = vmul.f32 %v5803_v44, %v5803_v44 }
 0x4da   :  { %v5811_v26 = vsub.f32 %v5707_v41, %v1118_v29  ;;  %v1170_v22 = vsel %vm341_vm4, %v1148_v40, 0.0 }
 0x4db   :  { %v5815_v23 = vsub.f32 %v5710_v0, %v1117_v54  ;;  %1171 = vadd.xlane.f32.xlu1 %v1170_v22  ;;  %v1167_v52 = vsel %vm341_vm4, %v1147_v20, 0.0 }
 0x4dc   :  { %1168 = vadd.xlane.f32.xlu0 %v1167_v52  ;;  %v1150_v30 = vmul.f32 %v5811_v26, %v5811_v26 }
 0x4dd   :  { %v1087_v6 = vpop.xlane.xlu1 %1086  ;;  %v1149_v37 = vmul.f32 %v5815_v23, %v5815_v23 }
 0x4de   :  { %v1120_v25 = vmul.f32 0.03125, %v1087_v6  ;;  %v1084_v28 = vpop.xlane.xlu0 %1083  ;;  %v1176_v41 = vsel %vm341_vm4, %v1150_v30, 0.0 }
 0x4df   :  { %v1119_v29 = vmul.f32 0.03125, %v1084_v28  ;;  %1177 = vadd.xlane.f32.xlu1 %v1176_v41  ;;  %v1173_v0 = vsel %vm341_vm4, %v1149_v37, 0.0 }
 0x4e0   :  { %v5825_v39 = vsub.f32 %v5720_v38, %v1120_v25  ;;  %1174 = vadd.xlane.f32.xlu0 %v1173_v0 }
 0x4e1   :  { %v5828_v40 = vsub.f32 %v5724_v46, %v1119_v29  ;;  %v1093_v54 = vpop.xlane.xlu1 %1092 }
 0x4e2   :  { %v1122_v20 = vmul.f32 0.03125, %v1093_v54  ;;  %v1090_v22 = vpop.xlane.xlu0 %1089  ;;  %v1152_v52 = vmul.f32 %v5825_v39, %v5825_v39 }
 0x4e3   :  { %v1121_v6 = vmul.f32 0.03125, %v1090_v22  ;;  %v1151_v30 = vmul.f32 %v5828_v40, %v5828_v40 }
 0x4e4   :  { %v5835_v28 = vsub.f32 %v5732_v45, %v1122_v20  ;;  %v1182_v38 = vsel %vm341_vm4, %v1152_v52, 0.0 }
 0x4e5   :  { %v5839_v37 = vsub.f32 %v5736_v8, %v1121_v6  ;;  %v1099_v46 = vpop.xlane.xlu1 %1098  ;;  %1183 = vadd.xlane.f32.xlu1 %v1182_v38  ;;  %v1179_v25 = vsel %vm341_vm4, %v1151_v30, 0.0 }
 0x4e6   :  { %v1124_v41 = vmul.f32 0.03125, %v1099_v46  ;;  %1180 = vadd.xlane.f32.xlu0 %v1179_v25  ;;  %v1096_v29 = vpop.xlane.xlu0 %1095  ;;  %v1154_v0 = vmul.f32 %v5835_v28, %v5835_v28 }
 0x4e7   :  { %v1123_v54 = vmul.f32 0.03125, %v1096_v29  ;;  %v1153_v45 = vmul.f32 %v5839_v37, %v5839_v37 }
 0x4e8   :  { %v5847_v20 = vsub.f32 %v5744_v2, %v1124_v41  ;;  %v1188_v8 = vsel %vm341_vm4, %v1154_v0, 0.0 }
 0x4e9   :  { %v5851_v22 = vsub.f32 %v5748_v55, %v1123_v54  ;;  %v1105_v52 = vpop.xlane.xlu1 %1104  ;;  %1189 = vadd.xlane.f32.xlu1 %v1188_v8  ;;  %v1185_v6 = vsel %vm341_vm4, %v1153_v45, 0.0 }
 0x4ea   :  { %v1126_v30 = vmul.f32 0.03125, %v1105_v52  ;;  %1186 = vadd.xlane.f32.xlu0 %v1185_v6  ;;  %v1102_v38 = vpop.xlane.xlu0 %1101  ;;  %v1156_v46 = vmul.f32 %v5847_v20, %v5847_v20 }
 0x4eb   :  { %v1125_v25 = vmul.f32 0.03125, %v1102_v38  ;;  %v1155_v2 = vmul.f32 %v5851_v22, %v5851_v22 }
 0x4ec   :  { %v5859_v41 = vsub.f32 %v5758_v31, %v1126_v30  ;;  %v1194_v55 = vsel %vm341_vm4, %v1156_v46, 0.0 }
 0x4ed   :  { %v5863_v29 = vsub.f32 %v5764_v12, %v1125_v25  ;;  %1195 = vadd.xlane.f32.xlu1 %v1194_v55  ;;  %v1111_v0 = vpop.xlane.xlu1 %1110  ;;  %v1191_v54 = vsel %vm341_vm4, %v1155_v2, 0.0 }
 0x4ee   :  { %v1128_v45 = vmul.f32 0.03125, %v1111_v0  ;;  %1192 = vadd.xlane.f32.xlu0 %v1191_v54  ;;  %v1108_v8 = vpop.xlane.xlu0 %1107  ;;  %v1158_v52 = vmul.f32 %v5859_v41, %v5859_v41  ;;  %v1350_v0 = vld [vmem:[%s6545_s5 + $0x18] sm:$0xff] }
 0x4ef   :  { %v1127_v6 = vmul.f32 0.03125, %v1108_v8  ;;  %v1157_v31 = vmul.f32 %v5863_v29, %v5863_v29 }
 0x4f0   :  { %v5871_v30 = vsub.f32 %v5773_v58, %v1128_v45  ;;  %v1200_v12 = vsel %vm341_vm4, %v1158_v52, 0.0 }
 0x4f1   :  { %v5875_v38 = vsub.f32 %v5776_v10, %v1127_v6  ;;  %1201 = vadd.xlane.f32.xlu1 %v1200_v12  ;;  %v1197_v46 = vsel %vm341_vm4, %v1157_v31, 0.0  ;;  %v1349_v10 = vld [vmem:[%s6545_s5 + $0x10] sm:$0xff]  ;;  %s5191_s5 = smov 16  }
 0x4f2   :  { %1198 = vadd.xlane.f32.xlu0 %v1197_v46  ;;  %v1160_v25 = vmul.f32 %v5871_v30, %v5871_v30  ;;  %v4258_v54 = vpack.c.bf16 %v1350_v0, %v1349_v10 }
 0x4f3   :  { %v1159_v2 = vmul.f32 %v5875_v38, %v5875_v38 }
 0x4f4   :  { %v1206_v55 = vsel %vm341_vm4, %v1160_v25, 0.0  ;;  %4259 = vmatprep.subr.bf16.mxu1 %v4258_v54 }
 0x4f5   :  { %1207 = vadd.xlane.f32.xlu1 %v1206_v55  ;;  %v1203_v58 = vsel %vm341_vm4, %v1159_v2, 0.0  ;;  %4261 = vmatpush3.bf16.msra.mxu1 %v4258_v54 }
 0x4f6   :  { %1204 = vadd.xlane.f32.xlu0 %v1203_v58 }
 0x564   :  { %v1166_v45 = vpop.xlane.xlu1 %1165 }
 0x565   :  { %v1210_v8 = vmul.f32 0.03125, %v1166_v45  ;;  %v1163_v52 = vpop.xlane.xlu0 %1162 }
 0x566   :  { %v1209_v6 = vmul.f32 0.03125, %v1163_v52 }
 0x567   :  { %v1226_v31 = vadd.f32 1e-05, %v1210_v8 }
 0x568   :  { %v1225_v12 = vadd.f32 1e-05, %v1209_v6  ;;  %v1172_v46 = vpop.xlane.xlu1 %1171  ;;  %v5893_v6 = vld [vmem:[%s6543_s11 + $0x1] ss:$0 sm:$0xff] }
 0x569   :  { %5015 = vrsqrt.f32 %v1226_v31  ;;  %v1212_v25 = vmul.f32 0.03125, %v1172_v46  ;;  %v1169_v2 = vpop.xlane.xlu0 %1168 }
 0x56a   :  { %5017 = vrsqrt.f32 %v1225_v12  ;;  %v1211_v55 = vmul.f32 0.03125, %v1169_v2 }
 0x56b   :  { %v1228_v58 = vadd.f32 1e-05, %v1212_v25 }
 0x56c   :  { %v1227_v24 = vadd.f32 1e-05, %v1211_v55  ;;  %v1178_v27 = vpop.xlane.xlu1 %1177 }
 0x56d   :  { %5019 = vrsqrt.f32 %v1228_v58  ;;  %v1214_v11 = vmul.f32 0.03125, %v1178_v27  ;;  %v1175_v10 = vpop.xlane.xlu0 %1174 }
 0x56e   :  { %5021 = vrsqrt.f32 %v1227_v24  ;;  %v1213_v0 = vmul.f32 0.03125, %v1175_v10  ;;  %v5899_v24 = vld [vmem:[%s6543_s11 + $0x2] ss:$0 sm:$0xff] }
 0x56f   :  { %v1230_v54 = vadd.f32 1e-05, %v1214_v11 }
 0x570   :  { %v1229_v45 = vadd.f32 1e-05, %v1213_v0 }
 0x571   :  { %5023 = vrsqrt.f32 %v1230_v54  ;;  %v1316_v54 = vsub.f32 %v5367_v36, %v5585_v19 }
 0x572   :  { %5025 = vrsqrt.f32 %v1229_v45  ;;  %v1184_v8 = vpop.xlane.xlu1 %1183 }
 0x573   :  { %v5016_v52 = vpop.eup %5015  ;;  %v1216_v31 = vmul.f32 0.03125, %v1184_v8  ;;  %v1181_v12 = vpop.xlane.xlu0 %1180 }
 0x574   :  { %v5018_v46 = vpop.eup %5017  ;;  %v1258_v25 = vmul.f32 %v5016_v52, %v5789_v32  ;;  %v1215_v27 = vmul.f32 0.03125, %v1181_v12 }
 0x575   :  { %v1232_v11 = vadd.f32 1e-05, %v1216_v31  ;;  %v1257_v2 = vmul.f32 %v5018_v46, %v5792_v4  ;;  %v1315_v46 = vsub.f32 %v5365_v35, %v5582_v15 }
 0x576   :  { %v1279_v55 = vmul.f32 %v5893_v6, %v1258_v25  ;;  %v1231_v58 = vadd.f32 1e-05, %v1215_v27  ;;  %v1190_v10 = vpop.xlane.xlu1 %1189 }
 0x577   :  { %v5020_v0 = vpop.eup %5019  ;;  %5027 = vrsqrt.f32 %v1232_v11  ;;  %v1218_v45 = vmul.f32 0.03125, %v1190_v10  ;;  %v1187_v32 = vpop.xlane.xlu0 %1186  ;;  %v1278_v8 = vmul.f32 %v5893_v6, %v1257_v2 }
 0x578   :  { %v5022_v52 = vpop.eup %5021  ;;  %v1300_v12 = vadd.f32 %v5899_v24, %v1279_v55  ;;  %5029 = vrsqrt.f32 %v1231_v58  ;;  %v1217_v31 = vmul.f32 0.03125, %v1187_v32  ;;  %v1260_v4 = vmul.f32 %v5020_v0, %v5799_v16 }
 0x579   :  { %v1234_v25 = vadd.f32 1e-05, %v1218_v45  ;;  %v1299_v27 = vadd.f32 %v5899_v24, %v1278_v8  ;;  %v1259_v36 = vmul.f32 %v5022_v52, %v5803_v44  ;;  %v1317_v44 = vsub.f32 %v5372_v43, %v5597_v34 }
 0x57a   :  { %v1233_v19 = vadd.f32 1e-05, %v1217_v31  ;;  %v1196_v11 = vpop.xlane.xlu1 %1195  ;;  %v1332_v10 = vadd.f32 %v1316_v54, %v1300_v12  ;;  %v1281_v2 = vmul.f32 %v5893_v6, %v1260_v4  ;;  %v1318_v12 = vsub.f32 %v5370_v42, %v5594_v14 }
 0x57b   :  { %v5024_v60 = vpop.eup %5023  ;;  %5031 = vrsqrt.f32 %v1234_v25  ;;  %v1220_v55 = vmul.f32 0.03125, %v1196_v11  ;;  %v1193_v58 = vpop.xlane.xlu0 %1192  ;;  %v1331_v32 = vadd.f32 %v1315_v46, %v1299_v27  ;;  %v1280_v16 = vmul.f32 %v5893_v6, %v1259_v36 }
 0x57c   :  { %v5026_v0 = vpop.eup %5025  ;;  %5033 = vrsqrt.f32 %v1233_v19  ;;  %v1219_v35 = vmul.f32 0.03125, %v1193_v58  ;;  %v1302_v15 = vadd.f32 %v5899_v24, %v1281_v2  ;;  %v1262_v45 = vmul.f32 %v5024_v60, %v5811_v26 }
 0x57d   :  { %v1236_v54 = vadd.f32 1e-05, %v1220_v55  ;;  %3881 = vmatprep.mubr.msk.f32.mxu1 %vm341_vm4, %v1331_v32  ;;  %v1301_v8 = vadd.f32 %v5899_v24, %v1280_v16  ;;  %v1261_v52 = vmul.f32 %v5026_v0, %v5815_v23  ;;  %v1319_v42 = vsub.f32 %v5381_v51, %v5609_v21 }
 0x57e   :  { %v1235_v31 = vadd.f32 1e-05, %v1219_v35  ;;  %v1202_v4 = vpop.xlane.xlu1 %1201  ;;  %3882 = vmatmul.mubr.msk.f32.vlgmr.msra.gmra.mrb[22].mxu1 %vm341_vm4, %v1332_v10  ;;  %v1283_v46 = vmul.f32 %v5893_v6, %v1262_v45  ;;  %v1334_v27 = vadd.f32 %v1318_v12, %v1302_v15  ;;  %v1320_v10 = vsub.f32 %v5379_v50, %v5606_v47 }
 0x57f   :  { %5035 = vrsqrt.f32 %v1236_v54  ;;  %v1222_v60 = vmul.f32 0.03125, %v1202_v4  ;;  %v1199_v26 = vpop.xlane.xlu0 %1198  ;;  %v1333_v43 = vadd.f32 %v1317_v44, %v1301_v8  ;;  %v1282_v34 = vmul.f32 %v5893_v6, %v1261_v52 }
 0x580   :  { %5037 = vrsqrt.f32 %v1235_v31  ;;  %v1221_v25 = vmul.f32 0.03125, %v1199_v26  ;;  %v1304_v23 = vadd.f32 %v5899_v24, %v1283_v46  ;;  %v1322_v31 = vsub.f32 %v5386_v56, %v5618_v33 }
 0x581   :  { %v5028_v36 = vpop.eup %5027  ;;  %v1238_v14 = vadd.f32 1e-05, %v1222_v60  ;;  %3884 = vmatprep.mubr.msk.f32.mxu1 %vm341_vm4, %v1333_v43  ;;  %v1303_v19 = vadd.f32 %v5899_v24, %v1282_v34 }
 0x582   :  { %v5030_v11 = vpop.eup %5029  ;;  %v1237_v2 = vadd.f32 1e-05, %v1221_v25  ;;  %v1208_v55 = vpop.xlane.xlu1 %1207  ;;  %3885 = vmatmul.mubr.msk.f32.gmra.mrb[24].mxu1 %vm341_vm4, %v1334_v27  ;;  %v1264_v58 = vmul.f32 %v5028_v36, %v5825_v39  ;;  %v1336_v35 = vadd.f32 %v1320_v10, %v1304_v23 }
 0x583   :  { %5039 = vrsqrt.f32 %v1238_v14  ;;  %v1224_v32 = vmul.f32 0.03125, %v1208_v55  ;;  %v1205_v16 = vpop.xlane.xlu0 %1204  ;;  %v1335_v0 = vadd.f32 %v1319_v42, %v1303_v19  ;;  %v1263_v51 = vmul.f32 %v5030_v11, %v5828_v40 }
 0x584   :  { %5041 = vrsqrt.f32 %v1237_v2  ;;  %v1223_v21 = vmul.f32 0.03125, %v1205_v16  ;;  %v1285_v15 = vmul.f32 %v5893_v6, %v1264_v58  ;;  %v1321_v40 = vsub.f32 %v5388_v57, %v5621_v61 }
 0x585   :  { %v5032_v45 = vpop.eup %5031  ;;  %v1240_v44 = vadd.f32 1e-05, %v1224_v32  ;;  %3887 = vmatprep.mubr.msk.f32.mxu1 %vm341_vm4, %v1335_v0  ;;  %v1284_v50 = vmul.f32 %v5893_v6, %v1263_v51  ;;  %v1323_v61 = vsub.f32 %v5396_v63, %v5633_v48  ;;  %v1326_v14 = vsub.f32 %v5404_v3, %v5640_v53 }
 0x586   :  { %v5034_v47 = vpop.eup %5033  ;;  %v1239_v54 = vadd.f32 1e-05, %v1223_v21  ;;  %3888 = vmatmul.mubr.msk.f32.gmra.mrb[26].mxu1 %vm341_vm4, %v1336_v35  ;;  %v1306_v39 = vadd.f32 %v5899_v24, %v1285_v15  ;;  %v1266_v8 = vmul.f32 %v5032_v45, %v5835_v28  ;;  %v1328_v58 = vsub.f32 %v5412_v7, %v5652_v49  ;;  %v6567_v21 = vld [vmem:[#allocation6_spill] sm:$0xff]  ;;  %v1762_v15 = vld [vmem:[%s6546_s7 + $0x18] sm:$0xff] }
 0x587   :  { %5043 = vrsqrt.f32 %v1240_v44  ;;  %v1305_v52 = vadd.f32 %v5899_v24, %v1284_v50  ;;  %v1265_v12 = vmul.f32 %v5034_v47, %v5839_v37  ;;  %v1324_v37 = vsub.f32 %v5394_v62, %v5628_v17  ;;  %v6011_v44 = vld [vmem:[%s6547_s6] ss:$0 sm:$0xff] }
 0x588   :  { %5045 = vrsqrt.f32 %v1239_v54  ;;  %v1287_v4 = vmul.f32 %v5893_v6, %v1266_v8  ;;  %v1338_v28 = vadd.f32 %v1322_v31, %v1306_v39 }
 0x589   :  { %v5036_v46 = vpop.eup %5035  ;;  %v1337_v60 = vadd.f32 %v1321_v40, %v1305_v52  ;;  %v1286_v26 = vmul.f32 %v5893_v6, %v1265_v12 }
 0x58a   :  { %v5038_v43 = vpop.eup %5037  ;;  %v1308_v34 = vadd.f32 %v5899_v24, %v1287_v4  ;;  %v1268_v57 = vmul.f32 %v5036_v46, %v5847_v20 }
 0x58b   :  { %3890 = vmatprep.mubr.msk.f32.mxu1 %vm341_vm4, %v1337_v60  ;;  %v1307_v56 = vadd.f32 %v5899_v24, %v1286_v26  ;;  %v1267_v33 = vmul.f32 %v5038_v43, %v5851_v22  ;;  %v1325_v22 = vsub.f32 %v5400_v1, %v5645_v59 }
 0x58c   :  { %3891 = vmatmul.mubr.msk.f32.gmra.mrb[28].mxu1 %vm341_vm4, %v1338_v28  ;;  %v1289_v25 = vmul.f32 %v5893_v6, %v1268_v57  ;;  %v1340_v42 = vadd.f32 %v1324_v37, %v1308_v34 }
 0x58d   :  { %v5040_v27 = vpop.eup %5039  ;;  %v1339_v23 = vadd.f32 %v1323_v61, %v1307_v56  ;;  %v1288_v20 = vmul.f32 %v5893_v6, %v1267_v33 }
 0x58e   :  { %v5042_v36 = vpop.eup %5041  ;;  %v1310_v63 = vadd.f32 %v5899_v24, %v1289_v25  ;;  %v1270_v48 = vmul.f32 %v5040_v27, %v5859_v41 }
 0x58f   :  { %3893 = vmatprep.mubr.msk.f32.mxu1 %vm341_vm4, %v1339_v23  ;;  %v1309_v62 = vadd.f32 %v5899_v24, %v1288_v20  ;;  %v1269_v17 = vmul.f32 %v5042_v36, %v5863_v29  ;;  %v1327_v29 = vsub.f32 %v5408_v5, %v5657_v13  ;;  %v1329_v5 = vsub.f32 %v5416_v9, %v5669_v18  ;;  %v1760_v9 = vld [vmem:[%s6546_s7 + $0x8] sm:$0xff]  ;;  %v1761_v18 = vld [vmem:[%s6546_s7 + $0x10] sm:$0xff] }
 0x590   :  { %3894 = vmatmul.mubr.msk.f32.gmra.mrb[30].mxu1 %vm341_vm4, %v1340_v42  ;;  %v1291_v19 = vmul.f32 %v5893_v6, %v1270_v48  ;;  %v1342_v55 = vadd.f32 %v1326_v14, %v1310_v63  ;;  %v4266_v45 = vpack.c.bf16 %v1762_v15, %v1761_v18 }
 0x591   :  { %v5044_v11 = vpop.eup %5043  ;;  %v1341_v10 = vadd.f32 %v1325_v22, %v1309_v62  ;;  %v1290_v41 = vmul.f32 %v5893_v6, %v1269_v17 }
 0x592   :  { %v5046_v2 = vpop.eup %5045  ;;  %v1312_v1 = vadd.f32 %v5899_v24, %v1291_v19  ;;  %v1272_v59 = vmul.f32 %v5044_v11, %v5871_v30 }
 0x593   :  { %3896 = vmatprep.mubr.msk.f32.mxu1 %vm341_vm4, %v1341_v10  ;;  %v1311_v3 = vadd.f32 %v5899_v24, %v1290_v41  ;;  %v1271_v53 = vmul.f32 %v5046_v2, %v5875_v38  ;;  %v6566_v38 = vld [vmem:[#allocation7_spill] sm:$0xff] }
 0x594   :  { %3897 = vmatmul.mubr.msk.f32.gmra.mrb[32].mxu1 %vm341_vm4, %v1342_v55  ;;  %v1293_v32 = vmul.f32 %v5893_v6, %v1272_v59  ;;  %v1344_v30 = vadd.f32 %v1328_v58, %v1312_v1  ;;  %v1330_v7 = vsub.f32 %v6567_v21, %v6566_v38 }
 0x595   :  { %v1343_v16 = vadd.f32 %v1327_v29, %v1311_v3  ;;  %v1292_v0 = vmul.f32 %v5893_v6, %v1271_v53  ;;  %v1759_v6 = vld [vmem:[%s6546_s7] sm:$0xff] }
 0x596   :  { %v1314_v51 = vadd.f32 %v5899_v24, %v1293_v32 }
 0x597   :  { %3899 = vmatprep.mubr.msk.f32.mxu1 %vm341_vm4, %v1343_v16  ;;  %v1313_v13 = vadd.f32 %v5899_v24, %v1292_v0  ;;  %v4262_v24 = vpack.c.bf16 %v1760_v9, %v1759_v6 }
 0x598   :  { %3900 = vmatmul.mubr.msk.f32.gmra.mrb[34].mxu1 %vm341_vm4, %v1344_v30  ;;  %v1346_v35 = vadd.f32 %v1330_v7, %v1314_v51 }
 0x599   :  { %v1345_v49 = vadd.f32 %v1329_v5, %v1313_v13  ;;  %4263 = vmatprep.subr.bf16.mxu0 %v4262_v24 }
 0x59a   :  { %4265 = vmatpush3.bf16.msra.mxu0 %v4262_v24 }
 0x59b   :  { %3902 = vmatprep.mubr.msk.f32.mxu1 %vm341_vm4, %v1345_v49  ;;  %4267 = vmatprep.subr.bf16.mxu0 %v4266_v45 }
 0x59c   :  { %3903 = vmatmul.mubr.msk.f32.gmra.mrb[36].mxu1 %vm341_vm4, %v1346_v35 }
 0x59e   :  { %4269 = vmatpush3.bf16.msra.mxu0 %v4266_v45 }
 0x651   :  { %v3883_v50 = vpop.f32.mrb[22].mxu1 }
 0x652   :  { %v6014_v47 = vadd.f32 %v3883_v50, %v6011_v44  ;;  %v1472_v54 = vpop.f32.mrb[23].mxu1 }
 0x653   :  { %v6017_v39 = vadd.f32 %v6011_v44, %v1472_v54 }
 0x654   :  { %5047 = vtanh.f32 %v6014_v47  ;;  %v3421_v30 = vmul.f32 -1.442695, %v6014_v47 }
 0x655   :  { %5049 = vtanh.f32 %v6017_v39  ;;  %v3886_v8 = vpop.f32.mrb[24].mxu1  ;;  %v3420_v51 = vmul.f32 -1.442695, %v6017_v39 }
 0x656   :  { %v6022_v40 = vadd.f32 %v3886_v8, %v6011_v44  ;;  %v1482_v52 = vpop.f32.mrb[25].mxu1 }
 0x657   :  { %v6025_v12 = vadd.f32 %v6011_v44, %v1482_v52 }
 0x658   :  { %5051 = vtanh.f32 %v6022_v40  ;;  %v3423_v5 = vmul.f32 -1.442695, %v6022_v40 }
 0x659   :  { %5053 = vtanh.f32 %v6025_v12  ;;  %v3889_v31 = vpop.f32.mrb[26].mxu1  ;;  %v3422_v13 = vmul.f32 -1.442695, %v6025_v12 }
 0x65a   :  { %v6030_v4 = vadd.f32 %v3889_v31, %v6011_v44  ;;  %v1492_v46 = vpop.f32.mrb[27].mxu1 }
 0x65b   :  { %v6033_v60 = vadd.f32 %v6011_v44, %v1492_v46 }
 0x65c   :  { %5055 = vtanh.f32 %v6030_v4  ;;  %v3425_v38 = vmul.f32 -1.442695, %v6030_v4 }
 0x65d   :  { %5057 = vtanh.f32 %v6033_v60  ;;  %v3424_v21 = vmul.f32 -1.442695, %v6033_v60 }
 0x65e   :  { %v5048_v26 = vpop.eup %5047 }
 0x65f   :  { %v5050_v43 = vpop.eup %5049  ;;  %v3892_v28 = vpop.f32.mrb[28].mxu1  ;;  %1697 = vrot.lane.b32.xlu1 %v5048_v26, %s5177_s9 }
 0x660   :  { %v6039_v34 = vadd.f32 %v3892_v28, %v6011_v44  ;;  %v1502_v57 = vpop.f32.mrb[29].mxu1  ;;  %1695 = vrot.lane.b32.xlu0 %v5050_v43, %s5177_s9 }
 0x661   :  { %v6046_v25 = vadd.f32 %v6011_v44, %v1502_v57 }
 0x662   :  { %v5052_v61 = vpop.eup %5051  ;;  %5059 = vtanh.f32 %v6039_v34  ;;  %v3427_v18 = vmul.f32 -1.442695, %v6039_v34 }
 0x663   :  { %v5054_v56 = vpop.eup %5053  ;;  %v3895_v33 = vpop.f32.mrb[30].mxu1  ;;  %5061 = vtanh.f32 %v6046_v25  ;;  %v3426_v15 = vmul.f32 -1.442695, %v6046_v25 }
 0x664   :  { %v1512_v37 = vpop.f32.mrb[31].mxu1  ;;  %1701 = vrot.lane.b32.xlu0 %v5052_v61, %s5177_s9  ;;  %1699 = vrot.lane.b32.xlu1 %v5054_v56, %s5177_s9  ;;  %v6052_v42 = vadd.f32 %v3895_v33, %v6011_v44 }
 0x665   :  { %v6055_v63 = vadd.f32 %v6011_v44, %v1512_v37 }
 0x666   :  { %v5056_v27 = vpop.eup %5055  ;;  %5063 = vtanh.f32 %v6052_v42  ;;  %v3429_v54 = vmul.f32 -1.442695, %v6052_v42 }
 0x667   :  { %v5058_v23 = vpop.eup %5057  ;;  %v3898_v20 = vpop.f32.mrb[32].mxu1  ;;  %5065 = vtanh.f32 %v6055_v63  ;;  %v3428_v8 = vmul.f32 -1.442695, %v6055_v63 }
 0x668   :  { %v1522_v36 = vpop.f32.mrb[33].mxu1  ;;  %1705 = vrot.lane.b32.xlu0 %v5056_v27, %s5177_s9  ;;  %1703 = vrot.lane.b32.xlu1 %v5058_v23, %s5177_s9  ;;  %v6059_v17 = vadd.f32 %v3898_v20, %v6011_v44 }
 0x669   :  { %v6065_v11 = vadd.f32 %v6011_v44, %v1522_v36 }
 0x66a   :  { %5067 = vtanh.f32 %v6059_v17  ;;  %v3431_v4 = vmul.f32 -1.442695, %v6059_v17 }
 0x66b   :  { %v3901_v48 = vpop.f32.mrb[34].mxu1  ;;  %5069 = vtanh.f32 %v6065_v11  ;;  %v3430_v60 = vmul.f32 -1.442695, %v6065_v11 }
 0x66c   :  { %v5060_v22 = vpop.eup %5059  ;;  %v1532_v62 = vpop.f32.mrb[35].mxu1  ;;  %v6068_v41 = vadd.f32 %v3901_v48, %v6011_v44 }
 0x66d   :  { %1709 = vrot.lane.b32.xlu0 %v5060_v22, %s5177_s9  ;;  %v5062_v10 = vpop.eup %5061  ;;  %v6073_v2 = vadd.f32 %v6011_v44, %v1532_v62 }
 0x66e   :  { %1707 = vrot.lane.b32.xlu1 %v5062_v10, %s5177_s9  ;;  %5071 = vtanh.f32 %v6068_v41  ;;  %v3433_v25 = vmul.f32 -1.442695, %v6068_v41 }
 0x66f   :  { %v3904_v14 = vpop.f32.mrb[36].mxu1  ;;  %5073 = vtanh.f32 %v6073_v2  ;;  %v3432_v20 = vmul.f32 -1.442695, %v6073_v2 }
 0x670   :  { %v1542_v19 = vpop.f32.mrb[37].mxu1  ;;  %v5064_v55 = vpop.eup %5063  ;;  %v6079_v59 = vadd.f32 %v3904_v14, %v6011_v44 }
 0x671   :  { %1713 = vrot.lane.b32.xlu0 %v5064_v55, %s5177_s9  ;;  %v5066_v1 = vpop.eup %5065  ;;  %v6083_v3 = vadd.f32 %v6011_v44, %v1542_v19 }
 0x672   :  { %1711 = vrot.lane.b32.xlu1 %v5066_v1, %s5177_s9  ;;  %5075 = vtanh.f32 %v6079_v59  ;;  %v3435_v41 = vmul.f32 -1.442695, %v6079_v59 }
 0x673   :  { %5077 = vtanh.f32 %v6083_v3  ;;  %v3434_v1 = vmul.f32 -1.442695, %v6083_v3 }
 0x674   :  { %v5068_v29 = vpop.eup %5067  ;;  %5079 = vpow2.f32 %v3421_v30 }
 0x675   :  { %1717 = vrot.lane.b32.xlu0 %v5068_v29, %s5177_s9  ;;  %v5070_v53 = vpop.eup %5069  ;;  %5081 = vpow2.f32 %v3420_v51 }
 0x676   :  { %1715 = vrot.lane.b32.xlu1 %v5070_v53, %s5177_s9  ;;  %5083 = vpow2.f32 %v3423_v5 }
 0x677   :  { %5085 = vpow2.f32 %v3422_v13 }
 0x678   :  { %v5072_v58 = vpop.eup %5071  ;;  %5087 = vpow2.f32 %v3425_v38 }
 0x679   :  { %1721 = vrot.lane.b32.xlu0 %v5072_v58, %s5177_s9  ;;  %v5074_v32 = vpop.eup %5073  ;;  %5089 = vpow2.f32 %v3424_v21 }
 0x67a   :  { %1719 = vrot.lane.b32.xlu1 %v5074_v32, %s5177_s9 }
 0x67c   :  { %v5076_v16 = vpop.eup %5075 }
 0x67d   :  { %1725 = vrot.lane.b32.xlu0 %v5076_v16, %s5177_s9  ;;  %v5078_v0 = vpop.eup %5077 }
 0x67e   :  { %1723 = vrot.lane.b32.xlu1 %v5078_v0, %s5177_s9  ;;  %v5080_v7 = vpop.eup %5079 }
 0x67f   :  { %v5082_v49 = vpop.eup %5081  ;;  %v1600_v35 = vadd.f32 1.0, %v5080_v7 }
 0x680   :  { %v1599_v6 = vadd.f32 1.0, %v5082_v49  ;;  %v5084_v9 = vpop.eup %5083 }
 0x681   :  { %v5086_v24 = vpop.eup %5085  ;;  %5091 = vrcp.f32 %v1600_v35  ;;  %v1602_v44 = vadd.f32 1.0, %v5084_v9 }
 0x682   :  { %v5088_v45 = vpop.eup %5087  ;;  %5093 = vrcp.f32 %v1599_v6  ;;  %v1601_v50 = vadd.f32 1.0, %v5086_v24 }
 0x683   :  { %5095 = vpow2.f32 %v3427_v18  ;;  %v5090_v47 = vpop.eup %5089  ;;  %v1604_v39 = vadd.f32 1.0, %v5088_v45 }
 0x684   :  { %5097 = vpow2.f32 %v3426_v15  ;;  %v1603_v40 = vadd.f32 1.0, %v5090_v47 }
 0x685   :  { %5099 = vrcp.f32 %v1602_v44 }
 0x686   :  { %5101 = vrcp.f32 %v1601_v50 }
 0x687   :  { %5103 = vpow2.f32 %v3429_v54 }
 0x688   :  { %5105 = vrcp.f32 %v1604_v39 }
 0x689   :  { %5107 = vpow2.f32 %v3428_v8 }
 0x68a   :  { %5109 = vrcp.f32 %v1603_v40 }
 0x68b   :  { %v5092_v52 = vpop.eup %5091  ;;  %5111 = vpow2.f32 %v3431_v4 }
 0x68c   :  { %v5094_v12 = vpop.eup %5093  ;;  %v1664_v56 = vsub.f32 1.0, %v5092_v52  ;;  %5113 = vpow2.f32 %v3430_v60 }
 0x68d   :  { %v5096_v31 = vpop.eup %5095  ;;  %v1663_v34 = vsub.f32 1.0, %v5094_v12 }
 0x68e   :  { %v5098_v46 = vpop.eup %5097  ;;  %v1606_v43 = vadd.f32 1.0, %v5096_v31 }
 0x68f   :  { %v5100_v26 = vpop.eup %5099  ;;  %v1605_v61 = vadd.f32 1.0, %v5098_v46 }
 0x690   :  { %v5102_v57 = vpop.eup %5101  ;;  %5115 = vrcp.f32 %v1606_v43  ;;  %v1666_v48 = vsub.f32 1.0, %v5100_v26 }
 0x691   :  { %v5104_v37 = vpop.eup %5103  ;;  %v1665_v63 = vsub.f32 1.0, %v5102_v57  ;;  %5117 = vrcp.f32 %v1605_v61 }
 0x692   :  { %v5106_v23 = vpop.eup %5105  ;;  %v1608_v14 = vadd.f32 1.0, %v5104_v37  ;;  %5119 = vpow2.f32 %v3433_v25 }
 0x693   :  { %v5108_v42 = vpop.eup %5107  ;;  %5121 = vpow2.f32 %v3432_v20  ;;  %v1668_v55 = vsub.f32 1.0, %v5106_v23 }
 0x694   :  { %v5110_v22 = vpop.eup %5109  ;;  %v1607_v10 = vadd.f32 1.0, %v5108_v42  ;;  %5123 = vrcp.f32 %v1608_v14  ;;  %v3436_v14 = vld [vmem:[%s6548_s8] ss:$0 sm:$0xff]  ;;  %s5179_s8 = smov 64  }
 0x695   :  { %v1667_v2 = vsub.f32 1.0, %v5110_v22  ;;  %v5112_v16 = vpop.eup %5111 }
 0x696   :  { %5125 = vrcp.f32 %v1607_v10  ;;  %v5114_v0 = vpop.eup %5113  ;;  %v1610_v30 = vadd.f32 1.0, %v5112_v16 }
 0x697   :  { %5127 = vpow2.f32 %v3435_v41  ;;  %v1609_v3 = vadd.f32 1.0, %v5114_v0 }
 0x698   :  { %5129 = vpow2.f32 %v3434_v1 }
 0x699   :  { %5131 = vrcp.f32 %v1610_v30 }
 0x69a   :  { %v5116_v59 = vpop.eup %5115  ;;  %5133 = vrcp.f32 %v1609_v3 }
 0x69b   :  { %v5118_v51 = vpop.eup %5117  ;;  %v1670_v7 = vsub.f32 1.0, %v5116_v59 }
 0x69c   :  { %v5120_v5 = vpop.eup %5119  ;;  %v1669_v6 = vsub.f32 1.0, %v5118_v51 }
 0x69d   :  { %v5122_v13 = vpop.eup %5121  ;;  %v1612_v21 = vadd.f32 1.0, %v5120_v5 }
 0x69e   :  { %v5124_v49 = vpop.eup %5123  ;;  %v1611_v35 = vadd.f32 1.0, %v5122_v13 }
 0x69f   :  { %5135 = vrcp.f32 %v1612_v21  ;;  %v1672_v50 = vsub.f32 1.0, %v5124_v49 }
 0x6a0   :  { %v5126_v9 = vpop.eup %5125  ;;  %5137 = vrcp.f32 %v1611_v35 }
 0x6a1   :  { %v5128_v15 = vpop.eup %5127  ;;  %v1671_v8 = vsub.f32 1.0, %v5126_v9 }
 0x6a2   :  { %v5130_v44 = vpop.eup %5129  ;;  %v1614_v54 = vadd.f32 1.0, %v5128_v15 }
 0x6a3   :  { %v1613_v39 = vadd.f32 1.0, %v5130_v44  ;;  %v5132_v12 = vpop.eup %5131 }
 0x6a4   :  { %v5134_v4 = vpop.eup %5133  ;;  %5139 = vrcp.f32 %v1614_v54  ;;  %v1674_v60 = vsub.f32 1.0, %v5132_v12 }
 0x6a5   :  { %5141 = vrcp.f32 %v1613_v39  ;;  %v1673_v26 = vsub.f32 1.0, %v5134_v4 }
 0x6a9   :  { %v5136_v43 = vpop.eup %5135 }
 0x6aa   :  { %v5138_v57 = vpop.eup %5137 }
 0x6ab   :  { %v1675_v37 = vsub.f32 1.0, %v5138_v57 }
 0x6ae   :  { %v5140_v23 = vpop.eup %5139 }
 0x6af   :  { %v1678_v42 = vsub.f32 1.0, %v5140_v23 }
 0x6d1   :  { %v1698_v28 = vpop.permute.xlu1 %1697 }
 0x6d2   :  { %v1696_v33 = vpop.permute.xlu0 %1695  ;;  %v1744_v36 = vmul.f32 %v1698_v28, %v1664_v56  ;;  %v1676_v56 = vsub.f32 1.0, %v5136_v43 }
 0x6d3   :  { %v1743_v27 = vmul.f32 %v1696_v33, %v1663_v34 }
 0x6d5   :  { %3913 = vmatprep.mubr.msk.f32.mxu0 %vm341_vm4, %v1743_v27 }
 0x6d6   :  { %v1700_v62 = vpop.permute.xlu1 %1699  ;;  %3914 = vmatmul.mubr.msk.f32.vlgmr.msra.gmra.mrb[26].mxu0 %vm341_vm4, %v1744_v36  ;;  %v1702_v17 = vpop.permute.xlu0 %1701 }
 0x6d7   :  { %v1745_v19 = vmul.f32 %v1700_v62, %v1665_v63  ;;  %v1746_v11 = vmul.f32 %v1702_v17, %v1666_v48  ;;  %v5142_v36 = vpop.eup %5141 }
 0x6d8   :  { %v1677_v48 = vsub.f32 1.0, %v5142_v36 }
 0x6d9   :  { %3916 = vmatprep.mubr.msk.f32.mxu0 %vm341_vm4, %v1745_v19 }
 0x6da   :  { %v1704_v29 = vpop.permute.xlu1 %1703  ;;  %3917 = vmatmul.mubr.msk.f32.gmra.mrb[28].mxu0 %vm341_vm4, %v1746_v11  ;;  %v1706_v53 = vpop.permute.xlu0 %1705 }
 0x6db   :  { %v1747_v58 = vmul.f32 %v1704_v29, %v1667_v2  ;;  %v1748_v32 = vmul.f32 %v1706_v53, %v1668_v55 }
 0x6dd   :  { %3919 = vmatprep.mubr.msk.f32.mxu0 %vm341_vm4, %v1747_v58 }
 0x6de   :  { %3920 = vmatmul.mubr.msk.f32.gmra.mrb[30].mxu0 %vm341_vm4, %v1748_v32 }
 0x6df   :  { %v1710_v38 = vpop.permute.xlu0 %1709 }
 0x6e0   :  { %v1708_v18 = vpop.permute.xlu1 %1707  ;;  %v1750_v24 = vmul.f32 %v1710_v38, %v1670_v7 }
 0x6e1   :  { %v1749_v45 = vmul.f32 %v1708_v18, %v1669_v6 }
 0x6e3   :  { %3922 = vmatprep.mubr.msk.f32.mxu0 %vm341_vm4, %v1749_v45  ;;  %v1714_v47 = vpop.permute.xlu0 %1713 }
 0x6e4   :  { %3923 = vmatmul.mubr.msk.f32.gmra.mrb[32].mxu0 %vm341_vm4, %v1750_v24  ;;  %v1712_v40 = vpop.permute.xlu1 %1711  ;;  %v1752_v52 = vmul.f32 %v1714_v47, %v1672_v50 }
 0x6e5   :  { %v1751_v31 = vmul.f32 %v1712_v40, %v1671_v8 }
 0x6e7   :  { %3925 = vmatprep.mubr.msk.f32.mxu0 %vm341_vm4, %v1751_v31  ;;  %v1718_v46 = vpop.permute.xlu0 %1717 }
 0x6e8   :  { %3926 = vmatmul.mubr.msk.f32.gmra.mrb[34].mxu0 %vm341_vm4, %v1752_v52  ;;  %v1716_v28 = vpop.permute.xlu1 %1715  ;;  %v1754_v34 = vmul.f32 %v1718_v46, %v1674_v60 }
 0x6e9   :  { %v1753_v61 = vmul.f32 %v1716_v28, %v1673_v26 }
 0x6eb   :  { %3928 = vmatprep.mubr.msk.f32.mxu0 %vm341_vm4, %v1753_v61  ;;  %v1722_v33 = vpop.permute.xlu0 %1721 }
 0x6ec   :  { %3929 = vmatmul.mubr.msk.f32.gmra.mrb[36].mxu0 %vm341_vm4, %v1754_v34  ;;  %v1720_v25 = vpop.permute.xlu1 %1719  ;;  %v1756_v27 = vmul.f32 %v1722_v33, %v1676_v56 }
 0x6ed   :  { %v1755_v20 = vmul.f32 %v1720_v25, %v1675_v37 }
 0x6ef   :  { %3931 = vmatprep.mubr.msk.f32.mxu0 %vm341_vm4, %v1755_v20  ;;  %v1726_v63 = vpop.permute.xlu0 %1725 }
 0x6f0   :  { %3932 = vmatmul.mubr.msk.f32.gmra.mrb[38].mxu0 %vm341_vm4, %v1756_v27  ;;  %v1724_v22 = vpop.permute.xlu1 %1723  ;;  %v1758_v62 = vmul.f32 %v1726_v63, %v1678_v42 }
 0x6f1   :  { %v1757_v17 = vmul.f32 %v1724_v22, %v1677_v48 }
 0x6f3   :  { %3934 = vmatprep.mubr.msk.f32.mxu0 %vm341_vm4, %v1757_v17 }
 0x6f4   :  { %3935 = vmatmul.mubr.msk.f32.gmra.mrb[40].mxu0 %vm341_vm4, %v1758_v62 }
 0x7a9   :  { %v3915_v19 = vpop.f32.mrb[26].mxu0 }
 0x7aa   :  { %v1890_v11 = vadd.f32 %v3915_v19, %v3436_v14  ;;  %v1884_v10 = vpop.f32.mrb[27].mxu0 }
 0x7ab   :  { %v1885_v41 = vadd.f32 %v3436_v14, %v1884_v10 }
 0x7ad   :  { %v3918_v2 = vpop.f32.mrb[28].mxu0  ;;  %v6128_v55 = vpack.i.bf16 %v1890_v11, %v1885_v41 }
 0x7ae   :  { %v1900_v1 = vadd.f32 %v3918_v2, %v3436_v14  ;;  %v1894_v29 = vpop.f32.mrb[29].mxu0 }
 0x7af   :  { %v1895_v53 = vadd.f32 %v3436_v14, %v1894_v29  ;;  %4622 = vrot.lane.b32.xlu1 %v6128_v55, %s5177_s9 }
 0x7b1   :  { %v3921_v58 = vpop.f32.mrb[30].mxu0  ;;  %v6132_v32 = vpack.i.bf16 %v1900_v1, %v1895_v53 }
 0x7b2   :  { %v1910_v16 = vadd.f32 %v3921_v58, %v3436_v14  ;;  %v1904_v0 = vpop.f32.mrb[31].mxu0 }
 0x7b3   :  { %v1905_v59 = vadd.f32 %v3436_v14, %v1904_v0  ;;  %4627 = vrot.lane.b32.xlu0 %v6132_v32, %s5177_s9 }
 0x7b5   :  { %v6136_v30 = vpack.i.bf16 %v1910_v16, %v1905_v59 }
 0x7b7   :  { %4632 = vrot.lane.b32.xlu1 %v6136_v30, %s5177_s9  ;;  %v3924_v51 = vpop.f32.mrb[32].mxu0 }
 0x7b8   :  { %v1920_v3 = vadd.f32 %v3924_v51, %v3436_v14  ;;  %v1914_v5 = vpop.f32.mrb[33].mxu0 }
 0x7b9   :  { %v1915_v13 = vadd.f32 %v3436_v14, %v1914_v5 }
 0x7bb   :  { %v6140_v38 = vpack.i.bf16 %v1920_v3, %v1915_v13  ;;  %v3927_v21 = vpop.f32.mrb[34].mxu0 }
 0x7bc   :  { %v1930_v7 = vadd.f32 %v3927_v21, %v3436_v14  ;;  %v1924_v49 = vpop.f32.mrb[35].mxu0 }
 0x7bd   :  { %4637 = vrot.lane.b32.xlu0 %v6140_v38, %s5177_s9  ;;  %v1925_v35 = vadd.f32 %v3436_v14, %v1924_v49 }
 0x7bf   :  { %v6144_v6 = vpack.i.bf16 %v1930_v7, %v1925_v35  ;;  %v3930_v9 = vpop.f32.mrb[36].mxu0 }
 0x7c0   :  { %v1940_v18 = vadd.f32 %v3930_v9, %v3436_v14  ;;  %v1934_v24 = vpop.f32.mrb[37].mxu0 }
 0x7c1   :  { %4642 = vrot.lane.b32.xlu1 %v6144_v6, %s5177_s9  ;;  %v1935_v15 = vadd.f32 %v3436_v14, %v1934_v24 }
 0x7c3   :  { %v6148_v45 = vpack.i.bf16 %v1940_v18, %v1935_v15  ;;  %v3933_v44 = vpop.f32.mrb[38].mxu0 }
 0x7c4   :  { %v1950_v50 = vadd.f32 %v3933_v44, %v3436_v14  ;;  %v1944_v47 = vpop.f32.mrb[39].mxu0 }
 0x7c5   :  { %4647 = vrot.lane.b32.xlu0 %v6148_v45, %s5177_s9  ;;  %v1945_v54 = vadd.f32 %v3436_v14, %v1944_v47 }
 0x7c7   :  { %v6152_v39 = vpack.i.bf16 %v1950_v50, %v1945_v54  ;;  %v3936_v8 = vpop.f32.mrb[40].mxu0 }
 0x7c8   :  { %v6156_v40 = vadd.f32 %v3936_v8, %v3436_v14  ;;  %v1954_v52 = vpop.f32.mrb[41].mxu0 }
 0x7c9   :  { %4652 = vrot.lane.b32.xlu1 %v6152_v39, %s5177_s9  ;;  %v1955_v12 = vadd.f32 %v3436_v14, %v1954_v52 }
 0x7cb   :  { %v6161_v31 = vpack.i.bf16 %v6156_v40, %v1955_v12  ;;  %v6163_v4 = vmul.f32 0.35355338, %v1955_v12 }
 0x7cd   :  { %4662 = vrot.lane.b32.xlu1 %v6128_v55, %s5179_s8  ;;  %4657 = vrot.lane.b32.xlu0 %v6161_v31, %s5177_s9 }
 0x7ce   :  { %3969 = vmatprep.mubr.msk.f32.mxu1 %vm2056_vm5, %v6163_v4 }
 0x7d1   :  { %4672 = vrot.lane.b32.xlu1 %v6136_v30, %s5179_s8  ;;  %4667 = vrot.lane.b32.xlu0 %v6132_v32, %s5179_s8 }
 0x7d5   :  { %4682 = vrot.lane.b32.xlu1 %v6144_v6, %s5179_s8  ;;  %4677 = vrot.lane.b32.xlu0 %v6140_v38, %s5179_s8 }
 0x7d9   :  { %4692 = vrot.lane.b32.xlu1 %v6152_v39, %s5179_s8  ;;  %4687 = vrot.lane.b32.xlu0 %v6148_v45, %s5179_s8 }
 0x821   :  { %v4623_v46 = vpop.permute.xlu1 %4622 }
 0x822   :  { %v4625_v60 = vunpack.i.h.bf16 %v4623_v46  ;;  %v4624_v26 = vunpack.i.l.bf16 %v4623_v46 }
 0x824   :  { %v4270_v28 = vpack.c.bf16 %v4625_v60, %v4624_v26 }
 0x825   :  { %v4628_v34 = vpop.permute.xlu0 %4627 }
 0x826   :  { %v4630_v57 = vunpack.i.h.bf16 %v4628_v34  ;;  %v4629_v61 = vunpack.i.l.bf16 %v4628_v34  ;;  %4272 = vmatprep.subr.msk.bf16.mxu1 %vm6183_vm6, %v4270_v28 }
 0x827   :  { %4275 = vmatpush3.bf16.xpose.msk.msra.mxu1 %vm6183_vm6, %v4270_v28 }
 0x828   :  { %v4276_v56 = vpack.c.bf16 %v4630_v57, %v4629_v61  ;;  %v6220_v61 = vmul.f32 0.35355338, %v6156_v40 }
 0x829   :  { %v4633_v33 = vpop.permute.xlu1 %4632 }
 0x82a   :  { %v4635_v37 = vunpack.i.h.bf16 %v4633_v33  ;;  %v4634_v25 = vunpack.i.l.bf16 %v4633_v33  ;;  %4278 = vmatprep.subr.msk.bf16.mxu1 %vm6183_vm6, %v4276_v56  ;;  %v1963_v33 = vlaneseq }
 0x82c   :  { %v4282_v27 = vpack.c.bf16 %v4635_v37, %v4634_v25  ;;  %v1964_v37 = vshrl.u32 %v1963_v33, 7 }
 0x82e   :  { %v1965_v25 = vadd.s32 8, %v1964_v37 }
 0x82f   :  { %4281 = vmatpush3.bf16.xpose.msk.msra.mxu1 %vm6183_vm6, %v4276_v56  ;;  %v4638_v23 = vpop.permute.xlu0 %4637 }
 0x830   :  { %4284 = vmatprep.subr.msk.bf16.mxu1 %vm6183_vm6, %v4282_v27  ;;  %v4640_v20 = vunpack.i.h.bf16 %v4638_v23  ;;  %v4639_v36 = vunpack.i.l.bf16 %v4638_v23  ;;  %v1977_v23 = vand.u32 7, %v1965_v25 }
 0x832   :  { %v4288_v42 = vpack.c.bf16 %v4640_v20, %v4639_v36  ;;  %v1970_v36 = vand.u32 7, %v1964_v37 }
 0x833   :  { %v4643_v63 = vpop.permute.xlu1 %4642 }
 0x834   :  { %v4645_v48 = vunpack.i.h.bf16 %v4643_v63  ;;  %v4644_v22 = vunpack.i.l.bf16 %v4643_v63 }
 0x836   :  { %v4294_v62 = vpack.c.bf16 %v4645_v48, %v4644_v22 }
 0x837   :  { %4287 = vmatpush3.bf16.xpose.msk.msra.mxu1 %vm6183_vm6, %v4282_v27  ;;  %v4648_v17 = vpop.permute.xlu0 %4647  ;;  %v1991_v27 = vand.u32 127, %v1963_v33 }
 0x838   :  { %4290 = vmatprep.subr.msk.bf16.mxu1 %vm6183_vm6, %v4288_v42  ;;  %v4650_v14 = vunpack.i.h.bf16 %v4648_v17  ;;  %v4649_v19 = vunpack.i.l.bf16 %v4648_v17 }
 0x839   :  { %v1996_v20 = vand.u32 7, %v1991_v27 }
 0x83a   :  { %v4300_v11 = vpack.c.bf16 %v4650_v14, %v4649_v19 }
 0x83b   :  { %v4653_v10 = vpop.permute.xlu1 %4652  ;;  %vm6224_vm7 = vcmp.eq.s32.totalorder %v1977_v23, %v1996_v20  ;;  %vm6228_vm8 = vcmp.eq.s32.totalorder %v1970_v36, %v1996_v20 }
 0x83c   :  { %v4655_v41 = vunpack.i.h.bf16 %v4653_v10  ;;  %v4654_v2 = vunpack.i.l.bf16 %v4653_v10 }
 0x83e   :  { %v4306_v0 = vpack.c.bf16 %v4655_v41, %v4654_v2 }
 0x83f   :  { %4293 = vmatpush3.bf16.xpose.msk.msra.mxu1 %vm6183_vm6, %v4288_v42  ;;  %v4663_v1 = vpop.permute.xlu1 %4662  ;;  %v4658_v58 = vpop.permute.xlu0 %4657 }
 0x840   :  { %4296 = vmatprep.subr.msk.bf16.mxu1 %vm6183_vm6, %v4294_v62  ;;  %v4665_v29 = vunpack.i.h.bf16 %v4663_v1  ;;  %v4664_v53 = vunpack.i.l.bf16 %v4663_v1  ;;  %v4660_v7 = vunpack.i.h.bf16 %v4658_v58  ;;  %v4659_v49 = vunpack.i.l.bf16 %v4658_v58 }
 0x842   :  { %v4318_v16 = vpack.c.bf16 %v4665_v29, %v4664_v53  ;;  %v4312_v44 = vpack.c.bf16 %v4660_v7, %v4659_v49 }
 0x843   :  { %v4673_v59 = vpop.permute.xlu1 %4672  ;;  %v4668_v51 = vpop.permute.xlu0 %4667 }
 0x844   :  { %4319 = vmatprep.subr.bf16.mxu0 %v4318_v16  ;;  %v4675_v3 = vunpack.i.h.bf16 %v4673_v59  ;;  %v4674_v5 = vunpack.i.l.bf16 %v4673_v59  ;;  %v4670_v13 = vunpack.i.h.bf16 %v4668_v51  ;;  %v4669_v21 = vunpack.i.l.bf16 %v4668_v51 }
 0x845   :  { %4321 = vmatpush3.bf16.msra.mxu0 %v4318_v16 }
 0x846   :  { %v4322_v35 = vpack.c.bf16 %v4670_v13, %v4669_v21  ;;  %v4326_v18 = vpack.c.bf16 %v4675_v3, %v4674_v5 }
 0x847   :  { %4299 = vmatpush3.bf16.xpose.msk.msra.mxu1 %vm6183_vm6, %v4294_v62  ;;  %v4678_v9 = vpop.permute.xlu0 %4677  ;;  %v4683_v50 = vpop.permute.xlu1 %4682 }
 0x848   :  { %4302 = vmatprep.subr.msk.bf16.mxu1 %vm6183_vm6, %v4300_v11  ;;  %v4680_v24 = vunpack.i.h.bf16 %v4678_v9  ;;  %v4679_v15 = vunpack.i.l.bf16 %v4678_v9  ;;  %4323 = vmatprep.subr.bf16.mxu0 %v4322_v35  ;;  %v4685_v47 = vunpack.i.h.bf16 %v4683_v50  ;;  %v4684_v54 = vunpack.i.l.bf16 %v4683_v50 }
 0x849   :  { %4325 = vmatpush3.bf16.msra.mxu0 %v4322_v35 }
 0x84a   :  { %4327 = vmatprep.subr.bf16.mxu0 %v4326_v18  ;;  %v4330_v8 = vpack.c.bf16 %v4680_v24, %v4679_v15  ;;  %v4334_v12 = vpack.c.bf16 %v4685_v47, %v4684_v54 }
 0x84b   :  { %v4688_v52 = vpop.permute.xlu0 %4687  ;;  %v4693_v26 = vpop.permute.xlu1 %4692 }
 0x84c   :  { %v4690_v46 = vunpack.i.h.bf16 %v4688_v52  ;;  %v4689_v60 = vunpack.i.l.bf16 %v4688_v52  ;;  %v4695_v28 = vunpack.i.h.bf16 %v4693_v26  ;;  %v4694_v34 = vunpack.i.l.bf16 %v4693_v26 }
 0x84d   :  { %4329 = vmatpush3.bf16.msra.mxu0 %v4326_v18 }
 0x84e   :  { %4331 = vmatprep.subr.bf16.mxu0 %v4330_v8  ;;  %v4338_v57 = vpack.c.bf16 %v4690_v46, %v4689_v60  ;;  %v4342_v56 = vpack.c.bf16 %v4695_v28, %v4694_v34 }
 0x84f   :  { %4305 = vmatpush3.bf16.xpose.msk.msra.mxu1 %vm6183_vm6, %v4300_v11 }
 0x850   :  { %4308 = vmatprep.subr.msk.bf16.mxu1 %vm6183_vm6, %v4306_v0 }
 0x851   :  { %4333 = vmatpush3.bf16.msra.mxu0 %v4330_v8 }
 0x852   :  { %4335 = vmatprep.subr.bf16.mxu0 %v4334_v12 }
 0x855   :  { %4337 = vmatpush3.bf16.msra.mxu0 %v4334_v12 }
 0x856   :  { %4339 = vmatprep.subr.bf16.mxu0 %v4338_v57 }
 0x857   :  { %4311 = vmatpush3.bf16.xpose.msk.msra.mxu1 %vm6183_vm6, %v4306_v0 }
 0x858   :  { %4314 = vmatprep.subr.msk.bf16.mxu1 %vm6183_vm6, %v4312_v44 }
 0x859   :  { %4341 = vmatpush3.bf16.msra.mxu0 %v4338_v57 }
 0x85a   :  { %4343 = vmatprep.subr.bf16.mxu0 %v4342_v56 }
 0x85d   :  { %4345 = vmatpush3.bf16.msra.mxu0 %v4342_v56 }
 0x85f   :  { %4317 = vmatpush3.bf16.xpose.msk.msra.mxu1 %vm6183_vm6, %v4312_v44 }
 0x866   :  { %3970 = vmatmul.mubr.msk.f32.vlgmr.msra.gmra.mrb[38].mxu1 %vm2056_vm5, %v6220_v61 }
 0x939   :  { %v3971_v63 = vpop.f32.mrb[38].mxu1 }
 0x93a   :  { %v2171_v48 = vsel %vm6224_vm7, %v3971_v63, -1e+30  ;;  %v2161_v22 = vpop.f32.mrb[39].mxu1 }
 0x93b   :  { %v2170_v62 = vsel %vm6228_vm8, %v2161_v22, -1e+30  ;;  %2174 = vmax.xlane.f32.xlu1 %v2171_v48 }
 0x93c   :  { %2172 = vmax.xlane.f32.xlu0 %v2170_v62 }
 0x94c   :  { %4702 = vrot.lane.b32.xlu1 %v6128_v55, %s5180_s23 }
 0x950   :  { %4712 = vrot.lane.b32.xlu1 %v6136_v30, %s5180_s23 }
 0x952   :  { %4697 = vrot.lane.b32.xlu0 %v6161_v31, %s5179_s8 }
 0x954   :  { %4722 = vrot.lane.b32.xlu1 %v6144_v6, %s5180_s23 }
 0x956   :  { %4707 = vrot.lane.b32.xlu0 %v6132_v32, %s5180_s23 }
 0x958   :  { %4732 = vrot.lane.b32.xlu1 %v6152_v39, %s5180_s23 }
 0x95a   :  { %4717 = vrot.lane.b32.xlu0 %v6140_v38, %s5180_s23 }
 0x95c   :  { %2313 = vrot.lane.b32.xlu1 %v6163_v4, %s5181_s3 }
 0x95e   :  { %4727 = vrot.lane.b32.xlu0 %v6148_v45, %s5180_s23 }
 0x960   :  { %4742 = vrot.lane.b32.xlu1 %v6128_v55, %s5182_s24 }
 0x962   :  { %4737 = vrot.lane.b32.xlu0 %v6161_v31, %s5180_s23 }
 0x964   :  { %4752 = vrot.lane.b32.xlu1 %v6136_v30, %s5182_s24 }
 0x966   :  { %2315 = vrot.lane.b32.xlu0 %v6220_v61, %s5181_s3 }
 0x968   :  { %4762 = vrot.lane.b32.xlu1 %v6144_v6, %s5182_s24 }
 0x96a   :  { %4747 = vrot.lane.b32.xlu0 %v6132_v32, %s5182_s24 }
 0x96c   :  { %4772 = vrot.lane.b32.xlu1 %v6152_v39, %s5182_s24 }
 0x96e   :  { %4757 = vrot.lane.b32.xlu0 %v6140_v38, %s5182_s24 }
 0x972   :  { %4767 = vrot.lane.b32.xlu0 %v6148_v45, %s5182_s24 }
 0x9c8   :  { %v2175_v17 = vpop.xlane.xlu1 %2174 }
 0x9c9   :  { %v2177_v14 = vsub.f32 %v2171_v48, %v2175_v17  ;;  %v2173_v19 = vpop.xlane.xlu0 %2172 }
 0x9ca   :  { %v2176_v11 = vsub.f32 %v2170_v62, %v2173_v19 }
 0x9cb   :  { %v2180_v10 = vmul.f32 1.442695, %v2177_v14 }
 0x9cc   :  { %v2178_v41 = vmul.f32 1.442695, %v2176_v11  ;;  %v4703_v2 = vpop.permute.xlu1 %4702 }
 0x9cd   :  { %v4705_v1 = vunpack.i.h.bf16 %v4703_v2  ;;  %v4698_v29 = vpop.permute.xlu0 %4697  ;;  %v4704_v53 = vunpack.i.l.bf16 %v4703_v2 }
 0x9ce   :  { %5143 = vpow2.f32 %v2178_v41  ;;  %v4700_v58 = vunpack.i.h.bf16 %v4698_v29  ;;  %v4699_v16 = vunpack.i.l.bf16 %v4698_v29 }
 0x9cf   :  { %5145 = vpow2.f32 %v2180_v10  ;;  %v4350_v3 = vpack.c.bf16 %v4705_v1, %v4704_v53 }
 0x9d0   :  { %v4346_v0 = vpack.c.bf16 %v4700_v58, %v4699_v16  ;;  %v4713_v59 = vpop.permute.xlu1 %4712 }
 0x9d1   :  { %v4708_v51 = vpop.permute.xlu0 %4707  ;;  %v4715_v50 = vunpack.i.h.bf16 %v4713_v59  ;;  %v4714_v47 = vunpack.i.l.bf16 %v4713_v59 }
 0x9d2   :  { %4347 = vmatprep.subr.bf16.mxu0 %v4346_v0  ;;  %v4710_v21 = vunpack.i.h.bf16 %v4708_v51  ;;  %v4709_v7 = vunpack.i.l.bf16 %v4708_v51 }
 0x9d3   :  { %4349 = vmatpush3.bf16.msra.mxu0 %v4346_v0  ;;  %v4362_v46 = vpack.c.bf16 %v4715_v50, %v4714_v47 }
 0x9d4   :  { %v4723_v5 = vpop.permute.xlu1 %4722  ;;  %4352 = vmatprep.subr.msk.bf16.mxu0 %vm6183_vm6, %v4350_v3  ;;  %v4356_v24 = vpack.c.bf16 %v4710_v21, %v4709_v7 }
 0x9d5   :  { %v4718_v13 = vpop.permute.xlu0 %4717  ;;  %v4725_v19 = vunpack.i.h.bf16 %v4723_v5  ;;  %v4724_v11 = vunpack.i.l.bf16 %v4723_v5 }
 0x9d6   :  { %v4720_v37 = vunpack.i.h.bf16 %v4718_v13  ;;  %v4719_v25 = vunpack.i.l.bf16 %v4718_v13 }
 0x9d7   :  { %v4374_v29 = vpack.c.bf16 %v4725_v19, %v4724_v11 }
 0x9d8   :  { %v6264_v49 = vpop.eup %5143  ;;  %v6266_v35 = vpop.permute.xlu1 %4732  ;;  %v4368_v48 = vpack.c.bf16 %v4720_v37, %v4719_v25 }
 0x9d9   :  { %v6268_v9 = vpop.eup %5145  ;;  %4004 = vmatprep.mubr.f32.mxu0 %v6264_v49  ;;  %v6271_v18 = vpop.permute.xlu0 %4727  ;;  %v4735_v13 = vunpack.i.h.bf16 %v6266_v35  ;;  %v4734_v21 = vunpack.i.l.bf16 %v6266_v35 }
 0x9da   :  { %4005 = vmatmul.mubr.f32.vlgmr.msra.gmra.mrb[42].mxu0 %v6268_v9  ;;  %v4730_v59 = vunpack.i.h.bf16 %v6271_v18  ;;  %v4729_v51 = vunpack.i.l.bf16 %v6271_v18 }
 0x9db   :  { %v4386_v7 = vpack.c.bf16 %v4735_v13, %v4734_v21 }
 0x9dc   :  { %v2314_v15 = vpop.permute.xlu1 %2313  ;;  %4355 = vmatpush3.bf16.xpose.msk.msra.mxu0 %vm6183_vm6, %v4350_v3  ;;  %v4380_v5 = vpack.c.bf16 %v4730_v59, %v4729_v51 }
 0x9dd   :  { %v6276_v44 = vpop.permute.xlu0 %4737  ;;  %4358 = vmatprep.subr.msk.bf16.mxu0 %vm6183_vm6, %v4356_v24  ;;  %4039 = vmatprep.mubr.msk.f32.mxu0 %vm2056_vm5, %v2314_v15 }
 0x9de   :  { %v4740_v18 = vunpack.i.h.bf16 %v6276_v44 }
 0x9e0   :  { %v4743_v54 = vpop.permute.xlu1 %4742 }
 0x9e1   :  { %v4745_v8 = vunpack.i.h.bf16 %v4743_v54  ;;  %v4744_v52 = vunpack.i.l.bf16 %v4743_v54  ;;  %v6281_v12 = vpop.permute.xlu0 %2315 }
 0x9e3   :  { %v4398_v60 = vpack.c.bf16 %v4745_v8, %v4744_v52 }
 0x9e4   :  { %v4753_v26 = vpop.permute.xlu1 %4752  ;;  %4361 = vmatpush3.bf16.xpose.msk.msra.mxu0 %vm6183_vm6, %v4356_v24  ;;  %v4739_v24 = vunpack.i.l.bf16 %v6276_v44 }
 0x9e5   :  { %4399 = vmatprep.subr.bf16.mxu1 %v4398_v60  ;;  %v4748_v28 = vpop.permute.xlu0 %4747  ;;  %4364 = vmatprep.subr.msk.bf16.mxu0 %vm6183_vm6, %v4362_v46  ;;  %v4755_v34 = vunpack.i.h.bf16 %v4753_v26  ;;  %v4754_v57 = vunpack.i.l.bf16 %v4753_v26 }
 0x9e6   :  { %v4750_v56 = vunpack.i.h.bf16 %v4748_v28  ;;  %v4749_v33 = vunpack.i.l.bf16 %v4748_v28  ;;  %4401 = vmatpush3.bf16.msra.mxu1 %v4398_v60  ;;  %v4392_v15 = vpack.c.bf16 %v4740_v18, %v4739_v24 }
 0x9e7   :  { %v4406_v20 = vpack.c.bf16 %v4755_v34, %v4754_v57 }
 0x9e8   :  { %v4402_v27 = vpack.c.bf16 %v4750_v56, %v4749_v33  ;;  %v4763_v22 = vpop.permute.xlu1 %4762 }
 0x9e9   :  { %v4758_v23 = vpop.permute.xlu0 %4757  ;;  %v4765_v62 = vunpack.i.h.bf16 %v4763_v22  ;;  %v4764_v17 = vunpack.i.l.bf16 %v4763_v22 }
 0x9ea   :  { %v4760_v36 = vunpack.i.h.bf16 %v4758_v23  ;;  %v4759_v63 = vunpack.i.l.bf16 %v4758_v23  ;;  %4403 = vmatprep.subr.bf16.mxu1 %v4402_v27 }
 0x9eb   :  { %4405 = vmatpush3.bf16.msra.mxu1 %v4402_v27  ;;  %v4414_v41 = vpack.c.bf16 %v4765_v62, %v4764_v17 }
 0x9ec   :  { %4367 = vmatpush3.bf16.xpose.msk.msra.mxu0 %vm6183_vm6, %v4362_v46  ;;  %4407 = vmatprep.subr.bf16.mxu1 %v4406_v20  ;;  %v4410_v14 = vpack.c.bf16 %v4760_v36, %v4759_v63  ;;  %v4773_v53 = vpop.permute.xlu1 %4772 }
 0x9ed   :  { %4370 = vmatprep.subr.msk.bf16.mxu0 %vm6183_vm6, %v4368_v48  ;;  %v4768_v10 = vpop.permute.xlu0 %4767  ;;  %v4775_v58 = vunpack.i.h.bf16 %v4773_v53  ;;  %v4774_v16 = vunpack.i.l.bf16 %v4773_v53 }
 0x9ee   :  { %v4770_v2 = vunpack.i.h.bf16 %v4768_v10  ;;  %v4769_v1 = vunpack.i.l.bf16 %v4768_v10 }
 0x9ef   :  { %4409 = vmatpush3.bf16.msra.mxu1 %v4406_v20  ;;  %v4422_v3 = vpack.c.bf16 %v4775_v58, %v4774_v16 }
 0x9f0   :  { %4411 = vmatprep.subr.bf16.mxu1 %v4410_v14  ;;  %v4418_v0 = vpack.c.bf16 %v4770_v2, %v4769_v1 }
 0x9f3   :  { %4413 = vmatpush3.bf16.msra.mxu1 %v4410_v14 }
 0x9f4   :  { %4373 = vmatpush3.bf16.xpose.msk.msra.mxu0 %vm6183_vm6, %v4368_v48  ;;  %4415 = vmatprep.subr.bf16.mxu1 %v4414_v41 }
 0x9f5   :  { %4376 = vmatprep.subr.msk.bf16.mxu0 %vm6183_vm6, %v4374_v29 }
 0x9f7   :  { %4417 = vmatpush3.bf16.msra.mxu1 %v4414_v41 }
 0x9f8   :  { %4419 = vmatprep.subr.bf16.mxu1 %v4418_v0 }
 0x9fb   :  { %4421 = vmatpush3.bf16.msra.mxu1 %v4418_v0 }
 0x9fc   :  { %4379 = vmatpush3.bf16.xpose.msk.msra.mxu0 %vm6183_vm6, %v4374_v29  ;;  %4423 = vmatprep.subr.bf16.mxu1 %v4422_v3 }
 0x9fd   :  { %4382 = vmatprep.subr.msk.bf16.mxu0 %vm6183_vm6, %v4380_v5 }
 0x9ff   :  { %4425 = vmatpush3.bf16.msra.mxu1 %v4422_v3 }
 0xa04   :  { %4385 = vmatpush3.bf16.xpose.msk.msra.mxu0 %vm6183_vm6, %v4380_v5 }
 0xa05   :  { %4388 = vmatprep.subr.msk.bf16.mxu0 %vm6183_vm6, %v4386_v7 }
 0xa0c   :  { %4391 = vmatpush3.bf16.xpose.msk.msra.mxu0 %vm6183_vm6, %v4386_v7 }
 0xa0d   :  { %4394 = vmatprep.subr.msk.bf16.mxu0 %vm6183_vm6, %v4392_v15 }
 0xa14   :  { %4397 = vmatpush3.bf16.xpose.msk.msra.mxu0 %vm6183_vm6, %v4392_v15 }
 0xa1b   :  { %4040 = vmatmul.mubr.msk.f32.vlgmr.msra.gmra.mrb[44].mxu0 %vm2056_vm5, %v6281_v12 }
 0xaad   :  { %v6317_v35 = vpop.f32.mrb[42].mxu0 }
 0xaae   :  { %v6319_v50 = vpop.f32.mrb[43].mxu0 }
 0xaee   :  { %v4041_v47 = vpop.f32.mrb[44].mxu0 }
 0xaef   :  { %v2461_v44 = vsel %vm6224_vm7, %v4041_v47, -1e+30  ;;  %v2451_v54 = vpop.f32.mrb[45].mxu0 }
 0xaf0   :  { %v2460_v8 = vsel %vm6228_vm8, %v2451_v54, -1e+30  ;;  %2464 = vmax.xlane.f32.xlu1 %v2461_v44 }
 0xaf1   :  { %2462 = vmax.xlane.f32.xlu0 %v2460_v8 }
 0xb01   :  { %4782 = vrot.lane.b32.xlu1 %v6128_v55, %s5183_s4 }
 0xb05   :  { %4792 = vrot.lane.b32.xlu1 %v6136_v30, %s5183_s4 }
 0xb07   :  { %4777 = vrot.lane.b32.xlu0 %v6161_v31, %s5182_s24 }
 0xb09   :  { %4802 = vrot.lane.b32.xlu1 %v6144_v6, %s5183_s4 }
 0xb0b   :  { %4787 = vrot.lane.b32.xlu0 %v6132_v32, %s5183_s4 }
 0xb0d   :  { %4812 = vrot.lane.b32.xlu1 %v6152_v39, %s5183_s4 }
 0xb0f   :  { %4797 = vrot.lane.b32.xlu0 %v6140_v38, %s5183_s4 }
 0xb11   :  { %2603 = vrot.lane.b32.xlu1 %v6163_v4, %s5184_s25 }
 0xb13   :  { %4807 = vrot.lane.b32.xlu0 %v6148_v45, %s5183_s4 }
 0xb15   :  { %4822 = vrot.lane.b32.xlu1 %v6128_v55, %s5185_s26 }
 0xb17   :  { %4817 = vrot.lane.b32.xlu0 %v6161_v31, %s5183_s4 }
 0xb19   :  { %4832 = vrot.lane.b32.xlu1 %v6136_v30, %s5185_s26 }
 0xb1b   :  { %2605 = vrot.lane.b32.xlu0 %v6220_v61, %s5184_s25 }
 0xb1d   :  { %4842 = vrot.lane.b32.xlu1 %v6144_v6, %s5185_s26 }
 0xb1f   :  { %4827 = vrot.lane.b32.xlu0 %v6132_v32, %s5185_s26 }
 0xb21   :  { %4852 = vrot.lane.b32.xlu1 %v6152_v39, %s5185_s26 }
 0xb23   :  { %4837 = vrot.lane.b32.xlu0 %v6140_v38, %s5185_s26 }
 0xb27   :  { %4847 = vrot.lane.b32.xlu0 %v6148_v45, %s5185_s26 }
 0xb7d   :  { %v2465_v52 = vpop.xlane.xlu1 %2464 }
 0xb7e   :  { %v2467_v12 = vsub.f32 %v2461_v44, %v2465_v52  ;;  %v2463_v46 = vpop.xlane.xlu0 %2462 }
 0xb7f   :  { %v2466_v60 = vsub.f32 %v2460_v8, %v2463_v46 }
 0xb80   :  { %v2470_v26 = vmul.f32 1.442695, %v2467_v12 }
 0xb81   :  { %v2468_v28 = vmul.f32 1.442695, %v2466_v60  ;;  %v4783_v34 = vpop.permute.xlu1 %4782 }
 0xb82   :  { %v4785_v57 = vunpack.i.h.bf16 %v4783_v34  ;;  %v4778_v56 = vpop.permute.xlu0 %4777  ;;  %v4784_v33 = vunpack.i.l.bf16 %v4783_v34 }
 0xb83   :  { %5147 = vpow2.f32 %v2468_v28  ;;  %v4780_v37 = vunpack.i.h.bf16 %v4778_v56  ;;  %v4779_v25 = vunpack.i.l.bf16 %v4778_v56 }
 0xb84   :  { %5149 = vpow2.f32 %v2470_v26  ;;  %v4430_v36 = vpack.c.bf16 %v4785_v57, %v4784_v33 }
 0xb85   :  { %v4426_v27 = vpack.c.bf16 %v4780_v37, %v4779_v25  ;;  %v4793_v23 = vpop.permute.xlu1 %4792 }
 0xb86   :  { %v4788_v20 = vpop.permute.xlu0 %4787  ;;  %v4795_v1 = vunpack.i.h.bf16 %v4793_v23  ;;  %v4794_v29 = vunpack.i.l.bf16 %v4793_v23 }
 0xb87   :  { %4427 = vmatprep.subr.bf16.mxu1 %v4426_v27  ;;  %v4790_v22 = vunpack.i.h.bf16 %v4788_v20  ;;  %v4789_v62 = vunpack.i.l.bf16 %v4788_v20 }
 0xb88   :  { %4429 = vmatpush3.bf16.msra.mxu1 %v4426_v27  ;;  %v4442_v59 = vpack.c.bf16 %v4795_v1, %v4794_v29 }
 0xb89   :  { %v4803_v63 = vpop.permute.xlu1 %4802  ;;  %4432 = vmatprep.subr.msk.bf16.mxu1 %vm6183_vm6, %v4430_v36  ;;  %v4436_v10 = vpack.c.bf16 %v4790_v22, %v4789_v62 }
 0xb8a   :  { %v4798_v48 = vpop.permute.xlu0 %4797  ;;  %v4805_v34 = vunpack.i.h.bf16 %v4803_v63  ;;  %v4804_v57 = vunpack.i.l.bf16 %v4803_v63 }
 0xb8b   :  { %v4800_v24 = vunpack.i.h.bf16 %v4798_v48  ;;  %v4799_v15 = vunpack.i.l.bf16 %v4798_v48 }
 0xb8c   :  { %v4454_v27 = vpack.c.bf16 %v4805_v34, %v4804_v57 }
 0xb8d   :  { %v6353_v17 = vpop.eup %5147  ;;  %v6355_v14 = vpop.permute.xlu1 %4812  ;;  %v4448_v12 = vpack.c.bf16 %v4800_v24, %v4799_v15 }
 0xb8e   :  { %v6357_v19 = vpop.eup %5149  ;;  %4074 = vmatprep.mubr.f32.mxu1 %v6353_v17  ;;  %v6360_v11 = vpop.permute.xlu0 %4807  ;;  %v4814_v1 = vunpack.i.l.bf16 %v6355_v14 }
 0xb8f   :  { %4075 = vmatmul.mubr.f32.vlgmr.msra.gmra.mrb[40].mxu1 %v6357_v19  ;;  %v4810_v63 = vunpack.i.h.bf16 %v6360_v11  ;;  %v4809_v22 = vunpack.i.l.bf16 %v6360_v11 }
 0xb91   :  { %v2604_v41 = vpop.permute.xlu1 %2603  ;;  %4435 = vmatpush3.bf16.xpose.msk.msra.mxu1 %vm6183_vm6, %v4430_v36 }
 0xb92   :  { %v6365_v2 = vpop.permute.xlu0 %4817  ;;  %4438 = vmatprep.subr.msk.bf16.mxu1 %vm6183_vm6, %v4436_v10  ;;  %4109 = vmatprep.mubr.msk.f32.mxu1 %vm2056_vm5, %v2604_v41  ;;  %v4815_v41 = vunpack.i.h.bf16 %v6355_v14 }
 0xb93   :  { %v4820_v11 = vunpack.i.h.bf16 %v6365_v2 }
 0xb94   :  { %v4466_v29 = vpack.c.bf16 %v4815_v41, %v4814_v1 }
 0xb95   :  { %v4823_v53 = vpop.permute.xlu1 %4822 }
 0xb96   :  { %v4825_v58 = vunpack.i.h.bf16 %v4823_v53  ;;  %v4824_v16 = vunpack.i.l.bf16 %v4823_v53  ;;  %v6370_v0 = vpop.permute.xlu0 %2605  ;;  %v4819_v53 = vunpack.i.l.bf16 %v6365_v2 }
 0xb98   :  { %v4478_v51 = vpack.c.bf16 %v4825_v58, %v4824_v16  ;;  %v4472_v58 = vpack.c.bf16 %v4820_v11, %v4819_v53 }
 0xb99   :  { %v4833_v3 = vpop.permute.xlu1 %4832  ;;  %4441 = vmatpush3.bf16.xpose.msk.msra.mxu1 %vm6183_vm6, %v4436_v10  ;;  %v4460_v10 = vpack.c.bf16 %v4810_v63, %v4809_v22 }
 0xb9a   :  { %4479 = vmatprep.subr.bf16.mxu0 %v4478_v51  ;;  %v4828_v5 = vpop.permute.xlu0 %4827  ;;  %4444 = vmatprep.subr.msk.bf16.mxu1 %vm6183_vm6, %v4442_v59  ;;  %v4835_v13 = vunpack.i.h.bf16 %v4833_v3  ;;  %v4834_v21 = vunpack.i.l.bf16 %v4833_v3 }
 0xb9b   :  { %v4830_v7 = vunpack.i.h.bf16 %v4828_v5  ;;  %v4829_v18 = vunpack.i.l.bf16 %v4828_v5  ;;  %4481 = vmatpush3.bf16.msra.mxu0 %v4478_v51 }
 0xb9c   :  { %v4486_v54 = vpack.c.bf16 %v4835_v13, %v4834_v21 }
 0xb9d   :  { %v4482_v47 = vpack.c.bf16 %v4830_v7, %v4829_v18  ;;  %v4843_v46 = vpop.permute.xlu1 %4842 }
 0xb9e   :  { %v4838_v44 = vpop.permute.xlu0 %4837  ;;  %v4845_v60 = vunpack.i.h.bf16 %v4843_v46  ;;  %v4844_v26 = vunpack.i.l.bf16 %v4843_v46 }
 0xb9f   :  { %v4840_v8 = vunpack.i.h.bf16 %v4838_v44  ;;  %v4839_v52 = vunpack.i.l.bf16 %v4838_v44  ;;  %4483 = vmatprep.subr.bf16.mxu0 %v4482_v47 }
 0xba0   :  { %4485 = vmatpush3.bf16.msra.mxu0 %v4482_v47  ;;  %v4494_v33 = vpack.c.bf16 %v4845_v60, %v4844_v26 }
 0xba1   :  { %4447 = vmatpush3.bf16.xpose.msk.msra.mxu1 %vm6183_vm6, %v4442_v59  ;;  %4487 = vmatprep.subr.bf16.mxu0 %v4486_v54  ;;  %v4490_v28 = vpack.c.bf16 %v4840_v8, %v4839_v52  ;;  %v4853_v23 = vpop.permute.xlu1 %4852 }
 0xba2   :  { %4450 = vmatprep.subr.msk.bf16.mxu1 %vm6183_vm6, %v4448_v12  ;;  %v4848_v56 = vpop.permute.xlu0 %4847  ;;  %v4855_v20 = vunpack.i.h.bf16 %v4853_v23  ;;  %v4854_v36 = vunpack.i.l.bf16 %v4853_v23 }
 0xba3   :  { %v4850_v37 = vunpack.i.h.bf16 %v4848_v56  ;;  %v4849_v25 = vunpack.i.l.bf16 %v4848_v56 }
 0xba4   :  { %4489 = vmatpush3.bf16.msra.mxu0 %v4486_v54  ;;  %v4502_v62 = vpack.c.bf16 %v4855_v20, %v4854_v36 }
 0xba5   :  { %4491 = vmatprep.subr.bf16.mxu0 %v4490_v28  ;;  %v4498_v48 = vpack.c.bf16 %v4850_v37, %v4849_v25 }
 0xba8   :  { %4493 = vmatpush3.bf16.msra.mxu0 %v4490_v28 }
 0xba9   :  { %4453 = vmatpush3.bf16.xpose.msk.msra.mxu1 %vm6183_vm6, %v4448_v12  ;;  %4495 = vmatprep.subr.bf16.mxu0 %v4494_v33 }
 0xbaa   :  { %4456 = vmatprep.subr.msk.bf16.mxu1 %vm6183_vm6, %v4454_v27 }
 0xbac   :  { %4497 = vmatpush3.bf16.msra.mxu0 %v4494_v33 }
 0xbad   :  { %4499 = vmatprep.subr.bf16.mxu0 %v4498_v48 }
 0xbb0   :  { %4501 = vmatpush3.bf16.msra.mxu0 %v4498_v48 }
 0xbb1   :  { %4459 = vmatpush3.bf16.xpose.msk.msra.mxu1 %vm6183_vm6, %v4454_v27  ;;  %4503 = vmatprep.subr.bf16.mxu0 %v4502_v62 }
 0xbb2   :  { %4462 = vmatprep.subr.msk.bf16.mxu1 %vm6183_vm6, %v4460_v10 }
 0xbb4   :  { %4505 = vmatpush3.bf16.msra.mxu0 %v4502_v62 }
 0xbb9   :  { %4465 = vmatpush3.bf16.xpose.msk.msra.mxu1 %vm6183_vm6, %v4460_v10 }
 0xbba   :  { %4468 = vmatprep.subr.msk.bf16.mxu1 %vm6183_vm6, %v4466_v29 }
 0xbc1   :  { %4471 = vmatpush3.bf16.xpose.msk.msra.mxu1 %vm6183_vm6, %v4466_v29 }
 0xbc2   :  { %4474 = vmatprep.subr.msk.bf16.mxu1 %vm6183_vm6, %v4472_v58 }
 0xbc9   :  { %4477 = vmatpush3.bf16.xpose.msk.msra.mxu1 %vm6183_vm6, %v4472_v58 }
 0xbd0   :  { %4110 = vmatmul.mubr.msk.f32.vlgmr.msra.gmra.mrb[42].mxu1 %vm2056_vm5, %v6370_v0 }
 0xc62   :  { %v6406_v14 = vpop.f32.mrb[40].mxu1 }
 0xc63   :  { %v6408_v16 = vpop.f32.mrb[41].mxu1 }
 0xca3   :  { %v4111_v59 = vpop.f32.mrb[42].mxu1 }
 0xca4   :  { %v2751_v2 = vsel %vm6224_vm7, %v4111_v59, -1e+30  ;;  %v2741_v51 = vpop.f32.mrb[43].mxu1 }
 0xca5   :  { %v2750_v3 = vsel %vm6228_vm8, %v2741_v51, -1e+30  ;;  %2754 = vmax.xlane.f32.xlu1 %v2751_v2 }
 0xca6   :  { %2752 = vmax.xlane.f32.xlu0 %v2750_v3 }
 0xcb6   :  { %4862 = vrot.lane.b32.xlu1 %v6128_v55, %s5186_s27 }
 0xcba   :  { %4872 = vrot.lane.b32.xlu1 %v6136_v30, %s5186_s27 }
 0xcbc   :  { %4857 = vrot.lane.b32.xlu0 %v6161_v31, %s5185_s26 }
 0xcbe   :  { %4882 = vrot.lane.b32.xlu1 %v6144_v6, %s5186_s27 }
 0xcc0   :  { %4867 = vrot.lane.b32.xlu0 %v6132_v32, %s5186_s27 }
 0xcc2   :  { %4892 = vrot.lane.b32.xlu1 %v6152_v39, %s5186_s27 }
 0xcc4   :  { %4877 = vrot.lane.b32.xlu0 %v6140_v38, %s5186_s27 }
 0xcc6   :  { %2893 = vrot.lane.b32.xlu1 %v6163_v4, %s5187_s28 }
 0xcc8   :  { %4887 = vrot.lane.b32.xlu0 %v6148_v45, %s5186_s27 }
 0xcca   :  { %4902 = vrot.lane.b32.xlu1 %v6128_v55, %s5188_s0 }
 0xccc   :  { %4897 = vrot.lane.b32.xlu0 %v6161_v31, %s5186_s27 }
 0xcce   :  { %4907 = vrot.lane.b32.xlu1 %v6132_v32, %s5188_s0 }
 0xcd0   :  { %2895 = vrot.lane.b32.xlu0 %v6220_v61, %s5187_s28 }
 0xcd2   :  { %4917 = vrot.lane.b32.xlu1 %v6140_v38, %s5188_s0 }
 0xcd4   :  { %4912 = vrot.lane.b32.xlu0 %v6136_v30, %s5188_s0 }
 0xcd8   :  { %4922 = vrot.lane.b32.xlu0 %v6144_v6, %s5188_s0 }
 0xcdc   :  { %4927 = vrot.lane.b32.xlu0 %v6148_v45, %s5188_s0 }
 0xd32   :  { %v2755_v55 = vpop.xlane.xlu1 %2754 }
 0xd33   :  { %v2757_v4 = vsub.f32 %v2751_v2, %v2755_v55  ;;  %v2753_v0 = vpop.xlane.xlu0 %2752 }
 0xd34   :  { %v2756_v5 = vsub.f32 %v2750_v3, %v2753_v0 }
 0xd35   :  { %v2760_v13 = vmul.f32 1.442695, %v2757_v4 }
 0xd36   :  { %v2758_v32 = vmul.f32 1.442695, %v2756_v5  ;;  %v4863_v21 = vpop.permute.xlu1 %4862 }
 0xd37   :  { %v4865_v61 = vunpack.i.h.bf16 %v4863_v21  ;;  %v4858_v7 = vpop.permute.xlu0 %4857  ;;  %v4864_v38 = vunpack.i.l.bf16 %v4863_v21 }
 0xd38   :  { %5151 = vpow2.f32 %v2758_v32  ;;  %v4860_v18 = vunpack.i.h.bf16 %v4858_v7  ;;  %v4859_v24 = vunpack.i.l.bf16 %v4858_v7 }
 0xd39   :  { %5153 = vpow2.f32 %v2760_v13  ;;  %v4510_v47 = vpack.c.bf16 %v4865_v61, %v4864_v38 }
 0xd3a   :  { %v4506_v30 = vpack.c.bf16 %v4860_v18, %v4859_v24  ;;  %v4873_v15 = vpop.permute.xlu1 %4872 }
 0xd3b   :  { %v4868_v6 = vpop.permute.xlu0 %4867  ;;  %v4875_v57 = vunpack.i.h.bf16 %v4873_v15  ;;  %v4874_v56 = vunpack.i.l.bf16 %v4873_v15 }
 0xd3c   :  { %4507 = vmatprep.subr.bf16.mxu0 %v4506_v30  ;;  %v4870_v54 = vunpack.i.h.bf16 %v4868_v6  ;;  %v4869_v8 = vunpack.i.l.bf16 %v4868_v6 }
 0xd3d   :  { %4509 = vmatpush3.bf16.msra.mxu0 %v4506_v30  ;;  %v4522_v23 = vpack.c.bf16 %v4875_v57, %v4874_v56 }
 0xd3e   :  { %v4883_v45 = vpop.permute.xlu1 %4882  ;;  %4512 = vmatprep.subr.msk.bf16.mxu0 %vm6183_vm6, %v4510_v47  ;;  %v4516_v26 = vpack.c.bf16 %v4870_v54, %v4869_v8 }
 0xd3f   :  { %v4878_v44 = vpop.permute.xlu0 %4877  ;;  %v4885_v5 = vunpack.i.h.bf16 %v4883_v45  ;;  %v4884_v13 = vunpack.i.l.bf16 %v4883_v45 }
 0xd40   :  { %v4880_v41 = vunpack.i.h.bf16 %v4878_v44  ;;  %v4879_v1 = vunpack.i.l.bf16 %v4878_v44 }
 0xd41   :  { %v4534_v7 = vpack.c.bf16 %v4885_v5, %v4884_v13 }
 0xd42   :  { %v6440_v52 = vpop.eup %5151  ;;  %v6442_v12 = vpop.permute.xlu1 %4892  ;;  %v4528_v51 = vpack.c.bf16 %v4880_v41, %v4879_v1 }
 0xd43   :  { %v6444_v46 = vpop.eup %5153  ;;  %4144 = vmatprep.mubr.f32.mxu0 %v6440_v52  ;;  %v6447_v60 = vpop.permute.xlu0 %4887  ;;  %v4895_v15 = vunpack.i.h.bf16 %v6442_v12  ;;  %v4894_v6 = vunpack.i.l.bf16 %v6442_v12 }
 0xd44   :  { %4145 = vmatmul.mubr.f32.vlgmr.msra.gmra.mrb[46].mxu0 %v6444_v46  ;;  %v4890_v18 = vunpack.i.h.bf16 %v6447_v60  ;;  %v4889_v24 = vunpack.i.l.bf16 %v6447_v60 }
 0xd46   :  { %v2894_v28 = vpop.permute.xlu1 %2893  ;;  %4515 = vmatpush3.bf16.xpose.msk.msra.mxu0 %vm6183_vm6, %v4510_v47  ;;  %v4540_v30 = vpack.c.bf16 %v4890_v18, %v4889_v24  ;;  %v4546_v47 = vpack.c.bf16 %v4895_v15, %v4894_v6 }
 0xd47   :  { %v6452_v34 = vpop.permute.xlu0 %4897  ;;  %4518 = vmatprep.subr.msk.bf16.mxu0 %vm6183_vm6, %v4516_v26  ;;  %4179 = vmatprep.mubr.msk.f32.mxu0 %vm2056_vm5, %v2894_v28 }
 0xd48   :  { %v4900_v45 = vunpack.i.h.bf16 %v6452_v34  ;;  %v4899_v44 = vunpack.i.l.bf16 %v6452_v34 }
 0xd4a   :  { %v4903_v33 = vpop.permute.xlu1 %4902  ;;  %v4552_v54 = vpack.c.bf16 %v4900_v45, %v4899_v44 }
 0xd4b   :  { %v4905_v37 = vunpack.i.h.bf16 %v4903_v33  ;;  %v4904_v25 = vunpack.i.l.bf16 %v4903_v33  ;;  %v6457_v27 = vpop.permute.xlu0 %2895 }
 0xd4d   :  { %v4558_v20 = vpack.c.bf16 %v4905_v37, %v4904_v25 }
 0xd4e   :  { %v4908_v36 = vpop.permute.xlu1 %4907  ;;  %4521 = vmatpush3.bf16.xpose.msk.msra.mxu0 %vm6183_vm6, %v4516_v26 }
 0xd4f   :  { %v4910_v48 = vunpack.i.h.bf16 %v4908_v36  ;;  %v4909_v63 = vunpack.i.l.bf16 %v4908_v36  ;;  %4559 = vmatprep.subr.bf16.mxu1 %v4558_v20  ;;  %v4913_v22 = vpop.permute.xlu0 %4912  ;;  %4524 = vmatprep.subr.msk.bf16.mxu0 %vm6183_vm6, %v4522_v23  ;;  %v6575_v36 = vld [vmem:[#allocation4_spill] sm:$0xff] }
 0xd50   :  { %v4915_v62 = vunpack.i.h.bf16 %v4913_v22  ;;  %v4914_v10 = vunpack.i.l.bf16 %v4913_v22  ;;  %4561 = vmatpush3.bf16.msra.mxu1 %v4558_v20  ;;  %v6574_v20 = vld [vmem:[#allocation5_spill] sm:$0xff]  ;;  %v6578_v22 = vld [vmem:[#allocation2_spill] sm:$0xff] }
 0xd51   :  { %v4562_v29 = vpack.c.bf16 %v4910_v48, %v4909_v63  ;;  %v6576_v48 = vpack.i.bf16 %v6574_v20, %v6575_v36  ;;  %v6577_v63 = vld [vmem:[#allocation3_spill] sm:$0xff] }
 0xd52   :  { %v4566_v11 = vpack.c.bf16 %v4915_v62, %v4914_v10  ;;  %v4918_v53 = vpop.permute.xlu1 %4917  ;;  %v6579_v62 = vpack.i.bf16 %v6577_v63, %v6578_v22 }
 0xd53   :  { %v4920_v58 = vunpack.i.h.bf16 %v4918_v53  ;;  %v4919_v59 = vunpack.i.l.bf16 %v4918_v53  ;;  %4563 = vmatprep.subr.bf16.mxu1 %v4562_v29  ;;  %v4923_v2 = vpop.permute.xlu0 %4922 }
 0xd54   :  { %4565 = vmatpush3.bf16.msra.mxu1 %v4562_v29  ;;  %v4925_v55 = vunpack.i.h.bf16 %v4923_v2  ;;  %v4924_v4 = vunpack.i.l.bf16 %v4923_v2 }
 0xd55   :  { %4567 = vmatprep.subr.bf16.mxu1 %v4566_v11  ;;  %v4570_v3 = vpack.c.bf16 %v4920_v58, %v4919_v59 }
 0xd56   :  { %4527 = vmatpush3.bf16.xpose.msk.msra.mxu0 %vm6183_vm6, %v4522_v23  ;;  %v4574_v32 = vpack.c.bf16 %v4925_v55, %v4924_v4 }
 0xd57   :  { %4530 = vmatprep.subr.msk.bf16.mxu0 %vm6183_vm6, %v4528_v51  ;;  %v4928_v0 = vpop.permute.xlu0 %4927 }
 0xd58   :  { %4569 = vmatpush3.bf16.msra.mxu1 %v4566_v11  ;;  %v4930_v21 = vunpack.i.h.bf16 %v4928_v0  ;;  %v4929_v61 = vunpack.i.l.bf16 %v4928_v0 }
 0xd59   :  { %4571 = vmatprep.subr.bf16.mxu1 %v4570_v3 }
 0xd5a   :  { %v4578_v38 = vpack.c.bf16 %v4930_v21, %v4929_v61 }
 0xd5c   :  { %4573 = vmatpush3.bf16.msra.mxu1 %v4570_v3 }
 0xd5d   :  { %4575 = vmatprep.subr.bf16.mxu1 %v4574_v32 }
 0xd5e   :  { %4533 = vmatpush3.bf16.xpose.msk.msra.mxu0 %vm6183_vm6, %v4528_v51 }
 0xd5f   :  { %4536 = vmatprep.subr.msk.bf16.mxu0 %vm6183_vm6, %v4534_v7 }
 0xd60   :  { %4577 = vmatpush3.bf16.msra.mxu1 %v4574_v32 }
 0xd61   :  { %4579 = vmatprep.subr.bf16.mxu1 %v4578_v38 }
 0xd64   :  { %4581 = vmatpush3.bf16.msra.mxu1 %v4578_v38 }
 0xd66   :  { %4539 = vmatpush3.bf16.xpose.msk.msra.mxu0 %vm6183_vm6, %v4534_v7 }
 0xd67   :  { %4542 = vmatprep.subr.msk.bf16.mxu0 %vm6183_vm6, %v4540_v30 }
 0xd6e   :  { %4545 = vmatpush3.bf16.xpose.msk.msra.mxu0 %vm6183_vm6, %v4540_v30 }
 0xd6f   :  { %4548 = vmatprep.subr.msk.bf16.mxu0 %vm6183_vm6, %v4546_v47 }
 0xd76   :  { %4551 = vmatpush3.bf16.xpose.msk.msra.mxu0 %vm6183_vm6, %v4546_v47 }
 0xd77   :  { %4554 = vmatprep.subr.msk.bf16.mxu0 %vm6183_vm6, %v4552_v54 }
 0xd7e   :  { %4557 = vmatpush3.bf16.xpose.msk.msra.mxu0 %vm6183_vm6, %v4552_v54 }
 0xd85   :  { %4180 = vmatmul.mubr.msk.f32.vlgmr.msra.gmra.mrb[48].mxu0 %vm2056_vm5, %v6457_v27 }
 0xe17   :  { %v4146_v8 = vpop.f32.mrb[46].mxu0 }
 0xe18   :  { %v2880_v12 = vpop.f32.mrb[47].mxu0 }
 0xe58   :  { %v4181_v60 = vpop.f32.mrb[48].mxu0 }
 0xe59   :  { %v3041_v26 = vsel %vm6224_vm7, %v4181_v60, -1e+30  ;;  %v3031_v28 = vpop.f32.mrb[49].mxu0 }
 0xe5a   :  { %v3040_v34 = vsel %vm6228_vm8, %v3031_v28, -1e+30  ;;  %3044 = vmax.xlane.f32.xlu1 %v3041_v26 }
 0xe5b   :  { %3042 = vmax.xlane.f32.xlu0 %v3040_v34 }
 0xe6b   :  { %4932 = vrot.lane.b32.xlu1 %v6152_v39, %s5188_s0 }
 0xe71   :  { %4937 = vrot.lane.b32.xlu0 %v6161_v31, %s5188_s0 }
 0xe8f   :  { %2472 = vadd.xlane.f32.xlu1 %v6353_v17 }
 0xe90   :  { %2474 = vadd.xlane.f32.xlu0 %v6357_v19 }
 0xe93   :  { %2764 = vadd.xlane.f32.xlu1 %v6444_v46 }
 0xe94   :  { %2762 = vadd.xlane.f32.xlu0 %v6440_v52 }
 0xee7   :  { %v3045_v43 = vpop.xlane.xlu1 %3044 }
 0xee8   :  { %v3047_v42 = vsub.f32 %v3041_v26, %v3045_v43  ;;  %v3043_v40 = vpop.xlane.xlu0 %3042 }
 0xee9   :  { %v3046_v57 = vsub.f32 %v3040_v34, %v3043_v40 }
 0xeea   :  { %v3050_v56 = vmul.f32 1.442695, %v3047_v42 }
 0xeeb   :  { %v3048_v33 = vmul.f32 1.442695, %v3046_v57  ;;  %v4933_v37 = vpop.permute.xlu1 %4932 }
 0xeec   :  { %5155 = vpow2.f32 %v3050_v56  ;;  %v4935_v39 = vunpack.i.h.bf16 %v4933_v37  ;;  %v4934_v25 = vunpack.i.l.bf16 %v4933_v37  ;;  %v4938_v27 = vpop.permute.xlu0 %4937 }
 0xeed   :  { %5157 = vpow2.f32 %v3048_v33  ;;  %v4940_v31 = vunpack.i.h.bf16 %v4938_v27  ;;  %v4939_v17 = vunpack.i.l.bf16 %v4938_v27 }
 0xeee   :  { %v4582_v23 = vpack.c.bf16 %v4935_v39, %v4934_v25 }
 0xeef   :  { %v4586_v19 = vpack.c.bf16 %v4940_v31, %v4939_v17 }
 0xef0   :  { %4583 = vmatprep.subr.bf16.mxu1 %v4582_v23 }
 0xef1   :  { %4585 = vmatpush3.bf16.msra.mxu1 %v4582_v23 }
 0xef2   :  { %4587 = vmatprep.subr.bf16.mxu1 %v4586_v19 }
 0xef5   :  { %4589 = vmatpush3.bf16.msra.mxu1 %v4586_v19 }
 0xef6   :  { %v5156_v52 = vpop.eup %5155 }
 0xef7   :  { %v5158_v46 = vpop.eup %5157  ;;  %3054 = vadd.xlane.f32.xlu1 %v5156_v52 }
 0xef8   :  { %3052 = vadd.xlane.f32.xlu0 %v5158_v46  ;;  %4214 = vmatprep.mubr.f32.mxu1 %v5158_v46 }
 0xef9   :  { %4215 = vmatmul.mubr.f32.vlgmr.msra.gmra.mrb[44].mxu1 %v5156_v52 }
 0xefb   :  { %2184 = vadd.xlane.f32.xlu1 %v6268_v9 }
 0xefc   :  { %2182 = vadd.xlane.f32.xlu0 %v6264_v49 }
 0xf0c   :  { %4947 = vrot.lane.b32.xlu1 %v6576_v48, %s5189_s29 }
 0xf12   :  { %4942 = vrot.lane.b32.xlu0 %v6579_v62, %s5189_s29 }
 0xf1c   :  { %v2473_v10 = vpop.xlane.xlu1 %2472 }
 0xf1d   :  { %5159 = vrcp.f32 %v2473_v10  ;;  %v2475_v41 = vpop.xlane.xlu0 %2474 }
 0xf1e   :  { %5161 = vrcp.f32 %v2475_v41 }
 0xf20   :  { %v2765_v1 = vpop.xlane.xlu1 %2764 }
 0xf21   :  { %5163 = vrcp.f32 %v2765_v1  ;;  %v2763_v9 = vpop.xlane.xlu0 %2762 }
 0xf22   :  { %5165 = vrcp.f32 %v2763_v9 }
 0xf27   :  { %v5160_v49 = vpop.eup %5159 }
 0xf28   :  { %v5162_v29 = vpop.eup %5161  ;;  %v2601_v11 = vmul.f32 %v5160_v49, %v6408_v16 }
 0xf29   :  { %v2602_v53 = vmul.f32 %v5162_v29, %v6406_v14 }
 0xf2a   :  { %3185 = vrot.lane.b32.xlu1 %v2601_v11, %s5190_s30 }
 0xf2b   :  { %v5164_v58 = vpop.eup %5163  ;;  %3187 = vrot.lane.b32.xlu0 %v2602_v53, %s5190_s30 }
 0xf2c   :  { %v5166_v59 = vpop.eup %5165  ;;  %v2892_v2 = vmul.f32 %v5164_v58, %v4146_v8  ;;  %v6580_v8 = vld [vmem:[#allocation9_spill] sm:$0xff] }
 0xf2d   :  { %v2891_v51 = vmul.f32 %v5166_v59, %v2880_v12 }
 0xf2f   :  { %3195 = vrot.lane.b32.xlu0 %v2892_v2, %s5191_s5  ;;  %3193 = vrot.lane.b32.xlu1 %v2891_v51, %s5191_s5 }
 0xf84   :  { %v3055_v3 = vpop.xlane.xlu1 %3054 }
 0xf85   :  { %v3053_v55 = vpop.xlane.xlu0 %3052 }
 0xf88   :  { %v2185_v4 = vpop.xlane.xlu1 %2184 }
 0xf89   :  { %5167 = vrcp.f32 %v2185_v4  ;;  %v2183_v0 = vpop.xlane.xlu0 %2182 }
 0xf8a   :  { %5169 = vrcp.f32 %v2183_v0 }
 0xf8b   :  { %5171 = vrcp.f32 %v3055_v3 }
 0xf8c   :  { %v4948_v5 = vpop.permute.xlu1 %4947  ;;  %5173 = vrcp.f32 %v3053_v55 }
 0xf8d   :  { %v4950_v16 = vunpack.i.h.bf16 %v4948_v5  ;;  %v4949_v13 = vunpack.i.l.bf16 %v4948_v5  ;;  %v4943_v14 = vpop.permute.xlu0 %4942 }
 0xf8e   :  { %v4945_v32 = vunpack.i.h.bf16 %v4943_v14  ;;  %v4944_v21 = vunpack.i.l.bf16 %v4943_v14 }
 0xf8f   :  { %v4594_v61 = vpack.c.bf16 %v4950_v16, %v4949_v13 }
 0xf90   :  { %v4590_v7 = vpack.c.bf16 %v4945_v32, %v4944_v21 }
 0xf92   :  { %4591 = vmatprep.subr.bf16.mxu1 %v4590_v7 }
 0xf93   :  { %v5168_v38 = vpop.eup %5167  ;;  %4593 = vmatpush3.bf16.msra.mxu1 %v4590_v7 }
 0xf94   :  { %v5170_v18 = vpop.eup %5169  ;;  %v2312_v24 = vmul.f32 %v5168_v38, %v6317_v35  ;;  %4595 = vmatprep.subr.bf16.mxu1 %v4594_v61  ;;  %v5175_v35 = vld [vmem:[%s6541_s10] ss:$0 sm:$0xff] }
 0xf95   :  { %v2311_v30 = vmul.f32 %v5170_v18, %v6319_v50  ;;  %v5172_v15 = vpop.eup %5171  ;;  %v6581_v50 = vld [vmem:[#allocation8_spill] sm:$0xff] }
 0xf96   :  { %v5174_v47 = vpop.eup %5173 }
 0xf97   :  { %4597 = vmatpush3.bf16.msra.mxu1 %v4594_v61 }
 0xf9c   :  { %v3186_v60 = vpop.permute.xlu1 %3185 }
 0xf9d   :  { %v3188_v12 = vpop.permute.xlu0 %3187  ;;  %v3207_v34 = vsel %vm2056_vm5, %v2311_v30, %v3186_v60 }
 0xf9e   :  { %v3208_v42 = vsel %vm2056_vm5, %v2312_v24, %v3188_v12 }
 0xfa1   :  { %v3196_v26 = vpop.permute.xlu0 %3195  ;;  %v3194_v28 = vpop.permute.xlu1 %3193 }
 0xfa2   :  { %v3210_v40 = vsel %vm3209_vm9, %v3207_v34, %v3194_v28  ;;  %v3211_v56 = vsel %vm3209_vm9, %v3208_v42, %v3196_v26 }
 0xfcc   :  { %v4216_v6 = vpop.f32.mrb[44].mxu1 }
 0xfcd   :  { %v3182_v45 = vmul.f32 %v5172_v15, %v4216_v6  ;;  %v3170_v44 = vpop.f32.mrb[45].mxu1 }
 0xfce   :  { %v3181_v54 = vmul.f32 %v5174_v47, %v3170_v44 }
 0xfcf   :  { %3203 = vrot.lane.b32.xlu0 %v3182_v45, %s5192_s13 }
 0xfd0   :  { %3201 = vrot.lane.b32.xlu1 %v3181_v54, %s5192_s13 }
 0xfd3   :  { %3317 = vrot.lane.b32.xlu0 %v6580_v8, %s5177_s9 }
 0xfd4   :  { %3231 = vrot.lane.b32.xlu1 %v5175_v35, %s5189_s29 }
 0xfd8   :  { %3319 = vrot.lane.b32.xlu1 %v6581_v50, %s5177_s9 }
0x1041   :  { %v3204_v43 = vpop.permute.xlu0 %3203 }
0x1042   :  { %v3202_v57 = vpop.permute.xlu1 %3201  ;;  %v3214_v37 = vsel %vm3212_vm10, %v3211_v56, %v3204_v43 }
0x1043   :  { %v3213_v33 = vsel %vm3212_vm10, %v3210_v40, %v3202_v57 }
0x1044   :  { %4225 = vmatprep.mubr.msk.f32.mxu1 %vm341_vm4, %v3213_v33 }
0x1045   :  { %4226 = vmatmul.mubr.msk.f32.vlgmr.msra.gmra.mrb[46].mxu1 %vm341_vm4, %v3214_v37  ;;  %v3318_v19 = vpop.permute.xlu0 %3317 }
0x1046   :  { %v3232_v39 = vpop.permute.xlu1 %3231 }
0x104a   :  { %v3320_v17 = vpop.permute.xlu1 %3319 }
0x1118   :  { %v4227_v25 = vpop.f32.mrb[46].mxu1 }
0x1119   :  { %v3312_v27 = vadd.f32 %v4227_v25, %v3232_v39  ;;  %v3306_v31 = vpop.f32.mrb[47].mxu1 }
0x111a   :  { %v3307_v23 = vadd.f32 %v3306_v31, %v3232_v39 }
0x111b   :  { %v3324_v52 = vadd.f32 %v3320_v17, %v3312_v27 }
0x111c   :  { %v3323_v46 = vadd.f32 %v3318_v19, %v3307_v23 }
0x111d   :  { %3327 = vst.msk [vmem:[%s6549_s12 + $0x8] sm:$0xff] %vm3325_vm11, %v3324_v52 }
0x111e   :  { %3326 = vst.msk [vmem:[%s6549_s12] sm:$0xff] %vm3325_vm11, %v3323_v46 }

</bundles_post_ra>
